<compile_context>
chip_gen: v6e
topology: v6e:2x2x1
jax: 0.10.0
libtpu: 0.0.40
codegen_flags: <defaults>
</compile_context>

<pallas_src>
import functools
import math

import jax
import jax.numpy as jnp
from jax.experimental import pallas as pl
from jax.experimental.pallas import tpu as pltpu

EPS = 1e-6        # LayerNorm eps (Annotated-Transformer default)
NEG_INF = -1e9    # masked_fill value (used as additive bias)

PARAM_ORDER = (
    "ln1_g", "ln1_b", "wqkv", "bqkv", "wo_s", "bo_s",
    "ln2_g", "ln2_b", "wq", "bq", "wkv", "bkv", "wo_c", "bo_c",
    "ln3_g", "ln3_b", "w1", "b1", "w2", "b2",
    "norm_g", "norm_b",
)


# ----------------------------------------------------------------------------
# In-kernel helpers (traced inside the Pallas kernel)
# ----------------------------------------------------------------------------
def _ln(x, g, b):
    """Annotated-Transformer LayerNorm: unbiased std (ddof=1), eps added to std."""
    d = x.shape[-1]
    mean = jnp.mean(x, axis=-1, keepdims=True)
    var = jnp.sum((x - mean) ** 2, axis=-1, keepdims=True) / (d - 1)
    std = jnp.sqrt(var)
    return g * (x - mean) / (std + EPS) + b


def _mha(q, k, v, bias, wo, bo, n_heads):
    """q: (Tq,D) f32 (scale already folded in), k/v: (Tk,D) f32,
    bias: additive f32 broadcastable to (Tq,Tk), wo: (D,D) bf16, bo: (1,D) f32.
    Heads live on the lane axis; contexts are lane-concatenated so the output
    projection is a single MXU matmul."""
    _, D = q.shape
    dk = D // n_heads
    ctxs = []
    for h in range(n_heads):                      # static unroll
        sl = slice(h * dk, (h + 1) * dk)
        qh = q[:, sl].astype(jnp.bfloat16)
        kh = k[:, sl].astype(jnp.bfloat16)
        vh = v[:, sl].astype(jnp.bfloat16)
        # scores = q_h @ k_h^T (contract over dk, no explicit transpose)
        s = jax.lax.dot_general(qh, kh, (((1,), (1,)), ((), ())),
                                preferred_element_type=jnp.float32)   # (Tq,Tk)
        s = s + bias                               # hoisted additive mask
        s = s - jnp.max(s, axis=-1, keepdims=True)
        p = jnp.exp(s)
        p = p * pl.reciprocal(jnp.sum(p, axis=-1, keepdims=True), approx=True)
        ctxs.append(jnp.dot(p.astype(jnp.bfloat16), vh,
                            preferred_element_type=jnp.float32))      # (Tq,dk)
    ctx = jnp.concatenate(ctxs, axis=-1)           # (Tq, D)
    return jnp.dot(ctx.astype(jnp.bfloat16), wo,
                   preferred_element_type=jnp.float32) + bo


# ----------------------------------------------------------------------------
# Fused whole-decoder kernel: one grid step per batch row, all layers inside.
# ----------------------------------------------------------------------------
def _decoder_kernel(x_ref, mem_ref, tb_ref, sb_ref,
                    ln1_g, ln1_b, wqkv, bqkv, wo_s, bo_s,
                    ln2_g, ln2_b, wq, bq, wkv, bkv, wo_c, bo_c,
                    ln3_g, ln3_b, w1, b1, w2, b2,
                    norm_g, norm_b,
                    o_ref, *, n_layers, n_heads, scale):
    x = x_ref[0]            # (T, D) f32 — resident on-chip for the whole stack
    mem = mem_ref[0]        # (Ts, D) f32 (memory is NOT normed)
    tb = tb_ref[0]          # (T, T) or (1, T)  additive tgt bias
    sb = sb_ref[0]          # (1, Ts)            additive src bias
    ng = norm_g[...]
    nb = norm_b[...]
    D = x.shape[-1]

    for l in range(n_layers):                       # static unroll over layers
        # ---- sublayer 1: masked self-attention + residual -----------------
        nx = _ln(x, ln1_g[l], ln1_b[l])
        qkv = jnp.dot(nx.astype(jnp.bfloat16), wqkv[l],
                      preferred_element_type=jnp.float32) + bqkv[l]    # (T,3D)
        q = qkv[:, :D] * scale
        x = x + _mha(q, qkv[:, D:2 * D], qkv[:, 2 * D:], tb,
                     wo_s[l], bo_s[l], n_heads)

        # ---- sublayer 2: cross-attention over memory + residual -----------
        # TODO(synk): for autoregressive decoding, cache mem@wkv+bkv across steps.
        nx = _ln(x, ln2_g[l], ln2_b[l])
        q = (jnp.dot(nx.astype(jnp.bfloat16), wq[l],
                     preferred_element_type=jnp.float32) + bq[l]) * scale
        kv = jnp.dot(mem.astype(jnp.bfloat16), wkv[l],
                     preferred_element_type=jnp.float32) + bkv[l]      # (Ts,2D)
        x = x + _mha(q, kv[:, :D], kv[:, D:], sb, wo_c[l], bo_c[l], n_heads)

        # ---- sublayer 3: position-wise FFN + residual ----------------------
        nx = _ln(x, ln3_g[l], ln3_b[l])
        h = jnp.maximum(
            jnp.dot(nx.astype(jnp.bfloat16), w1[l],
                    preferred_element_type=jnp.float32) + b1[l], 0.0)
        x = x + jnp.dot(h.astype(jnp.bfloat16), w2[l],
                        preferred_element_type=jnp.float32) + b2[l]

        # ---- shared Decoder LayerNorm: reference applies it after EVERY layer
        x = _ln(x, ng, nb)

    o_ref[0] = x


# ----------------------------------------------------------------------------
# Host-side wrapper
# ----------------------------------------------------------------------------
def _mask_to_bias(mask):
    """(… , R, C) {0,1} mask -> additive f32 bias of shape (Bm, R, C)."""
    bias = jnp.where(mask == 0, jnp.float32(NEG_INF), jnp.float32(0.0))
    return bias.reshape((-1,) + bias.shape[-2:]).astype(jnp.float32)


def decoder_forward(params, x, memory, src_mask, tgt_mask, n_heads):
    B, T, D = x.shape
    Ts = memory.shape[1]
    L = params["wqkv"].shape[0]
    scale = 1.0 / math.sqrt(D // n_heads)

    tgt_bias = _mask_to_bias(tgt_mask)      # (1 or B, T or 1, T)
    src_bias = _mask_to_bias(src_mask)      # (1 or B, 1, Ts)

    t_ix = (lambda b: (b, 0, 0)) if tgt_bias.shape[0] == B else (lambda b: (0, 0, 0))
    s_ix = (lambda b: (b, 0, 0)) if src_bias.shape[0] == B else (lambda b: (0, 0, 0))

    def const_spec(a):
        nd = a.ndim
        return pl.BlockSpec(a.shape, lambda b, _nd=nd: (0,) * _nd)

    in_specs = [
        pl.BlockSpec((1, T, D), lambda b: (b, 0, 0)),          # x
        pl.BlockSpec((1, Ts, D), lambda b: (b, 0, 0)),         # memory
        pl.BlockSpec((1,) + tgt_bias.shape[1:], t_ix),         # tgt additive bias
        pl.BlockSpec((1,) + src_bias.shape[1:], s_ix),         # src additive bias
    ] + [const_spec(params[name]) for name in PARAM_ORDER]

    kernel = functools.partial(_decoder_kernel, n_layers=L,
                               n_heads=n_heads, scale=scale)

    return pl.pallas_call(
        kernel,
        out_shape=jax.ShapeDtypeStruct((B, T, D), jnp.float32),
        grid=(B,),
        in_specs=in_specs,
        out_specs=pl.BlockSpec((1, T, D), lambda b: (b, 0, 0)),
        compiler_params=pltpu.CompilerParams(dimension_semantics=("parallel",)),
    )(x, memory, tgt_bias, src_bias, *[params[name] for name in PARAM_ORDER])


# ----------------------------------------------------------------------------
# Deterministic parameter construction (fused QKV / KV weights, layer-stacked)
# ----------------------------------------------------------------------------
def _init_linear(key, din, dout):
    kw, kb = jax.random.split(key)
    bound = 1.0 / math.sqrt(din)
    w = jax.random.uniform(kw, (din, dout), jnp.float32, -bound, bound)
    b = jax.random.uniform(kb, (1, dout), jnp.float32, -bound, bound)
    return w, b


def init_decoder(key, n_layers, d_model, d_ff):
    layers = []
    for lk in jax.random.split(key, n_layers):
        ks = jax.random.split(lk, 10)
        wq_s, bq_s = _init_linear(ks[0], d_model, d_model)
        wk_s, bk_s = _init_linear(ks[1], d_model, d_model)
        wv_s, bv_s = _init_linear(ks[2], d_model, d_model)
        wo_s, bo_s = _init_linear(ks[3], d_model, d_model)
        wq_c, bq_c = _init_linear(ks[4], d_model, d_model)
        wk_c, bk_c = _init_linear(ks[5], d_model, d_model)
        wv_c, bv_c = _init_linear(ks[6], d_model, d_model)
        wo_c, bo_c = _init_linear(ks[7], d_model, d_model)
        w1, b1 = _init_linear(ks[8], d_model, d_ff)
        w2, b2 = _init_linear(ks[9], d_ff, d_model)
        ones = jnp.ones((1, d_model), jnp.float32)
        zeros = jnp.zeros((1, d_model), jnp.float32)
        layers.append(dict(
            ln1_g=ones, ln1_b=zeros,
            wqkv=jnp.concatenate([wq_s, wk_s, wv_s], axis=1).astype(jnp.bfloat16),
            bqkv=jnp.concatenate([bq_s, bk_s, bv_s], axis=1),
            wo_s=wo_s.astype(jnp.bfloat16), bo_s=bo_s,
            ln2_g=ones, ln2_b=zeros,
            wq=wq_c.astype(jnp.bfloat16), bq=bq_c,
            wkv=jnp.concatenate([wk_c, wv_c], axis=1).astype(jnp.bfloat16),
            bkv=jnp.concatenate([bk_c, bv_c], axis=1),
            wo_c=wo_c.astype(jnp.bfloat16), bo_c=bo_c,
            ln3_g=ones, ln3_b=zeros,
            w1=w1.astype(jnp.bfloat16), b1=b1,
            w2=w2.astype(jnp.bfloat16), b2=b2,
        ))
    stacked = {k: jnp.stack([ly[k] for ly in layers], axis=0) for k in layers[0]}
    stacked["norm_g"] = jnp.ones((1, d_model), jnp.float32)
    stacked["norm_b"] = jnp.zeros((1, d_model), jnp.float32)
    return stacked


# ----------------------------------------------------------------------------
if __name__ == "__main__":
    # Small shapes consistent with the module
    B, T_TGT, T_SRC = 2, 8, 8
    D_MODEL, N_HEADS, D_FF, N_LAYERS = 32, 4, 64, 2

    key = jax.random.PRNGKey(0)
    k_params, k_x, k_mem = jax.random.split(key, 3)

    params = init_decoder(k_params, N_LAYERS, D_MODEL, D_FF)

    x = jax.random.normal(k_x, (B, T_TGT, D_MODEL), jnp.float32)
    memory = jax.random.normal(k_mem, (B, T_SRC, D_MODEL), jnp.float32)

    # tgt_mask: causal (subsequent) mask (1, T, T); src_mask: all-visible (B, 1, Ts)
    tgt_mask = jnp.tril(jnp.ones((T_TGT, T_TGT), jnp.float32))[None, :, :]
    src_mask = jnp.ones((B, 1, T_SRC), jnp.float32)

    fwd = jax.jit(functools.partial(decoder_forward, n_heads=N_HEADS))
    out = jax.block_until_ready(fwd(params, x, memory, src_mask, tgt_mask))

    assert out.shape == (B, T_TGT, D_MODEL)
    assert bool(jnp.all(jnp.isfinite(out)))
    print("KERNEL_OK")
</pallas_src>

<mosaic_0001>
module attributes {stable_mosaic.version = 11 : i64} {
  func.func @_decoder_kernel(%arg0: i32, %arg1: memref<1x8x32xf32, #tpu.memory_space<vmem>>, %arg2: memref<1x8x32xf32, #tpu.memory_space<vmem>>, %arg3: memref<1x8x8xf32, #tpu.memory_space<vmem>>, %arg4: memref<1x1x8xf32, #tpu.memory_space<vmem>>, %arg5: memref<2x1x32xf32, #tpu.memory_space<vmem>>, %arg6: memref<2x1x32xf32, #tpu.memory_space<vmem>>, %arg7: memref<2x32x96xbf16, #tpu.memory_space<vmem>>, %arg8: memref<2x1x96xf32, #tpu.memory_space<vmem>>, %arg9: memref<2x32x32xbf16, #tpu.memory_space<vmem>>, %arg10: memref<2x1x32xf32, #tpu.memory_space<vmem>>, %arg11: memref<2x1x32xf32, #tpu.memory_space<vmem>>, %arg12: memref<2x1x32xf32, #tpu.memory_space<vmem>>, %arg13: memref<2x32x32xbf16, #tpu.memory_space<vmem>>, %arg14: memref<2x1x32xf32, #tpu.memory_space<vmem>>, %arg15: memref<2x32x64xbf16, #tpu.memory_space<vmem>>, %arg16: memref<2x1x64xf32, #tpu.memory_space<vmem>>, %arg17: memref<2x32x32xbf16, #tpu.memory_space<vmem>>, %arg18: memref<2x1x32xf32, #tpu.memory_space<vmem>>, %arg19: memref<2x1x32xf32, #tpu.memory_space<vmem>>, %arg20: memref<2x1x32xf32, #tpu.memory_space<vmem>>, %arg21: memref<2x32x64xbf16, #tpu.memory_space<vmem>>, %arg22: memref<2x1x64xf32, #tpu.memory_space<vmem>>, %arg23: memref<2x64x32xbf16, #tpu.memory_space<vmem>>, %arg24: memref<2x1x32xf32, #tpu.memory_space<vmem>>, %arg25: memref<1x32xf32, #tpu.memory_space<vmem>>, %arg26: memref<1x32xf32, #tpu.memory_space<vmem>>, %arg27: memref<1x8x32xf32, #tpu.memory_space<vmem>>) attributes {dimension_semantics = [#tpu.dimension_semantics<parallel>], iteration_bounds = array<i64: 2>, scalar_prefetch = 0 : i64, scratch_operands = 0 : i64, tpu.core_type = #tpu.core_type<tc>, window_params = [{transform_indices = @transform_0, window_bounds = array<i64: 1, 8, 32>}, {transform_indices = @transform_1, window_bounds = array<i64: 1, 8, 32>}, {pipeline_mode = #tpu.pipeline_mode<synchronous>, transform_indices = @transform_2, window_bounds = array<i64: 1, 8, 8>}, {transform_indices = @transform_3, window_bounds = array<i64: 1, 1, 8>}, {pipeline_mode = #tpu.pipeline_mode<synchronous>, transform_indices = @transform_4, window_bounds = array<i64: 2, 1, 32>}, {pipeline_mode = #tpu.pipeline_mode<synchronous>, transform_indices = @transform_5, window_bounds = array<i64: 2, 1, 32>}, {pipeline_mode = #tpu.pipeline_mode<synchronous>, transform_indices = @transform_6, window_bounds = array<i64: 2, 32, 96>}, {pipeline_mode = #tpu.pipeline_mode<synchronous>, transform_indices = @transform_7, window_bounds = array<i64: 2, 1, 96>}, {pipeline_mode = #tpu.pipeline_mode<synchronous>, transform_indices = @transform_8, window_bounds = array<i64: 2, 32, 32>}, {pipeline_mode = #tpu.pipeline_mode<synchronous>, transform_indices = @transform_9, window_bounds = array<i64: 2, 1, 32>}, {pipeline_mode = #tpu.pipeline_mode<synchronous>, transform_indices = @transform_10, window_bounds = array<i64: 2, 1, 32>}, {pipeline_mode = #tpu.pipeline_mode<synchronous>, transform_indices = @transform_11, window_bounds = array<i64: 2, 1, 32>}, {pipeline_mode = #tpu.pipeline_mode<synchronous>, transform_indices = @transform_12, window_bounds = array<i64: 2, 32, 32>}, {pipeline_mode = #tpu.pipeline_mode<synchronous>, transform_indices = @transform_13, window_bounds = array<i64: 2, 1, 32>}, {pipeline_mode = #tpu.pipeline_mode<synchronous>, transform_indices = @transform_14, window_bounds = array<i64: 2, 32, 64>}, {pipeline_mode = #tpu.pipeline_mode<synchronous>, transform_indices = @transform_15, window_bounds = array<i64: 2, 1, 64>}, {pipeline_mode = #tpu.pipeline_mode<synchronous>, transform_indices = @transform_16, window_bounds = array<i64: 2, 32, 32>}, {pipeline_mode = #tpu.pipeline_mode<synchronous>, transform_indices = @transform_17, window_bounds = array<i64: 2, 1, 32>}, {pipeline_mode = #tpu.pipeline_mode<synchronous>, transform_indices = @transform_18, window_bounds = array<i64: 2, 1, 32>}, {pipeline_mode = #tpu.pipeline_mode<synchronous>, transform_indices = @transform_19, window_bounds = array<i64: 2, 1, 32>}, {pipeline_mode = #tpu.pipeline_mode<synchronous>, transform_indices = @transform_20, window_bounds = array<i64: 2, 32, 64>}, {pipeline_mode = #tpu.pipeline_mode<synchronous>, transform_indices = @transform_21, window_bounds = array<i64: 2, 1, 64>}, {pipeline_mode = #tpu.pipeline_mode<synchronous>, transform_indices = @transform_22, window_bounds = array<i64: 2, 64, 32>}, {pipeline_mode = #tpu.pipeline_mode<synchronous>, transform_indices = @transform_23, window_bounds = array<i64: 2, 1, 32>}, {pipeline_mode = #tpu.pipeline_mode<synchronous>, transform_indices = @transform_24, window_bounds = array<i64: 1, 32>}, {pipeline_mode = #tpu.pipeline_mode<synchronous>, transform_indices = @transform_25, window_bounds = array<i64: 1, 32>}, {transform_indices = @transform_26, window_bounds = array<i64: 1, 8, 32>}]} {
    %c0 = arith.constant 0 : index
    %c0_0 = arith.constant 0 : index
    %c0_1 = arith.constant 0 : index
    %0 = vector.load %arg1[%c0, %c0_0, %c0_1] : memref<1x8x32xf32, #tpu.memory_space<vmem>>, vector<1x8x32xf32>
    %1 = vector.shape_cast %0 : vector<1x8x32xf32> to vector<8x32xf32>
    %c0_2 = arith.constant 0 : index
    %c0_3 = arith.constant 0 : index
    %c0_4 = arith.constant 0 : index
    %2 = vector.load %arg2[%c0_2, %c0_3, %c0_4] : memref<1x8x32xf32, #tpu.memory_space<vmem>>, vector<1x8x32xf32>
    %3 = vector.shape_cast %2 : vector<1x8x32xf32> to vector<8x32xf32>
    %c0_5 = arith.constant 0 : index
    %c0_6 = arith.constant 0 : index
    %c0_7 = arith.constant 0 : index
    %4 = vector.load %arg3[%c0_5, %c0_6, %c0_7] : memref<1x8x8xf32, #tpu.memory_space<vmem>>, vector<1x8x8xf32>
    %5 = vector.shape_cast %4 : vector<1x8x8xf32> to vector<8x8xf32>
    %c0_8 = arith.constant 0 : index
    %c0_9 = arith.constant 0 : index
    %c0_10 = arith.constant 0 : index
    %6 = vector.load %arg4[%c0_8, %c0_9, %c0_10] : memref<1x1x8xf32, #tpu.memory_space<vmem>>, vector<1x1x8xf32>
    %7 = vector.shape_cast %6 : vector<1x1x8xf32> to vector<1x8xf32>
    %c0_11 = arith.constant 0 : index
    %c0_12 = arith.constant 0 : index
    %8 = vector.load %arg25[%c0_11, %c0_12] : memref<1x32xf32, #tpu.memory_space<vmem>>, vector<1x32xf32>
    %c0_13 = arith.constant 0 : index
    %c0_14 = arith.constant 0 : index
    %9 = vector.load %arg26[%c0_13, %c0_14] : memref<1x32xf32, #tpu.memory_space<vmem>>, vector<1x32xf32>
    %c0_15 = arith.constant 0 : index
    %c0_16 = arith.constant 0 : index
    %c0_17 = arith.constant 0 : index
    %10 = vector.load %arg5[%c0_15, %c0_16, %c0_17] : memref<2x1x32xf32, #tpu.memory_space<vmem>>, vector<1x1x32xf32>
    %11 = vector.shape_cast %10 : vector<1x1x32xf32> to vector<1x32xf32>
    %c0_18 = arith.constant 0 : index
    %c0_19 = arith.constant 0 : index
    %c0_20 = arith.constant 0 : index
    %12 = vector.load %arg6[%c0_18, %c0_19, %c0_20] : memref<2x1x32xf32, #tpu.memory_space<vmem>>, vector<1x1x32xf32>
    %13 = vector.shape_cast %12 : vector<1x1x32xf32> to vector<1x32xf32>
    %cst = arith.constant dense<0.000000e+00> : vector<8xf32>
    %14 = vector.multi_reduction <add>, %1, %cst [1] : vector<8x32xf32> to vector<8xf32>
    %15 = vector.shape_cast %14 : vector<8xf32> to vector<8x1xf32>
    %cst_21 = arith.constant 3.200000e+01 : f32
    %16 = vector.broadcast %cst_21 : f32 to vector<8x1xf32>
    %17 = arith.divf %15, %16 : vector<8x1xf32>
    %18 = vector.broadcast %17 : vector<8x1xf32> to vector<8x32xf32>
    %19 = arith.subf %1, %18 : vector<8x32xf32>
    %20 = arith.mulf %19, %19 : vector<8x32xf32>
    %cst_22 = arith.constant dense<0.000000e+00> : vector<8xf32>
    %21 = vector.multi_reduction <add>, %20, %cst_22 [1] : vector<8x32xf32> to vector<8xf32>
    %22 = vector.shape_cast %21 : vector<8xf32> to vector<8x1xf32>
    %cst_23 = arith.constant 3.100000e+01 : f32
    %23 = vector.broadcast %cst_23 : f32 to vector<8x1xf32>
    %24 = arith.divf %22, %23 : vector<8x1xf32>
    %25 = math.sqrt %24 : vector<8x1xf32>
    %26 = vector.broadcast %17 : vector<8x1xf32> to vector<8x32xf32>
    %27 = arith.subf %1, %26 : vector<8x32xf32>
    %28 = vector.broadcast %11 : vector<1x32xf32> to vector<8x32xf32>
    %29 = arith.mulf %28, %27 : vector<8x32xf32>
    %cst_24 = arith.constant 9.99999997E-7 : f32
    %30 = vector.broadcast %cst_24 : f32 to vector<8x1xf32>
    %31 = arith.addf %25, %30 : vector<8x1xf32>
    %32 = vector.broadcast %31 : vector<8x1xf32> to vector<8x32xf32>
    %33 = arith.divf %29, %32 : vector<8x32xf32>
    %34 = vector.broadcast %13 : vector<1x32xf32> to vector<8x32xf32>
    %35 = arith.addf %33, %34 : vector<8x32xf32>
    %36 = arith.truncf %35 : vector<8x32xf32> to vector<8x32xbf16>
    %c0_25 = arith.constant 0 : index
    %c0_26 = arith.constant 0 : index
    %c0_27 = arith.constant 0 : index
    %37 = vector.load %arg7[%c0_25, %c0_26, %c0_27] : memref<2x32x96xbf16, #tpu.memory_space<vmem>>, vector<1x32x96xbf16>
    %38 = vector.shape_cast %37 : vector<1x32x96xbf16> to vector<32x96xbf16>
    %cst_28 = arith.constant dense<0.000000e+00> : vector<8x96xf32>
    %39 = tpu.matmul %36, %38, %cst_28 {dimension_numbers = #tpu.dot_dimension_numbers<[1], [0], [0], [1], [0, 0, 1, 1], [], []>} : vector<8x32xbf16>, vector<32x96xbf16>, vector<8x96xf32> -> vector<8x96xf32>
    %c0_29 = arith.constant 0 : index
    %c0_30 = arith.constant 0 : index
    %c0_31 = arith.constant 0 : index
    %40 = vector.load %arg8[%c0_29, %c0_30, %c0_31] : memref<2x1x96xf32, #tpu.memory_space<vmem>>, vector<1x1x96xf32>
    %41 = vector.shape_cast %40 : vector<1x1x96xf32> to vector<1x96xf32>
    %42 = vector.broadcast %41 : vector<1x96xf32> to vector<8x96xf32>
    %43 = arith.addf %39, %42 : vector<8x96xf32>
    %44 = vector.extract_strided_slice %43 {offsets = [0, 0], sizes = [8, 32], strides = [1, 1]} : vector<8x96xf32> to vector<8x32xf32>
    %cst_32 = arith.constant 0.353553385 : f32
    %45 = vector.broadcast %cst_32 : f32 to vector<8x32xf32>
    %46 = arith.mulf %44, %45 : vector<8x32xf32>
    %47 = vector.extract_strided_slice %43 {offsets = [0, 32], sizes = [8, 32], strides = [1, 1]} : vector<8x96xf32> to vector<8x32xf32>
    %48 = vector.extract_strided_slice %43 {offsets = [0, 64], sizes = [8, 32], strides = [1, 1]} : vector<8x96xf32> to vector<8x32xf32>
    %c0_33 = arith.constant 0 : index
    %c0_34 = arith.constant 0 : index
    %c0_35 = arith.constant 0 : index
    %49 = vector.load %arg9[%c0_33, %c0_34, %c0_35] : memref<2x32x32xbf16, #tpu.memory_space<vmem>>, vector<1x32x32xbf16>
    %50 = vector.shape_cast %49 : vector<1x32x32xbf16> to vector<32x32xbf16>
    %c0_36 = arith.constant 0 : index
    %c0_37 = arith.constant 0 : index
    %c0_38 = arith.constant 0 : index
    %51 = vector.load %arg10[%c0_36, %c0_37, %c0_38] : memref<2x1x32xf32, #tpu.memory_space<vmem>>, vector<1x1x32xf32>
    %52 = vector.shape_cast %51 : vector<1x1x32xf32> to vector<1x32xf32>
    %53 = vector.extract_strided_slice %46 {offsets = [0, 0], sizes = [8, 8], strides = [1, 1]} : vector<8x32xf32> to vector<8x8xf32>
    %54 = arith.truncf %53 : vector<8x8xf32> to vector<8x8xbf16>
    %55 = vector.extract_strided_slice %47 {offsets = [0, 0], sizes = [8, 8], strides = [1, 1]} : vector<8x32xf32> to vector<8x8xf32>
    %56 = arith.truncf %55 : vector<8x8xf32> to vector<8x8xbf16>
    %57 = vector.extract_strided_slice %48 {offsets = [0, 0], sizes = [8, 8], strides = [1, 1]} : vector<8x32xf32> to vector<8x8xf32>
    %58 = arith.truncf %57 : vector<8x8xf32> to vector<8x8xbf16>
    %cst_39 = arith.constant dense<0.000000e+00> : vector<8x8xf32>
    %59 = tpu.matmul %54, %56, %cst_39 {dimension_numbers = #tpu.dot_dimension_numbers<[1], [1], [0], [0], [0, 0, 1, 0], [], []>} : vector<8x8xbf16>, vector<8x8xbf16>, vector<8x8xf32> -> vector<8x8xf32>
    %60 = arith.addf %59, %5 : vector<8x8xf32>
    %cst_40 = arith.constant dense<0xFF800000> : vector<8xf32>
    %61 = vector.multi_reduction <maximumf>, %60, %cst_40 [1] : vector<8x8xf32> to vector<8xf32>
    %62 = vector.shape_cast %61 : vector<8xf32> to vector<8x1xf32>
    %63 = vector.broadcast %62 : vector<8x1xf32> to vector<8x8xf32>
    %64 = arith.subf %60, %63 : vector<8x8xf32>
    %65 = math.exp %64 : vector<8x8xf32>
    %cst_41 = arith.constant dense<0.000000e+00> : vector<8xf32>
    %66 = vector.multi_reduction <add>, %65, %cst_41 [1] : vector<8x8xf32> to vector<8xf32>
    %67 = vector.shape_cast %66 : vector<8xf32> to vector<8x1xf32>
    %68 = tpu.reciprocal %67 {approx = true} : vector<8x1xf32> -> vector<8x1xf32>
    %69 = vector.broadcast %68 : vector<8x1xf32> to vector<8x8xf32>
    %70 = arith.mulf %65, %69 : vector<8x8xf32>
    %71 = arith.truncf %70 : vector<8x8xf32> to vector<8x8xbf16>
    %cst_42 = arith.constant dense<0.000000e+00> : vector<8x8xf32>
    %72 = tpu.matmul %71, %58, %cst_42 {dimension_numbers = #tpu.dot_dimension_numbers<[1], [0], [0], [1], [0, 0, 1, 1], [], []>} : vector<8x8xbf16>, vector<8x8xbf16>, vector<8x8xf32> -> vector<8x8xf32>
    %73 = vector.extract_strided_slice %46 {offsets = [0, 8], sizes = [8, 8], strides = [1, 1]} : vector<8x32xf32> to vector<8x8xf32>
    %74 = arith.truncf %73 : vector<8x8xf32> to vector<8x8xbf16>
    %75 = vector.extract_strided_slice %47 {offsets = [0, 8], sizes = [8, 8], strides = [1, 1]} : vector<8x32xf32> to vector<8x8xf32>
    %76 = arith.truncf %75 : vector<8x8xf32> to vector<8x8xbf16>
    %77 = vector.extract_strided_slice %48 {offsets = [0, 8], sizes = [8, 8], strides = [1, 1]} : vector<8x32xf32> to vector<8x8xf32>
    %78 = arith.truncf %77 : vector<8x8xf32> to vector<8x8xbf16>
    %cst_43 = arith.constant dense<0.000000e+00> : vector<8x8xf32>
    %79 = tpu.matmul %74, %76, %cst_43 {dimension_numbers = #tpu.dot_dimension_numbers<[1], [1], [0], [0], [0, 0, 1, 0], [], []>} : vector<8x8xbf16>, vector<8x8xbf16>, vector<8x8xf32> -> vector<8x8xf32>
    %80 = arith.addf %79, %5 : vector<8x8xf32>
    %cst_44 = arith.constant dense<0xFF800000> : vector<8xf32>
    %81 = vector.multi_reduction <maximumf>, %80, %cst_44 [1] : vector<8x8xf32> to vector<8xf32>
    %82 = vector.shape_cast %81 : vector<8xf32> to vector<8x1xf32>
    %83 = vector.broadcast %82 : vector<8x1xf32> to vector<8x8xf32>
    %84 = arith.subf %80, %83 : vector<8x8xf32>
    %85 = math.exp %84 : vector<8x8xf32>
    %cst_45 = arith.constant dense<0.000000e+00> : vector<8xf32>
    %86 = vector.multi_reduction <add>, %85, %cst_45 [1] : vector<8x8xf32> to vector<8xf32>
    %87 = vector.shape_cast %86 : vector<8xf32> to vector<8x1xf32>
    %88 = tpu.reciprocal %87 {approx = true} : vector<8x1xf32> -> vector<8x1xf32>
    %89 = vector.broadcast %88 : vector<8x1xf32> to vector<8x8xf32>
    %90 = arith.mulf %85, %89 : vector<8x8xf32>
    %91 = arith.truncf %90 : vector<8x8xf32> to vector<8x8xbf16>
    %cst_46 = arith.constant dense<0.000000e+00> : vector<8x8xf32>
    %92 = tpu.matmul %91, %78, %cst_46 {dimension_numbers = #tpu.dot_dimension_numbers<[1], [0], [0], [1], [0, 0, 1, 1], [], []>} : vector<8x8xbf16>, vector<8x8xbf16>, vector<8x8xf32> -> vector<8x8xf32>
    %93 = vector.extract_strided_slice %46 {offsets = [0, 16], sizes = [8, 8], strides = [1, 1]} : vector<8x32xf32> to vector<8x8xf32>
    %94 = arith.truncf %93 : vector<8x8xf32> to vector<8x8xbf16>
    %95 = vector.extract_strided_slice %47 {offsets = [0, 16], sizes = [8, 8], strides = [1, 1]} : vector<8x32xf32> to vector<8x8xf32>
    %96 = arith.truncf %95 : vector<8x8xf32> to vector<8x8xbf16>
    %97 = vector.extract_strided_slice %48 {offsets = [0, 16], sizes = [8, 8], strides = [1, 1]} : vector<8x32xf32> to vector<8x8xf32>
    %98 = arith.truncf %97 : vector<8x8xf32> to vector<8x8xbf16>
    %cst_47 = arith.constant dense<0.000000e+00> : vector<8x8xf32>
    %99 = tpu.matmul %94, %96, %cst_47 {dimension_numbers = #tpu.dot_dimension_numbers<[1], [1], [0], [0], [0, 0, 1, 0], [], []>} : vector<8x8xbf16>, vector<8x8xbf16>, vector<8x8xf32> -> vector<8x8xf32>
    %100 = arith.addf %99, %5 : vector<8x8xf32>
    %cst_48 = arith.constant dense<0xFF800000> : vector<8xf32>
    %101 = vector.multi_reduction <maximumf>, %100, %cst_48 [1] : vector<8x8xf32> to vector<8xf32>
    %102 = vector.shape_cast %101 : vector<8xf32> to vector<8x1xf32>
    %103 = vector.broadcast %102 : vector<8x1xf32> to vector<8x8xf32>
    %104 = arith.subf %100, %103 : vector<8x8xf32>
    %105 = math.exp %104 : vector<8x8xf32>
    %cst_49 = arith.constant dense<0.000000e+00> : vector<8xf32>
    %106 = vector.multi_reduction <add>, %105, %cst_49 [1] : vector<8x8xf32> to vector<8xf32>
    %107 = vector.shape_cast %106 : vector<8xf32> to vector<8x1xf32>
    %108 = tpu.reciprocal %107 {approx = true} : vector<8x1xf32> -> vector<8x1xf32>
    %109 = vector.broadcast %108 : vector<8x1xf32> to vector<8x8xf32>
    %110 = arith.mulf %105, %109 : vector<8x8xf32>
    %111 = arith.truncf %110 : vector<8x8xf32> to vector<8x8xbf16>
    %cst_50 = arith.constant dense<0.000000e+00> : vector<8x8xf32>
    %112 = tpu.matmul %111, %98, %cst_50 {dimension_numbers = #tpu.dot_dimension_numbers<[1], [0], [0], [1], [0, 0, 1, 1], [], []>} : vector<8x8xbf16>, vector<8x8xbf16>, vector<8x8xf32> -> vector<8x8xf32>
    %113 = vector.extract_strided_slice %46 {offsets = [0, 24], sizes = [8, 8], strides = [1, 1]} : vector<8x32xf32> to vector<8x8xf32>
    %114 = arith.truncf %113 : vector<8x8xf32> to vector<8x8xbf16>
    %115 = vector.extract_strided_slice %47 {offsets = [0, 24], sizes = [8, 8], strides = [1, 1]} : vector<8x32xf32> to vector<8x8xf32>
    %116 = arith.truncf %115 : vector<8x8xf32> to vector<8x8xbf16>
    %117 = vector.extract_strided_slice %48 {offsets = [0, 24], sizes = [8, 8], strides = [1, 1]} : vector<8x32xf32> to vector<8x8xf32>
    %118 = arith.truncf %117 : vector<8x8xf32> to vector<8x8xbf16>
    %cst_51 = arith.constant dense<0.000000e+00> : vector<8x8xf32>
    %119 = tpu.matmul %114, %116, %cst_51 {dimension_numbers = #tpu.dot_dimension_numbers<[1], [1], [0], [0], [0, 0, 1, 0], [], []>} : vector<8x8xbf16>, vector<8x8xbf16>, vector<8x8xf32> -> vector<8x8xf32>
    %120 = arith.addf %119, %5 : vector<8x8xf32>
    %cst_52 = arith.constant dense<0xFF800000> : vector<8xf32>
    %121 = vector.multi_reduction <maximumf>, %120, %cst_52 [1] : vector<8x8xf32> to vector<8xf32>
    %122 = vector.shape_cast %121 : vector<8xf32> to vector<8x1xf32>
    %123 = vector.broadcast %122 : vector<8x1xf32> to vector<8x8xf32>
    %124 = arith.subf %120, %123 : vector<8x8xf32>
    %125 = math.exp %124 : vector<8x8xf32>
    %cst_53 = arith.constant dense<0.000000e+00> : vector<8xf32>
    %126 = vector.multi_reduction <add>, %125, %cst_53 [1] : vector<8x8xf32> to vector<8xf32>
    %127 = vector.shape_cast %126 : vector<8xf32> to vector<8x1xf32>
    %128 = tpu.reciprocal %127 {approx = true} : vector<8x1xf32> -> vector<8x1xf32>
    %129 = vector.broadcast %128 : vector<8x1xf32> to vector<8x8xf32>
    %130 = arith.mulf %125, %129 : vector<8x8xf32>
    %131 = arith.truncf %130 : vector<8x8xf32> to vector<8x8xbf16>
    %cst_54 = arith.constant dense<0.000000e+00> : vector<8x8xf32>
    %132 = tpu.matmul %131, %118, %cst_54 {dimension_numbers = #tpu.dot_dimension_numbers<[1], [0], [0], [1], [0, 0, 1, 1], [], []>} : vector<8x8xbf16>, vector<8x8xbf16>, vector<8x8xf32> -> vector<8x8xf32>
    %133 = tpu.concatenate %72, %92, %112, %132 in 1 : vector<8x8xf32>, vector<8x8xf32>, vector<8x8xf32>, vector<8x8xf32> -> vector<8x32xf32>
    %134 = arith.truncf %133 : vector<8x32xf32> to vector<8x32xbf16>
    %cst_55 = arith.constant dense<0.000000e+00> : vector<8x32xf32>
    %135 = tpu.matmul %134, %50, %cst_55 {dimension_numbers = #tpu.dot_dimension_numbers<[1], [0], [0], [1], [0, 0, 1, 1], [], []>} : vector<8x32xbf16>, vector<32x32xbf16>, vector<8x32xf32> -> vector<8x32xf32>
    %136 = vector.broadcast %52 : vector<1x32xf32> to vector<8x32xf32>
    %137 = arith.addf %135, %136 : vector<8x32xf32>
    %138 = arith.addf %1, %137 : vector<8x32xf32>
    %c0_56 = arith.constant 0 : index
    %c0_57 = arith.constant 0 : index
    %c0_58 = arith.constant 0 : index
    %139 = vector.load %arg11[%c0_56, %c0_57, %c0_58] : memref<2x1x32xf32, #tpu.memory_space<vmem>>, vector<1x1x32xf32>
    %140 = vector.shape_cast %139 : vector<1x1x32xf32> to vector<1x32xf32>
    %c0_59 = arith.constant 0 : index
    %c0_60 = arith.constant 0 : index
    %c0_61 = arith.constant 0 : index
    %141 = vector.load %arg12[%c0_59, %c0_60, %c0_61] : memref<2x1x32xf32, #tpu.memory_space<vmem>>, vector<1x1x32xf32>
    %142 = vector.shape_cast %141 : vector<1x1x32xf32> to vector<1x32xf32>
    %cst_62 = arith.constant dense<0.000000e+00> : vector<8xf32>
    %143 = vector.multi_reduction <add>, %138, %cst_62 [1] : vector<8x32xf32> to vector<8xf32>
    %144 = vector.shape_cast %143 : vector<8xf32> to vector<8x1xf32>
    %cst_63 = arith.constant 3.200000e+01 : f32
    %145 = vector.broadcast %cst_63 : f32 to vector<8x1xf32>
    %146 = arith.divf %144, %145 : vector<8x1xf32>
    %147 = vector.broadcast %146 : vector<8x1xf32> to vector<8x32xf32>
    %148 = arith.subf %138, %147 : vector<8x32xf32>
    %149 = arith.mulf %148, %148 : vector<8x32xf32>
    %cst_64 = arith.constant dense<0.000000e+00> : vector<8xf32>
    %150 = vector.multi_reduction <add>, %149, %cst_64 [1] : vector<8x32xf32> to vector<8xf32>
    %151 = vector.shape_cast %150 : vector<8xf32> to vector<8x1xf32>
    %cst_65 = arith.constant 3.100000e+01 : f32
    %152 = vector.broadcast %cst_65 : f32 to vector<8x1xf32>
    %153 = arith.divf %151, %152 : vector<8x1xf32>
    %154 = math.sqrt %153 : vector<8x1xf32>
    %155 = vector.broadcast %146 : vector<8x1xf32> to vector<8x32xf32>
    %156 = arith.subf %138, %155 : vector<8x32xf32>
    %157 = vector.broadcast %140 : vector<1x32xf32> to vector<8x32xf32>
    %158 = arith.mulf %157, %156 : vector<8x32xf32>
    %cst_66 = arith.constant 9.99999997E-7 : f32
    %159 = vector.broadcast %cst_66 : f32 to vector<8x1xf32>
    %160 = arith.addf %154, %159 : vector<8x1xf32>
    %161 = vector.broadcast %160 : vector<8x1xf32> to vector<8x32xf32>
    %162 = arith.divf %158, %161 : vector<8x32xf32>
    %163 = vector.broadcast %142 : vector<1x32xf32> to vector<8x32xf32>
    %164 = arith.addf %162, %163 : vector<8x32xf32>
    %165 = arith.truncf %164 : vector<8x32xf32> to vector<8x32xbf16>
    %c0_67 = arith.constant 0 : index
    %c0_68 = arith.constant 0 : index
    %c0_69 = arith.constant 0 : index
    %166 = vector.load %arg13[%c0_67, %c0_68, %c0_69] : memref<2x32x32xbf16, #tpu.memory_space<vmem>>, vector<1x32x32xbf16>
    %167 = vector.shape_cast %166 : vector<1x32x32xbf16> to vector<32x32xbf16>
    %cst_70 = arith.constant dense<0.000000e+00> : vector<8x32xf32>
    %168 = tpu.matmul %165, %167, %cst_70 {dimension_numbers = #tpu.dot_dimension_numbers<[1], [0], [0], [1], [0, 0, 1, 1], [], []>} : vector<8x32xbf16>, vector<32x32xbf16>, vector<8x32xf32> -> vector<8x32xf32>
    %c0_71 = arith.constant 0 : index
    %c0_72 = arith.constant 0 : index
    %c0_73 = arith.constant 0 : index
    %169 = vector.load %arg14[%c0_71, %c0_72, %c0_73] : memref<2x1x32xf32, #tpu.memory_space<vmem>>, vector<1x1x32xf32>
    %170 = vector.shape_cast %169 : vector<1x1x32xf32> to vector<1x32xf32>
    %171 = vector.broadcast %170 : vector<1x32xf32> to vector<8x32xf32>
    %172 = arith.addf %168, %171 : vector<8x32xf32>
    %cst_74 = arith.constant 0.353553385 : f32
    %173 = vector.broadcast %cst_74 : f32 to vector<8x32xf32>
    %174 = arith.mulf %172, %173 : vector<8x32xf32>
    %175 = arith.truncf %3 : vector<8x32xf32> to vector<8x32xbf16>
    %c0_75 = arith.constant 0 : index
    %c0_76 = arith.constant 0 : index
    %c0_77 = arith.constant 0 : index
    %176 = vector.load %arg15[%c0_75, %c0_76, %c0_77] : memref<2x32x64xbf16, #tpu.memory_space<vmem>>, vector<1x32x64xbf16>
    %177 = vector.shape_cast %176 : vector<1x32x64xbf16> to vector<32x64xbf16>
    %cst_78 = arith.constant dense<0.000000e+00> : vector<8x64xf32>
    %178 = tpu.matmul %175, %177, %cst_78 {dimension_numbers = #tpu.dot_dimension_numbers<[1], [0], [0], [1], [0, 0, 1, 1], [], []>} : vector<8x32xbf16>, vector<32x64xbf16>, vector<8x64xf32> -> vector<8x64xf32>
    %c0_79 = arith.constant 0 : index
    %c0_80 = arith.constant 0 : index
    %c0_81 = arith.constant 0 : index
    %179 = vector.load %arg16[%c0_79, %c0_80, %c0_81] : memref<2x1x64xf32, #tpu.memory_space<vmem>>, vector<1x1x64xf32>
    %180 = vector.shape_cast %179 : vector<1x1x64xf32> to vector<1x64xf32>
    %181 = vector.broadcast %180 : vector<1x64xf32> to vector<8x64xf32>
    %182 = arith.addf %178, %181 : vector<8x64xf32>
    %183 = vector.extract_strided_slice %182 {offsets = [0, 0], sizes = [8, 32], strides = [1, 1]} : vector<8x64xf32> to vector<8x32xf32>
    %184 = vector.extract_strided_slice %182 {offsets = [0, 32], sizes = [8, 32], strides = [1, 1]} : vector<8x64xf32> to vector<8x32xf32>
    %c0_82 = arith.constant 0 : index
    %c0_83 = arith.constant 0 : index
    %c0_84 = arith.constant 0 : index
    %185 = vector.load %arg17[%c0_82, %c0_83, %c0_84] : memref<2x32x32xbf16, #tpu.memory_space<vmem>>, vector<1x32x32xbf16>
    %186 = vector.shape_cast %185 : vector<1x32x32xbf16> to vector<32x32xbf16>
    %c0_85 = arith.constant 0 : index
    %c0_86 = arith.constant 0 : index
    %c0_87 = arith.constant 0 : index
    %187 = vector.load %arg18[%c0_85, %c0_86, %c0_87] : memref<2x1x32xf32, #tpu.memory_space<vmem>>, vector<1x1x32xf32>
    %188 = vector.shape_cast %187 : vector<1x1x32xf32> to vector<1x32xf32>
    %189 = vector.extract_strided_slice %174 {offsets = [0, 0], sizes = [8, 8], strides = [1, 1]} : vector<8x32xf32> to vector<8x8xf32>
    %190 = arith.truncf %189 : vector<8x8xf32> to vector<8x8xbf16>
    %191 = vector.extract_strided_slice %183 {offsets = [0, 0], sizes = [8, 8], strides = [1, 1]} : vector<8x32xf32> to vector<8x8xf32>
    %192 = arith.truncf %191 : vector<8x8xf32> to vector<8x8xbf16>
    %193 = vector.extract_strided_slice %184 {offsets = [0, 0], sizes = [8, 8], strides = [1, 1]} : vector<8x32xf32> to vector<8x8xf32>
    %194 = arith.truncf %193 : vector<8x8xf32> to vector<8x8xbf16>
    %cst_88 = arith.constant dense<0.000000e+00> : vector<8x8xf32>
    %195 = tpu.matmul %190, %192, %cst_88 {dimension_numbers = #tpu.dot_dimension_numbers<[1], [1], [0], [0], [0, 0, 1, 0], [], []>} : vector<8x8xbf16>, vector<8x8xbf16>, vector<8x8xf32> -> vector<8x8xf32>
    %196 = vector.broadcast %7 : vector<1x8xf32> to vector<8x8xf32>
    %197 = arith.addf %195, %196 : vector<8x8xf32>
    %cst_89 = arith.constant dense<0xFF800000> : vector<8xf32>
    %198 = vector.multi_reduction <maximumf>, %197, %cst_89 [1] : vector<8x8xf32> to vector<8xf32>
    %199 = vector.shape_cast %198 : vector<8xf32> to vector<8x1xf32>
    %200 = vector.broadcast %199 : vector<8x1xf32> to vector<8x8xf32>
    %201 = arith.subf %197, %200 : vector<8x8xf32>
    %202 = math.exp %201 : vector<8x8xf32>
    %cst_90 = arith.constant dense<0.000000e+00> : vector<8xf32>
    %203 = vector.multi_reduction <add>, %202, %cst_90 [1] : vector<8x8xf32> to vector<8xf32>
    %204 = vector.shape_cast %203 : vector<8xf32> to vector<8x1xf32>
    %205 = tpu.reciprocal %204 {approx = true} : vector<8x1xf32> -> vector<8x1xf32>
    %206 = vector.broadcast %205 : vector<8x1xf32> to vector<8x8xf32>
    %207 = arith.mulf %202, %206 : vector<8x8xf32>
    %208 = arith.truncf %207 : vector<8x8xf32> to vector<8x8xbf16>
    %cst_91 = arith.constant dense<0.000000e+00> : vector<8x8xf32>
    %209 = tpu.matmul %208, %194, %cst_91 {dimension_numbers = #tpu.dot_dimension_numbers<[1], [0], [0], [1], [0, 0, 1, 1], [], []>} : vector<8x8xbf16>, vector<8x8xbf16>, vector<8x8xf32> -> vector<8x8xf32>
    %210 = vector.extract_strided_slice %174 {offsets = [0, 8], sizes = [8, 8], strides = [1, 1]} : vector<8x32xf32> to vector<8x8xf32>
    %211 = arith.truncf %210 : vector<8x8xf32> to vector<8x8xbf16>
    %212 = vector.extract_strided_slice %183 {offsets = [0, 8], sizes = [8, 8], strides = [1, 1]} : vector<8x32xf32> to vector<8x8xf32>
    %213 = arith.truncf %212 : vector<8x8xf32> to vector<8x8xbf16>
    %214 = vector.extract_strided_slice %184 {offsets = [0, 8], sizes = [8, 8], strides = [1, 1]} : vector<8x32xf32> to vector<8x8xf32>
    %215 = arith.truncf %214 : vector<8x8xf32> to vector<8x8xbf16>
    %cst_92 = arith.constant dense<0.000000e+00> : vector<8x8xf32>
    %216 = tpu.matmul %211, %213, %cst_92 {dimension_numbers = #tpu.dot_dimension_numbers<[1], [1], [0], [0], [0, 0, 1, 0], [], []>} : vector<8x8xbf16>, vector<8x8xbf16>, vector<8x8xf32> -> vector<8x8xf32>
    %217 = vector.broadcast %7 : vector<1x8xf32> to vector<8x8xf32>
    %218 = arith.addf %216, %217 : vector<8x8xf32>
    %cst_93 = arith.constant dense<0xFF800000> : vector<8xf32>
    %219 = vector.multi_reduction <maximumf>, %218, %cst_93 [1] : vector<8x8xf32> to vector<8xf32>
    %220 = vector.shape_cast %219 : vector<8xf32> to vector<8x1xf32>
    %221 = vector.broadcast %220 : vector<8x1xf32> to vector<8x8xf32>
    %222 = arith.subf %218, %221 : vector<8x8xf32>
    %223 = math.exp %222 : vector<8x8xf32>
    %cst_94 = arith.constant dense<0.000000e+00> : vector<8xf32>
    %224 = vector.multi_reduction <add>, %223, %cst_94 [1] : vector<8x8xf32> to vector<8xf32>
    %225 = vector.shape_cast %224 : vector<8xf32> to vector<8x1xf32>
    %226 = tpu.reciprocal %225 {approx = true} : vector<8x1xf32> -> vector<8x1xf32>
    %227 = vector.broadcast %226 : vector<8x1xf32> to vector<8x8xf32>
    %228 = arith.mulf %223, %227 : vector<8x8xf32>
    %229 = arith.truncf %228 : vector<8x8xf32> to vector<8x8xbf16>
    %cst_95 = arith.constant dense<0.000000e+00> : vector<8x8xf32>
    %230 = tpu.matmul %229, %215, %cst_95 {dimension_numbers = #tpu.dot_dimension_numbers<[1], [0], [0], [1], [0, 0, 1, 1], [], []>} : vector<8x8xbf16>, vector<8x8xbf16>, vector<8x8xf32> -> vector<8x8xf32>
    %231 = vector.extract_strided_slice %174 {offsets = [0, 16], sizes = [8, 8], strides = [1, 1]} : vector<8x32xf32> to vector<8x8xf32>
    %232 = arith.truncf %231 : vector<8x8xf32> to vector<8x8xbf16>
    %233 = vector.extract_strided_slice %183 {offsets = [0, 16], sizes = [8, 8], strides = [1, 1]} : vector<8x32xf32> to vector<8x8xf32>
    %234 = arith.truncf %233 : vector<8x8xf32> to vector<8x8xbf16>
    %235 = vector.extract_strided_slice %184 {offsets = [0, 16], sizes = [8, 8], strides = [1, 1]} : vector<8x32xf32> to vector<8x8xf32>
    %236 = arith.truncf %235 : vector<8x8xf32> to vector<8x8xbf16>
    %cst_96 = arith.constant dense<0.000000e+00> : vector<8x8xf32>
    %237 = tpu.matmul %232, %234, %cst_96 {dimension_numbers = #tpu.dot_dimension_numbers<[1], [1], [0], [0], [0, 0, 1, 0], [], []>} : vector<8x8xbf16>, vector<8x8xbf16>, vector<8x8xf32> -> vector<8x8xf32>
    %238 = vector.broadcast %7 : vector<1x8xf32> to vector<8x8xf32>
    %239 = arith.addf %237, %238 : vector<8x8xf32>
    %cst_97 = arith.constant dense<0xFF800000> : vector<8xf32>
    %240 = vector.multi_reduction <maximumf>, %239, %cst_97 [1] : vector<8x8xf32> to vector<8xf32>
    %241 = vector.shape_cast %240 : vector<8xf32> to vector<8x1xf32>
    %242 = vector.broadcast %241 : vector<8x1xf32> to vector<8x8xf32>
    %243 = arith.subf %239, %242 : vector<8x8xf32>
    %244 = math.exp %243 : vector<8x8xf32>
    %cst_98 = arith.constant dense<0.000000e+00> : vector<8xf32>
    %245 = vector.multi_reduction <add>, %244, %cst_98 [1] : vector<8x8xf32> to vector<8xf32>
    %246 = vector.shape_cast %245 : vector<8xf32> to vector<8x1xf32>
    %247 = tpu.reciprocal %246 {approx = true} : vector<8x1xf32> -> vector<8x1xf32>
    %248 = vector.broadcast %247 : vector<8x1xf32> to vector<8x8xf32>
    %249 = arith.mulf %244, %248 : vector<8x8xf32>
    %250 = arith.truncf %249 : vector<8x8xf32> to vector<8x8xbf16>
    %cst_99 = arith.constant dense<0.000000e+00> : vector<8x8xf32>
    %251 = tpu.matmul %250, %236, %cst_99 {dimension_numbers = #tpu.dot_dimension_numbers<[1], [0], [0], [1], [0, 0, 1, 1], [], []>} : vector<8x8xbf16>, vector<8x8xbf16>, vector<8x8xf32> -> vector<8x8xf32>
    %252 = vector.extract_strided_slice %174 {offsets = [0, 24], sizes = [8, 8], strides = [1, 1]} : vector<8x32xf32> to vector<8x8xf32>
    %253 = arith.truncf %252 : vector<8x8xf32> to vector<8x8xbf16>
    %254 = vector.extract_strided_slice %183 {offsets = [0, 24], sizes = [8, 8], strides = [1, 1]} : vector<8x32xf32> to vector<8x8xf32>
    %255 = arith.truncf %254 : vector<8x8xf32> to vector<8x8xbf16>
    %256 = vector.extract_strided_slice %184 {offsets = [0, 24], sizes = [8, 8], strides = [1, 1]} : vector<8x32xf32> to vector<8x8xf32>
    %257 = arith.truncf %256 : vector<8x8xf32> to vector<8x8xbf16>
    %cst_100 = arith.constant dense<0.000000e+00> : vector<8x8xf32>
    %258 = tpu.matmul %253, %255, %cst_100 {dimension_numbers = #tpu.dot_dimension_numbers<[1], [1], [0], [0], [0, 0, 1, 0], [], []>} : vector<8x8xbf16>, vector<8x8xbf16>, vector<8x8xf32> -> vector<8x8xf32>
    %259 = vector.broadcast %7 : vector<1x8xf32> to vector<8x8xf32>
    %260 = arith.addf %258, %259 : vector<8x8xf32>
    %cst_101 = arith.constant dense<0xFF800000> : vector<8xf32>
    %261 = vector.multi_reduction <maximumf>, %260, %cst_101 [1] : vector<8x8xf32> to vector<8xf32>
    %262 = vector.shape_cast %261 : vector<8xf32> to vector<8x1xf32>
    %263 = vector.broadcast %262 : vector<8x1xf32> to vector<8x8xf32>
    %264 = arith.subf %260, %263 : vector<8x8xf32>
    %265 = math.exp %264 : vector<8x8xf32>
    %cst_102 = arith.constant dense<0.000000e+00> : vector<8xf32>
    %266 = vector.multi_reduction <add>, %265, %cst_102 [1] : vector<8x8xf32> to vector<8xf32>
    %267 = vector.shape_cast %266 : vector<8xf32> to vector<8x1xf32>
    %268 = tpu.reciprocal %267 {approx = true} : vector<8x1xf32> -> vector<8x1xf32>
    %269 = vector.broadcast %268 : vector<8x1xf32> to vector<8x8xf32>
    %270 = arith.mulf %265, %269 : vector<8x8xf32>
    %271 = arith.truncf %270 : vector<8x8xf32> to vector<8x8xbf16>
    %cst_103 = arith.constant dense<0.000000e+00> : vector<8x8xf32>
    %272 = tpu.matmul %271, %257, %cst_103 {dimension_numbers = #tpu.dot_dimension_numbers<[1], [0], [0], [1], [0, 0, 1, 1], [], []>} : vector<8x8xbf16>, vector<8x8xbf16>, vector<8x8xf32> -> vector<8x8xf32>
    %273 = tpu.concatenate %209, %230, %251, %272 in 1 : vector<8x8xf32>, vector<8x8xf32>, vector<8x8xf32>, vector<8x8xf32> -> vector<8x32xf32>
    %274 = arith.truncf %273 : vector<8x32xf32> to vector<8x32xbf16>
    %cst_104 = arith.constant dense<0.000000e+00> : vector<8x32xf32>
    %275 = tpu.matmul %274, %186, %cst_104 {dimension_numbers = #tpu.dot_dimension_numbers<[1], [0], [0], [1], [0, 0, 1, 1], [], []>} : vector<8x32xbf16>, vector<32x32xbf16>, vector<8x32xf32> -> vector<8x32xf32>
    %276 = vector.broadcast %188 : vector<1x32xf32> to vector<8x32xf32>
    %277 = arith.addf %275, %276 : vector<8x32xf32>
    %278 = arith.addf %138, %277 : vector<8x32xf32>
    %c0_105 = arith.constant 0 : index
    %c0_106 = arith.constant 0 : index
    %c0_107 = arith.constant 0 : index
    %279 = vector.load %arg19[%c0_105, %c0_106, %c0_107] : memref<2x1x32xf32, #tpu.memory_space<vmem>>, vector<1x1x32xf32>
    %280 = vector.shape_cast %279 : vector<1x1x32xf32> to vector<1x32xf32>
    %c0_108 = arith.constant 0 : index
    %c0_109 = arith.constant 0 : index
    %c0_110 = arith.constant 0 : index
    %281 = vector.load %arg20[%c0_108, %c0_109, %c0_110] : memref<2x1x32xf32, #tpu.memory_space<vmem>>, vector<1x1x32xf32>
    %282 = vector.shape_cast %281 : vector<1x1x32xf32> to vector<1x32xf32>
    %cst_111 = arith.constant dense<0.000000e+00> : vector<8xf32>
    %283 = vector.multi_reduction <add>, %278, %cst_111 [1] : vector<8x32xf32> to vector<8xf32>
    %284 = vector.shape_cast %283 : vector<8xf32> to vector<8x1xf32>
    %cst_112 = arith.constant 3.200000e+01 : f32
    %285 = vector.broadcast %cst_112 : f32 to vector<8x1xf32>
    %286 = arith.divf %284, %285 : vector<8x1xf32>
    %287 = vector.broadcast %286 : vector<8x1xf32> to vector<8x32xf32>
    %288 = arith.subf %278, %287 : vector<8x32xf32>
    %289 = arith.mulf %288, %288 : vector<8x32xf32>
    %cst_113 = arith.constant dense<0.000000e+00> : vector<8xf32>
    %290 = vector.multi_reduction <add>, %289, %cst_113 [1] : vector<8x32xf32> to vector<8xf32>
    %291 = vector.shape_cast %290 : vector<8xf32> to vector<8x1xf32>
    %cst_114 = arith.constant 3.100000e+01 : f32
    %292 = vector.broadcast %cst_114 : f32 to vector<8x1xf32>
    %293 = arith.divf %291, %292 : vector<8x1xf32>
    %294 = math.sqrt %293 : vector<8x1xf32>
    %295 = vector.broadcast %286 : vector<8x1xf32> to vector<8x32xf32>
    %296 = arith.subf %278, %295 : vector<8x32xf32>
    %297 = vector.broadcast %280 : vector<1x32xf32> to vector<8x32xf32>
    %298 = arith.mulf %297, %296 : vector<8x32xf32>
    %cst_115 = arith.constant 9.99999997E-7 : f32
    %299 = vector.broadcast %cst_115 : f32 to vector<8x1xf32>
    %300 = arith.addf %294, %299 : vector<8x1xf32>
    %301 = vector.broadcast %300 : vector<8x1xf32> to vector<8x32xf32>
    %302 = arith.divf %298, %301 : vector<8x32xf32>
    %303 = vector.broadcast %282 : vector<1x32xf32> to vector<8x32xf32>
    %304 = arith.addf %302, %303 : vector<8x32xf32>
    %305 = arith.truncf %304 : vector<8x32xf32> to vector<8x32xbf16>
    %c0_116 = arith.constant 0 : index
    %c0_117 = arith.constant 0 : index
    %c0_118 = arith.constant 0 : index
    %306 = vector.load %arg21[%c0_116, %c0_117, %c0_118] : memref<2x32x64xbf16, #tpu.memory_space<vmem>>, vector<1x32x64xbf16>
    %307 = vector.shape_cast %306 : vector<1x32x64xbf16> to vector<32x64xbf16>
    %cst_119 = arith.constant dense<0.000000e+00> : vector<8x64xf32>
    %308 = tpu.matmul %305, %307, %cst_119 {dimension_numbers = #tpu.dot_dimension_numbers<[1], [0], [0], [1], [0, 0, 1, 1], [], []>} : vector<8x32xbf16>, vector<32x64xbf16>, vector<8x64xf32> -> vector<8x64xf32>
    %c0_120 = arith.constant 0 : index
    %c0_121 = arith.constant 0 : index
    %c0_122 = arith.constant 0 : index
    %309 = vector.load %arg22[%c0_120, %c0_121, %c0_122] : memref<2x1x64xf32, #tpu.memory_space<vmem>>, vector<1x1x64xf32>
    %310 = vector.shape_cast %309 : vector<1x1x64xf32> to vector<1x64xf32>
    %311 = vector.broadcast %310 : vector<1x64xf32> to vector<8x64xf32>
    %312 = arith.addf %308, %311 : vector<8x64xf32>
    %cst_123 = arith.constant 0.000000e+00 : f32
    %313 = vector.broadcast %cst_123 : f32 to vector<8x64xf32>
    %314 = arith.maximumf %312, %313 : vector<8x64xf32>
    %315 = arith.truncf %314 : vector<8x64xf32> to vector<8x64xbf16>
    %c0_124 = arith.constant 0 : index
    %c0_125 = arith.constant 0 : index
    %c0_126 = arith.constant 0 : index
    %316 = vector.load %arg23[%c0_124, %c0_125, %c0_126] : memref<2x64x32xbf16, #tpu.memory_space<vmem>>, vector<1x64x32xbf16>
    %317 = vector.shape_cast %316 : vector<1x64x32xbf16> to vector<64x32xbf16>
    %cst_127 = arith.constant dense<0.000000e+00> : vector<8x32xf32>
    %318 = tpu.matmul %315, %317, %cst_127 {dimension_numbers = #tpu.dot_dimension_numbers<[1], [0], [0], [1], [0, 0, 1, 1], [], []>} : vector<8x64xbf16>, vector<64x32xbf16>, vector<8x32xf32> -> vector<8x32xf32>
    %319 = arith.addf %278, %318 : vector<8x32xf32>
    %c0_128 = arith.constant 0 : index
    %c0_129 = arith.constant 0 : index
    %c0_130 = arith.constant 0 : index
    %320 = vector.load %arg24[%c0_128, %c0_129, %c0_130] : memref<2x1x32xf32, #tpu.memory_space<vmem>>, vector<1x1x32xf32>
    %321 = vector.shape_cast %320 : vector<1x1x32xf32> to vector<1x32xf32>
    %322 = vector.broadcast %321 : vector<1x32xf32> to vector<8x32xf32>
    %323 = arith.addf %319, %322 : vector<8x32xf32>
    %cst_131 = arith.constant dense<0.000000e+00> : vector<8xf32>
    %324 = vector.multi_reduction <add>, %323, %cst_131 [1] : vector<8x32xf32> to vector<8xf32>
    %325 = vector.shape_cast %324 : vector<8xf32> to vector<8x1xf32>
    %cst_132 = arith.constant 3.200000e+01 : f32
    %326 = vector.broadcast %cst_132 : f32 to vector<8x1xf32>
    %327 = arith.divf %325, %326 : vector<8x1xf32>
    %328 = vector.broadcast %327 : vector<8x1xf32> to vector<8x32xf32>
    %329 = arith.subf %323, %328 : vector<8x32xf32>
    %330 = arith.mulf %329, %329 : vector<8x32xf32>
    %cst_133 = arith.constant dense<0.000000e+00> : vector<8xf32>
    %331 = vector.multi_reduction <add>, %330, %cst_133 [1] : vector<8x32xf32> to vector<8xf32>
    %332 = vector.shape_cast %331 : vector<8xf32> to vector<8x1xf32>
    %cst_134 = arith.constant 3.100000e+01 : f32
    %333 = vector.broadcast %cst_134 : f32 to vector<8x1xf32>
    %334 = arith.divf %332, %333 : vector<8x1xf32>
    %335 = math.sqrt %334 : vector<8x1xf32>
    %336 = vector.broadcast %327 : vector<8x1xf32> to vector<8x32xf32>
    %337 = arith.subf %323, %336 : vector<8x32xf32>
    %338 = vector.broadcast %8 : vector<1x32xf32> to vector<8x32xf32>
    %339 = arith.mulf %338, %337 : vector<8x32xf32>
    %cst_135 = arith.constant 9.99999997E-7 : f32
    %340 = vector.broadcast %cst_135 : f32 to vector<8x1xf32>
    %341 = arith.addf %335, %340 : vector<8x1xf32>
    %342 = vector.broadcast %341 : vector<8x1xf32> to vector<8x32xf32>
    %343 = arith.divf %339, %342 : vector<8x32xf32>
    %344 = vector.broadcast %9 : vector<1x32xf32> to vector<8x32xf32>
    %345 = arith.addf %343, %344 : vector<8x32xf32>
    %c1 = arith.constant 1 : index
    %c0_136 = arith.constant 0 : index
    %c0_137 = arith.constant 0 : index
    %346 = vector.load %arg5[%c1, %c0_136, %c0_137] : memref<2x1x32xf32, #tpu.memory_space<vmem>>, vector<1x1x32xf32>
    %347 = vector.shape_cast %346 : vector<1x1x32xf32> to vector<1x32xf32>
    %c1_138 = arith.constant 1 : index
    %c0_139 = arith.constant 0 : index
    %c0_140 = arith.constant 0 : index
    %348 = vector.load %arg6[%c1_138, %c0_139, %c0_140] : memref<2x1x32xf32, #tpu.memory_space<vmem>>, vector<1x1x32xf32>
    %349 = vector.shape_cast %348 : vector<1x1x32xf32> to vector<1x32xf32>
    %cst_141 = arith.constant dense<0.000000e+00> : vector<8xf32>
    %350 = vector.multi_reduction <add>, %345, %cst_141 [1] : vector<8x32xf32> to vector<8xf32>
    %351 = vector.shape_cast %350 : vector<8xf32> to vector<8x1xf32>
    %cst_142 = arith.constant 3.200000e+01 : f32
    %352 = vector.broadcast %cst_142 : f32 to vector<8x1xf32>
    %353 = arith.divf %351, %352 : vector<8x1xf32>
    %354 = vector.broadcast %353 : vector<8x1xf32> to vector<8x32xf32>
    %355 = arith.subf %345, %354 : vector<8x32xf32>
    %356 = arith.mulf %355, %355 : vector<8x32xf32>
    %cst_143 = arith.constant dense<0.000000e+00> : vector<8xf32>
    %357 = vector.multi_reduction <add>, %356, %cst_143 [1] : vector<8x32xf32> to vector<8xf32>
    %358 = vector.shape_cast %357 : vector<8xf32> to vector<8x1xf32>
    %cst_144 = arith.constant 3.100000e+01 : f32
    %359 = vector.broadcast %cst_144 : f32 to vector<8x1xf32>
    %360 = arith.divf %358, %359 : vector<8x1xf32>
    %361 = math.sqrt %360 : vector<8x1xf32>
    %362 = vector.broadcast %353 : vector<8x1xf32> to vector<8x32xf32>
    %363 = arith.subf %345, %362 : vector<8x32xf32>
    %364 = vector.broadcast %347 : vector<1x32xf32> to vector<8x32xf32>
    %365 = arith.mulf %364, %363 : vector<8x32xf32>
    %cst_145 = arith.constant 9.99999997E-7 : f32
    %366 = vector.broadcast %cst_145 : f32 to vector<8x1xf32>
    %367 = arith.addf %361, %366 : vector<8x1xf32>
    %368 = vector.broadcast %367 : vector<8x1xf32> to vector<8x32xf32>
    %369 = arith.divf %365, %368 : vector<8x32xf32>
    %370 = vector.broadcast %349 : vector<1x32xf32> to vector<8x32xf32>
    %371 = arith.addf %369, %370 : vector<8x32xf32>
    %372 = arith.truncf %371 : vector<8x32xf32> to vector<8x32xbf16>
    %c1_146 = arith.constant 1 : index
    %c0_147 = arith.constant 0 : index
    %c0_148 = arith.constant 0 : index
    %373 = vector.load %arg7[%c1_146, %c0_147, %c0_148] : memref<2x32x96xbf16, #tpu.memory_space<vmem>>, vector<1x32x96xbf16>
    %374 = vector.shape_cast %373 : vector<1x32x96xbf16> to vector<32x96xbf16>
    %cst_149 = arith.constant dense<0.000000e+00> : vector<8x96xf32>
    %375 = tpu.matmul %372, %374, %cst_149 {dimension_numbers = #tpu.dot_dimension_numbers<[1], [0], [0], [1], [0, 0, 1, 1], [], []>} : vector<8x32xbf16>, vector<32x96xbf16>, vector<8x96xf32> -> vector<8x96xf32>
    %c1_150 = arith.constant 1 : index
    %c0_151 = arith.constant 0 : index
    %c0_152 = arith.constant 0 : index
    %376 = vector.load %arg8[%c1_150, %c0_151, %c0_152] : memref<2x1x96xf32, #tpu.memory_space<vmem>>, vector<1x1x96xf32>
    %377 = vector.shape_cast %376 : vector<1x1x96xf32> to vector<1x96xf32>
    %378 = vector.broadcast %377 : vector<1x96xf32> to vector<8x96xf32>
    %379 = arith.addf %375, %378 : vector<8x96xf32>
    %380 = vector.extract_strided_slice %379 {offsets = [0, 0], sizes = [8, 32], strides = [1, 1]} : vector<8x96xf32> to vector<8x32xf32>
    %cst_153 = arith.constant 0.353553385 : f32
    %381 = vector.broadcast %cst_153 : f32 to vector<8x32xf32>
    %382 = arith.mulf %380, %381 : vector<8x32xf32>
    %383 = vector.extract_strided_slice %379 {offsets = [0, 32], sizes = [8, 32], strides = [1, 1]} : vector<8x96xf32> to vector<8x32xf32>
    %384 = vector.extract_strided_slice %379 {offsets = [0, 64], sizes = [8, 32], strides = [1, 1]} : vector<8x96xf32> to vector<8x32xf32>
    %c1_154 = arith.constant 1 : index
    %c0_155 = arith.constant 0 : index
    %c0_156 = arith.constant 0 : index
    %385 = vector.load %arg9[%c1_154, %c0_155, %c0_156] : memref<2x32x32xbf16, #tpu.memory_space<vmem>>, vector<1x32x32xbf16>
    %386 = vector.shape_cast %385 : vector<1x32x32xbf16> to vector<32x32xbf16>
    %c1_157 = arith.constant 1 : index
    %c0_158 = arith.constant 0 : index
    %c0_159 = arith.constant 0 : index
    %387 = vector.load %arg10[%c1_157, %c0_158, %c0_159] : memref<2x1x32xf32, #tpu.memory_space<vmem>>, vector<1x1x32xf32>
    %388 = vector.shape_cast %387 : vector<1x1x32xf32> to vector<1x32xf32>
    %389 = vector.extract_strided_slice %382 {offsets = [0, 0], sizes = [8, 8], strides = [1, 1]} : vector<8x32xf32> to vector<8x8xf32>
    %390 = arith.truncf %389 : vector<8x8xf32> to vector<8x8xbf16>
    %391 = vector.extract_strided_slice %383 {offsets = [0, 0], sizes = [8, 8], strides = [1, 1]} : vector<8x32xf32> to vector<8x8xf32>
    %392 = arith.truncf %391 : vector<8x8xf32> to vector<8x8xbf16>
    %393 = vector.extract_strided_slice %384 {offsets = [0, 0], sizes = [8, 8], strides = [1, 1]} : vector<8x32xf32> to vector<8x8xf32>
    %394 = arith.truncf %393 : vector<8x8xf32> to vector<8x8xbf16>
    %cst_160 = arith.constant dense<0.000000e+00> : vector<8x8xf32>
    %395 = tpu.matmul %390, %392, %cst_160 {dimension_numbers = #tpu.dot_dimension_numbers<[1], [1], [0], [0], [0, 0, 1, 0], [], []>} : vector<8x8xbf16>, vector<8x8xbf16>, vector<8x8xf32> -> vector<8x8xf32>
    %396 = arith.addf %395, %5 : vector<8x8xf32>
    %cst_161 = arith.constant dense<0xFF800000> : vector<8xf32>
    %397 = vector.multi_reduction <maximumf>, %396, %cst_161 [1] : vector<8x8xf32> to vector<8xf32>
    %398 = vector.shape_cast %397 : vector<8xf32> to vector<8x1xf32>
    %399 = vector.broadcast %398 : vector<8x1xf32> to vector<8x8xf32>
    %400 = arith.subf %396, %399 : vector<8x8xf32>
    %401 = math.exp %400 : vector<8x8xf32>
    %cst_162 = arith.constant dense<0.000000e+00> : vector<8xf32>
    %402 = vector.multi_reduction <add>, %401, %cst_162 [1] : vector<8x8xf32> to vector<8xf32>
    %403 = vector.shape_cast %402 : vector<8xf32> to vector<8x1xf32>
    %404 = tpu.reciprocal %403 {approx = true} : vector<8x1xf32> -> vector<8x1xf32>
    %405 = vector.broadcast %404 : vector<8x1xf32> to vector<8x8xf32>
    %406 = arith.mulf %401, %405 : vector<8x8xf32>
    %407 = arith.truncf %406 : vector<8x8xf32> to vector<8x8xbf16>
    %cst_163 = arith.constant dense<0.000000e+00> : vector<8x8xf32>
    %408 = tpu.matmul %407, %394, %cst_163 {dimension_numbers = #tpu.dot_dimension_numbers<[1], [0], [0], [1], [0, 0, 1, 1], [], []>} : vector<8x8xbf16>, vector<8x8xbf16>, vector<8x8xf32> -> vector<8x8xf32>
    %409 = vector.extract_strided_slice %382 {offsets = [0, 8], sizes = [8, 8], strides = [1, 1]} : vector<8x32xf32> to vector<8x8xf32>
    %410 = arith.truncf %409 : vector<8x8xf32> to vector<8x8xbf16>
    %411 = vector.extract_strided_slice %383 {offsets = [0, 8], sizes = [8, 8], strides = [1, 1]} : vector<8x32xf32> to vector<8x8xf32>
    %412 = arith.truncf %411 : vector<8x8xf32> to vector<8x8xbf16>
    %413 = vector.extract_strided_slice %384 {offsets = [0, 8], sizes = [8, 8], strides = [1, 1]} : vector<8x32xf32> to vector<8x8xf32>
    %414 = arith.truncf %413 : vector<8x8xf32> to vector<8x8xbf16>
    %cst_164 = arith.constant dense<0.000000e+00> : vector<8x8xf32>
    %415 = tpu.matmul %410, %412, %cst_164 {dimension_numbers = #tpu.dot_dimension_numbers<[1], [1], [0], [0], [0, 0, 1, 0], [], []>} : vector<8x8xbf16>, vector<8x8xbf16>, vector<8x8xf32> -> vector<8x8xf32>
    %416 = arith.addf %415, %5 : vector<8x8xf32>
    %cst_165 = arith.constant dense<0xFF800000> : vector<8xf32>
    %417 = vector.multi_reduction <maximumf>, %416, %cst_165 [1] : vector<8x8xf32> to vector<8xf32>
    %418 = vector.shape_cast %417 : vector<8xf32> to vector<8x1xf32>
    %419 = vector.broadcast %418 : vector<8x1xf32> to vector<8x8xf32>
    %420 = arith.subf %416, %419 : vector<8x8xf32>
    %421 = math.exp %420 : vector<8x8xf32>
    %cst_166 = arith.constant dense<0.000000e+00> : vector<8xf32>
    %422 = vector.multi_reduction <add>, %421, %cst_166 [1] : vector<8x8xf32> to vector<8xf32>
    %423 = vector.shape_cast %422 : vector<8xf32> to vector<8x1xf32>
    %424 = tpu.reciprocal %423 {approx = true} : vector<8x1xf32> -> vector<8x1xf32>
    %425 = vector.broadcast %424 : vector<8x1xf32> to vector<8x8xf32>
    %426 = arith.mulf %421, %425 : vector<8x8xf32>
    %427 = arith.truncf %426 : vector<8x8xf32> to vector<8x8xbf16>
    %cst_167 = arith.constant dense<0.000000e+00> : vector<8x8xf32>
    %428 = tpu.matmul %427, %414, %cst_167 {dimension_numbers = #tpu.dot_dimension_numbers<[1], [0], [0], [1], [0, 0, 1, 1], [], []>} : vector<8x8xbf16>, vector<8x8xbf16>, vector<8x8xf32> -> vector<8x8xf32>
    %429 = vector.extract_strided_slice %382 {offsets = [0, 16], sizes = [8, 8], strides = [1, 1]} : vector<8x32xf32> to vector<8x8xf32>
    %430 = arith.truncf %429 : vector<8x8xf32> to vector<8x8xbf16>
    %431 = vector.extract_strided_slice %383 {offsets = [0, 16], sizes = [8, 8], strides = [1, 1]} : vector<8x32xf32> to vector<8x8xf32>
    %432 = arith.truncf %431 : vector<8x8xf32> to vector<8x8xbf16>
    %433 = vector.extract_strided_slice %384 {offsets = [0, 16], sizes = [8, 8], strides = [1, 1]} : vector<8x32xf32> to vector<8x8xf32>
    %434 = arith.truncf %433 : vector<8x8xf32> to vector<8x8xbf16>
    %cst_168 = arith.constant dense<0.000000e+00> : vector<8x8xf32>
    %435 = tpu.matmul %430, %432, %cst_168 {dimension_numbers = #tpu.dot_dimension_numbers<[1], [1], [0], [0], [0, 0, 1, 0], [], []>} : vector<8x8xbf16>, vector<8x8xbf16>, vector<8x8xf32> -> vector<8x8xf32>
    %436 = arith.addf %435, %5 : vector<8x8xf32>
    %cst_169 = arith.constant dense<0xFF800000> : vector<8xf32>
    %437 = vector.multi_reduction <maximumf>, %436, %cst_169 [1] : vector<8x8xf32> to vector<8xf32>
    %438 = vector.shape_cast %437 : vector<8xf32> to vector<8x1xf32>
    %439 = vector.broadcast %438 : vector<8x1xf32> to vector<8x8xf32>
    %440 = arith.subf %436, %439 : vector<8x8xf32>
    %441 = math.exp %440 : vector<8x8xf32>
    %cst_170 = arith.constant dense<0.000000e+00> : vector<8xf32>
    %442 = vector.multi_reduction <add>, %441, %cst_170 [1] : vector<8x8xf32> to vector<8xf32>
    %443 = vector.shape_cast %442 : vector<8xf32> to vector<8x1xf32>
    %444 = tpu.reciprocal %443 {approx = true} : vector<8x1xf32> -> vector<8x1xf32>
    %445 = vector.broadcast %444 : vector<8x1xf32> to vector<8x8xf32>
    %446 = arith.mulf %441, %445 : vector<8x8xf32>
    %447 = arith.truncf %446 : vector<8x8xf32> to vector<8x8xbf16>
    %cst_171 = arith.constant dense<0.000000e+00> : vector<8x8xf32>
    %448 = tpu.matmul %447, %434, %cst_171 {dimension_numbers = #tpu.dot_dimension_numbers<[1], [0], [0], [1], [0, 0, 1, 1], [], []>} : vector<8x8xbf16>, vector<8x8xbf16>, vector<8x8xf32> -> vector<8x8xf32>
    %449 = vector.extract_strided_slice %382 {offsets = [0, 24], sizes = [8, 8], strides = [1, 1]} : vector<8x32xf32> to vector<8x8xf32>
    %450 = arith.truncf %449 : vector<8x8xf32> to vector<8x8xbf16>
    %451 = vector.extract_strided_slice %383 {offsets = [0, 24], sizes = [8, 8], strides = [1, 1]} : vector<8x32xf32> to vector<8x8xf32>
    %452 = arith.truncf %451 : vector<8x8xf32> to vector<8x8xbf16>
    %453 = vector.extract_strided_slice %384 {offsets = [0, 24], sizes = [8, 8], strides = [1, 1]} : vector<8x32xf32> to vector<8x8xf32>
    %454 = arith.truncf %453 : vector<8x8xf32> to vector<8x8xbf16>
    %cst_172 = arith.constant dense<0.000000e+00> : vector<8x8xf32>
    %455 = tpu.matmul %450, %452, %cst_172 {dimension_numbers = #tpu.dot_dimension_numbers<[1], [1], [0], [0], [0, 0, 1, 0], [], []>} : vector<8x8xbf16>, vector<8x8xbf16>, vector<8x8xf32> -> vector<8x8xf32>
    %456 = arith.addf %455, %5 : vector<8x8xf32>
    %cst_173 = arith.constant dense<0xFF800000> : vector<8xf32>
    %457 = vector.multi_reduction <maximumf>, %456, %cst_173 [1] : vector<8x8xf32> to vector<8xf32>
    %458 = vector.shape_cast %457 : vector<8xf32> to vector<8x1xf32>
    %459 = vector.broadcast %458 : vector<8x1xf32> to vector<8x8xf32>
    %460 = arith.subf %456, %459 : vector<8x8xf32>
    %461 = math.exp %460 : vector<8x8xf32>
    %cst_174 = arith.constant dense<0.000000e+00> : vector<8xf32>
    %462 = vector.multi_reduction <add>, %461, %cst_174 [1] : vector<8x8xf32> to vector<8xf32>
    %463 = vector.shape_cast %462 : vector<8xf32> to vector<8x1xf32>
    %464 = tpu.reciprocal %463 {approx = true} : vector<8x1xf32> -> vector<8x1xf32>
    %465 = vector.broadcast %464 : vector<8x1xf32> to vector<8x8xf32>
    %466 = arith.mulf %461, %465 : vector<8x8xf32>
    %467 = arith.truncf %466 : vector<8x8xf32> to vector<8x8xbf16>
    %cst_175 = arith.constant dense<0.000000e+00> : vector<8x8xf32>
    %468 = tpu.matmul %467, %454, %cst_175 {dimension_numbers = #tpu.dot_dimension_numbers<[1], [0], [0], [1], [0, 0, 1, 1], [], []>} : vector<8x8xbf16>, vector<8x8xbf16>, vector<8x8xf32> -> vector<8x8xf32>
    %469 = tpu.concatenate %408, %428, %448, %468 in 1 : vector<8x8xf32>, vector<8x8xf32>, vector<8x8xf32>, vector<8x8xf32> -> vector<8x32xf32>
    %470 = arith.truncf %469 : vector<8x32xf32> to vector<8x32xbf16>
    %cst_176 = arith.constant dense<0.000000e+00> : vector<8x32xf32>
    %471 = tpu.matmul %470, %386, %cst_176 {dimension_numbers = #tpu.dot_dimension_numbers<[1], [0], [0], [1], [0, 0, 1, 1], [], []>} : vector<8x32xbf16>, vector<32x32xbf16>, vector<8x32xf32> -> vector<8x32xf32>
    %472 = vector.broadcast %388 : vector<1x32xf32> to vector<8x32xf32>
    %473 = arith.addf %471, %472 : vector<8x32xf32>
    %474 = arith.addf %345, %473 : vector<8x32xf32>
    %c1_177 = arith.constant 1 : index
    %c0_178 = arith.constant 0 : index
    %c0_179 = arith.constant 0 : index
    %475 = vector.load %arg11[%c1_177, %c0_178, %c0_179] : memref<2x1x32xf32, #tpu.memory_space<vmem>>, vector<1x1x32xf32>
    %476 = vector.shape_cast %475 : vector<1x1x32xf32> to vector<1x32xf32>
    %c1_180 = arith.constant 1 : index
    %c0_181 = arith.constant 0 : index
    %c0_182 = arith.constant 0 : index
    %477 = vector.load %arg12[%c1_180, %c0_181, %c0_182] : memref<2x1x32xf32, #tpu.memory_space<vmem>>, vector<1x1x32xf32>
    %478 = vector.shape_cast %477 : vector<1x1x32xf32> to vector<1x32xf32>
    %cst_183 = arith.constant dense<0.000000e+00> : vector<8xf32>
    %479 = vector.multi_reduction <add>, %474, %cst_183 [1] : vector<8x32xf32> to vector<8xf32>
    %480 = vector.shape_cast %479 : vector<8xf32> to vector<8x1xf32>
    %cst_184 = arith.constant 3.200000e+01 : f32
    %481 = vector.broadcast %cst_184 : f32 to vector<8x1xf32>
    %482 = arith.divf %480, %481 : vector<8x1xf32>
    %483 = vector.broadcast %482 : vector<8x1xf32> to vector<8x32xf32>
    %484 = arith.subf %474, %483 : vector<8x32xf32>
    %485 = arith.mulf %484, %484 : vector<8x32xf32>
    %cst_185 = arith.constant dense<0.000000e+00> : vector<8xf32>
    %486 = vector.multi_reduction <add>, %485, %cst_185 [1] : vector<8x32xf32> to vector<8xf32>
    %487 = vector.shape_cast %486 : vector<8xf32> to vector<8x1xf32>
    %cst_186 = arith.constant 3.100000e+01 : f32
    %488 = vector.broadcast %cst_186 : f32 to vector<8x1xf32>
    %489 = arith.divf %487, %488 : vector<8x1xf32>
    %490 = math.sqrt %489 : vector<8x1xf32>
    %491 = vector.broadcast %482 : vector<8x1xf32> to vector<8x32xf32>
    %492 = arith.subf %474, %491 : vector<8x32xf32>
    %493 = vector.broadcast %476 : vector<1x32xf32> to vector<8x32xf32>
    %494 = arith.mulf %493, %492 : vector<8x32xf32>
    %cst_187 = arith.constant 9.99999997E-7 : f32
    %495 = vector.broadcast %cst_187 : f32 to vector<8x1xf32>
    %496 = arith.addf %490, %495 : vector<8x1xf32>
    %497 = vector.broadcast %496 : vector<8x1xf32> to vector<8x32xf32>
    %498 = arith.divf %494, %497 : vector<8x32xf32>
    %499 = vector.broadcast %478 : vector<1x32xf32> to vector<8x32xf32>
    %500 = arith.addf %498, %499 : vector<8x32xf32>
    %501 = arith.truncf %500 : vector<8x32xf32> to vector<8x32xbf16>
    %c1_188 = arith.constant 1 : index
    %c0_189 = arith.constant 0 : index
    %c0_190 = arith.constant 0 : index
    %502 = vector.load %arg13[%c1_188, %c0_189, %c0_190] : memref<2x32x32xbf16, #tpu.memory_space<vmem>>, vector<1x32x32xbf16>
    %503 = vector.shape_cast %502 : vector<1x32x32xbf16> to vector<32x32xbf16>
    %cst_191 = arith.constant dense<0.000000e+00> : vector<8x32xf32>
    %504 = tpu.matmul %501, %503, %cst_191 {dimension_numbers = #tpu.dot_dimension_numbers<[1], [0], [0], [1], [0, 0, 1, 1], [], []>} : vector<8x32xbf16>, vector<32x32xbf16>, vector<8x32xf32> -> vector<8x32xf32>
    %c1_192 = arith.constant 1 : index
    %c0_193 = arith.constant 0 : index
    %c0_194 = arith.constant 0 : index
    %505 = vector.load %arg14[%c1_192, %c0_193, %c0_194] : memref<2x1x32xf32, #tpu.memory_space<vmem>>, vector<1x1x32xf32>
    %506 = vector.shape_cast %505 : vector<1x1x32xf32> to vector<1x32xf32>
    %507 = vector.broadcast %506 : vector<1x32xf32> to vector<8x32xf32>
    %508 = arith.addf %504, %507 : vector<8x32xf32>
    %cst_195 = arith.constant 0.353553385 : f32
    %509 = vector.broadcast %cst_195 : f32 to vector<8x32xf32>
    %510 = arith.mulf %508, %509 : vector<8x32xf32>
    %511 = arith.truncf %3 : vector<8x32xf32> to vector<8x32xbf16>
    %c1_196 = arith.constant 1 : index
    %c0_197 = arith.constant 0 : index
    %c0_198 = arith.constant 0 : index
    %512 = vector.load %arg15[%c1_196, %c0_197, %c0_198] : memref<2x32x64xbf16, #tpu.memory_space<vmem>>, vector<1x32x64xbf16>
    %513 = vector.shape_cast %512 : vector<1x32x64xbf16> to vector<32x64xbf16>
    %cst_199 = arith.constant dense<0.000000e+00> : vector<8x64xf32>
    %514 = tpu.matmul %511, %513, %cst_199 {dimension_numbers = #tpu.dot_dimension_numbers<[1], [0], [0], [1], [0, 0, 1, 1], [], []>} : vector<8x32xbf16>, vector<32x64xbf16>, vector<8x64xf32> -> vector<8x64xf32>
    %c1_200 = arith.constant 1 : index
    %c0_201 = arith.constant 0 : index
    %c0_202 = arith.constant 0 : index
    %515 = vector.load %arg16[%c1_200, %c0_201, %c0_202] : memref<2x1x64xf32, #tpu.memory_space<vmem>>, vector<1x1x64xf32>
    %516 = vector.shape_cast %515 : vector<1x1x64xf32> to vector<1x64xf32>
    %517 = vector.broadcast %516 : vector<1x64xf32> to vector<8x64xf32>
    %518 = arith.addf %514, %517 : vector<8x64xf32>
    %519 = vector.extract_strided_slice %518 {offsets = [0, 0], sizes = [8, 32], strides = [1, 1]} : vector<8x64xf32> to vector<8x32xf32>
    %520 = vector.extract_strided_slice %518 {offsets = [0, 32], sizes = [8, 32], strides = [1, 1]} : vector<8x64xf32> to vector<8x32xf32>
    %c1_203 = arith.constant 1 : index
    %c0_204 = arith.constant 0 : index
    %c0_205 = arith.constant 0 : index
    %521 = vector.load %arg17[%c1_203, %c0_204, %c0_205] : memref<2x32x32xbf16, #tpu.memory_space<vmem>>, vector<1x32x32xbf16>
    %522 = vector.shape_cast %521 : vector<1x32x32xbf16> to vector<32x32xbf16>
    %c1_206 = arith.constant 1 : index
    %c0_207 = arith.constant 0 : index
    %c0_208 = arith.constant 0 : index
    %523 = vector.load %arg18[%c1_206, %c0_207, %c0_208] : memref<2x1x32xf32, #tpu.memory_space<vmem>>, vector<1x1x32xf32>
    %524 = vector.shape_cast %523 : vector<1x1x32xf32> to vector<1x32xf32>
    %525 = vector.extract_strided_slice %510 {offsets = [0, 0], sizes = [8, 8], strides = [1, 1]} : vector<8x32xf32> to vector<8x8xf32>
    %526 = arith.truncf %525 : vector<8x8xf32> to vector<8x8xbf16>
    %527 = vector.extract_strided_slice %519 {offsets = [0, 0], sizes = [8, 8], strides = [1, 1]} : vector<8x32xf32> to vector<8x8xf32>
    %528 = arith.truncf %527 : vector<8x8xf32> to vector<8x8xbf16>
    %529 = vector.extract_strided_slice %520 {offsets = [0, 0], sizes = [8, 8], strides = [1, 1]} : vector<8x32xf32> to vector<8x8xf32>
    %530 = arith.truncf %529 : vector<8x8xf32> to vector<8x8xbf16>
    %cst_209 = arith.constant dense<0.000000e+00> : vector<8x8xf32>
    %531 = tpu.matmul %526, %528, %cst_209 {dimension_numbers = #tpu.dot_dimension_numbers<[1], [1], [0], [0], [0, 0, 1, 0], [], []>} : vector<8x8xbf16>, vector<8x8xbf16>, vector<8x8xf32> -> vector<8x8xf32>
    %532 = vector.broadcast %7 : vector<1x8xf32> to vector<8x8xf32>
    %533 = arith.addf %531, %532 : vector<8x8xf32>
    %cst_210 = arith.constant dense<0xFF800000> : vector<8xf32>
    %534 = vector.multi_reduction <maximumf>, %533, %cst_210 [1] : vector<8x8xf32> to vector<8xf32>
    %535 = vector.shape_cast %534 : vector<8xf32> to vector<8x1xf32>
    %536 = vector.broadcast %535 : vector<8x1xf32> to vector<8x8xf32>
    %537 = arith.subf %533, %536 : vector<8x8xf32>
    %538 = math.exp %537 : vector<8x8xf32>
    %cst_211 = arith.constant dense<0.000000e+00> : vector<8xf32>
    %539 = vector.multi_reduction <add>, %538, %cst_211 [1] : vector<8x8xf32> to vector<8xf32>
    %540 = vector.shape_cast %539 : vector<8xf32> to vector<8x1xf32>
    %541 = tpu.reciprocal %540 {approx = true} : vector<8x1xf32> -> vector<8x1xf32>
    %542 = vector.broadcast %541 : vector<8x1xf32> to vector<8x8xf32>
    %543 = arith.mulf %538, %542 : vector<8x8xf32>
    %544 = arith.truncf %543 : vector<8x8xf32> to vector<8x8xbf16>
    %cst_212 = arith.constant dense<0.000000e+00> : vector<8x8xf32>
    %545 = tpu.matmul %544, %530, %cst_212 {dimension_numbers = #tpu.dot_dimension_numbers<[1], [0], [0], [1], [0, 0, 1, 1], [], []>} : vector<8x8xbf16>, vector<8x8xbf16>, vector<8x8xf32> -> vector<8x8xf32>
    %546 = vector.extract_strided_slice %510 {offsets = [0, 8], sizes = [8, 8], strides = [1, 1]} : vector<8x32xf32> to vector<8x8xf32>
    %547 = arith.truncf %546 : vector<8x8xf32> to vector<8x8xbf16>
    %548 = vector.extract_strided_slice %519 {offsets = [0, 8], sizes = [8, 8], strides = [1, 1]} : vector<8x32xf32> to vector<8x8xf32>
    %549 = arith.truncf %548 : vector<8x8xf32> to vector<8x8xbf16>
    %550 = vector.extract_strided_slice %520 {offsets = [0, 8], sizes = [8, 8], strides = [1, 1]} : vector<8x32xf32> to vector<8x8xf32>
    %551 = arith.truncf %550 : vector<8x8xf32> to vector<8x8xbf16>
    %cst_213 = arith.constant dense<0.000000e+00> : vector<8x8xf32>
    %552 = tpu.matmul %547, %549, %cst_213 {dimension_numbers = #tpu.dot_dimension_numbers<[1], [1], [0], [0], [0, 0, 1, 0], [], []>} : vector<8x8xbf16>, vector<8x8xbf16>, vector<8x8xf32> -> vector<8x8xf32>
    %553 = vector.broadcast %7 : vector<1x8xf32> to vector<8x8xf32>
    %554 = arith.addf %552, %553 : vector<8x8xf32>
    %cst_214 = arith.constant dense<0xFF800000> : vector<8xf32>
    %555 = vector.multi_reduction <maximumf>, %554, %cst_214 [1] : vector<8x8xf32> to vector<8xf32>
    %556 = vector.shape_cast %555 : vector<8xf32> to vector<8x1xf32>
    %557 = vector.broadcast %556 : vector<8x1xf32> to vector<8x8xf32>
    %558 = arith.subf %554, %557 : vector<8x8xf32>
    %559 = math.exp %558 : vector<8x8xf32>
    %cst_215 = arith.constant dense<0.000000e+00> : vector<8xf32>
    %560 = vector.multi_reduction <add>, %559, %cst_215 [1] : vector<8x8xf32> to vector<8xf32>
    %561 = vector.shape_cast %560 : vector<8xf32> to vector<8x1xf32>
    %562 = tpu.reciprocal %561 {approx = true} : vector<8x1xf32> -> vector<8x1xf32>
    %563 = vector.broadcast %562 : vector<8x1xf32> to vector<8x8xf32>
    %564 = arith.mulf %559, %563 : vector<8x8xf32>
    %565 = arith.truncf %564 : vector<8x8xf32> to vector<8x8xbf16>
    %cst_216 = arith.constant dense<0.000000e+00> : vector<8x8xf32>
    %566 = tpu.matmul %565, %551, %cst_216 {dimension_numbers = #tpu.dot_dimension_numbers<[1], [0], [0], [1], [0, 0, 1, 1], [], []>} : vector<8x8xbf16>, vector<8x8xbf16>, vector<8x8xf32> -> vector<8x8xf32>
    %567 = vector.extract_strided_slice %510 {offsets = [0, 16], sizes = [8, 8], strides = [1, 1]} : vector<8x32xf32> to vector<8x8xf32>
    %568 = arith.truncf %567 : vector<8x8xf32> to vector<8x8xbf16>
    %569 = vector.extract_strided_slice %519 {offsets = [0, 16], sizes = [8, 8], strides = [1, 1]} : vector<8x32xf32> to vector<8x8xf32>
    %570 = arith.truncf %569 : vector<8x8xf32> to vector<8x8xbf16>
    %571 = vector.extract_strided_slice %520 {offsets = [0, 16], sizes = [8, 8], strides = [1, 1]} : vector<8x32xf32> to vector<8x8xf32>
    %572 = arith.truncf %571 : vector<8x8xf32> to vector<8x8xbf16>
    %cst_217 = arith.constant dense<0.000000e+00> : vector<8x8xf32>
    %573 = tpu.matmul %568, %570, %cst_217 {dimension_numbers = #tpu.dot_dimension_numbers<[1], [1], [0], [0], [0, 0, 1, 0], [], []>} : vector<8x8xbf16>, vector<8x8xbf16>, vector<8x8xf32> -> vector<8x8xf32>
    %574 = vector.broadcast %7 : vector<1x8xf32> to vector<8x8xf32>
    %575 = arith.addf %573, %574 : vector<8x8xf32>
    %cst_218 = arith.constant dense<0xFF800000> : vector<8xf32>
    %576 = vector.multi_reduction <maximumf>, %575, %cst_218 [1] : vector<8x8xf32> to vector<8xf32>
    %577 = vector.shape_cast %576 : vector<8xf32> to vector<8x1xf32>
    %578 = vector.broadcast %577 : vector<8x1xf32> to vector<8x8xf32>
    %579 = arith.subf %575, %578 : vector<8x8xf32>
    %580 = math.exp %579 : vector<8x8xf32>
    %cst_219 = arith.constant dense<0.000000e+00> : vector<8xf32>
    %581 = vector.multi_reduction <add>, %580, %cst_219 [1] : vector<8x8xf32> to vector<8xf32>
    %582 = vector.shape_cast %581 : vector<8xf32> to vector<8x1xf32>
    %583 = tpu.reciprocal %582 {approx = true} : vector<8x1xf32> -> vector<8x1xf32>
    %584 = vector.broadcast %583 : vector<8x1xf32> to vector<8x8xf32>
    %585 = arith.mulf %580, %584 : vector<8x8xf32>
    %586 = arith.truncf %585 : vector<8x8xf32> to vector<8x8xbf16>
    %cst_220 = arith.constant dense<0.000000e+00> : vector<8x8xf32>
    %587 = tpu.matmul %586, %572, %cst_220 {dimension_numbers = #tpu.dot_dimension_numbers<[1], [0], [0], [1], [0, 0, 1, 1], [], []>} : vector<8x8xbf16>, vector<8x8xbf16>, vector<8x8xf32> -> vector<8x8xf32>
    %588 = vector.extract_strided_slice %510 {offsets = [0, 24], sizes = [8, 8], strides = [1, 1]} : vector<8x32xf32> to vector<8x8xf32>
    %589 = arith.truncf %588 : vector<8x8xf32> to vector<8x8xbf16>
    %590 = vector.extract_strided_slice %519 {offsets = [0, 24], sizes = [8, 8], strides = [1, 1]} : vector<8x32xf32> to vector<8x8xf32>
    %591 = arith.truncf %590 : vector<8x8xf32> to vector<8x8xbf16>
    %592 = vector.extract_strided_slice %520 {offsets = [0, 24], sizes = [8, 8], strides = [1, 1]} : vector<8x32xf32> to vector<8x8xf32>
    %593 = arith.truncf %592 : vector<8x8xf32> to vector<8x8xbf16>
    %cst_221 = arith.constant dense<0.000000e+00> : vector<8x8xf32>
    %594 = tpu.matmul %589, %591, %cst_221 {dimension_numbers = #tpu.dot_dimension_numbers<[1], [1], [0], [0], [0, 0, 1, 0], [], []>} : vector<8x8xbf16>, vector<8x8xbf16>, vector<8x8xf32> -> vector<8x8xf32>
    %595 = vector.broadcast %7 : vector<1x8xf32> to vector<8x8xf32>
    %596 = arith.addf %594, %595 : vector<8x8xf32>
    %cst_222 = arith.constant dense<0xFF800000> : vector<8xf32>
    %597 = vector.multi_reduction <maximumf>, %596, %cst_222 [1] : vector<8x8xf32> to vector<8xf32>
    %598 = vector.shape_cast %597 : vector<8xf32> to vector<8x1xf32>
    %599 = vector.broadcast %598 : vector<8x1xf32> to vector<8x8xf32>
    %600 = arith.subf %596, %599 : vector<8x8xf32>
    %601 = math.exp %600 : vector<8x8xf32>
    %cst_223 = arith.constant dense<0.000000e+00> : vector<8xf32>
    %602 = vector.multi_reduction <add>, %601, %cst_223 [1] : vector<8x8xf32> to vector<8xf32>
    %603 = vector.shape_cast %602 : vector<8xf32> to vector<8x1xf32>
    %604 = tpu.reciprocal %603 {approx = true} : vector<8x1xf32> -> vector<8x1xf32>
    %605 = vector.broadcast %604 : vector<8x1xf32> to vector<8x8xf32>
    %606 = arith.mulf %601, %605 : vector<8x8xf32>
    %607 = arith.truncf %606 : vector<8x8xf32> to vector<8x8xbf16>
    %cst_224 = arith.constant dense<0.000000e+00> : vector<8x8xf32>
    %608 = tpu.matmul %607, %593, %cst_224 {dimension_numbers = #tpu.dot_dimension_numbers<[1], [0], [0], [1], [0, 0, 1, 1], [], []>} : vector<8x8xbf16>, vector<8x8xbf16>, vector<8x8xf32> -> vector<8x8xf32>
    %609 = tpu.concatenate %545, %566, %587, %608 in 1 : vector<8x8xf32>, vector<8x8xf32>, vector<8x8xf32>, vector<8x8xf32> -> vector<8x32xf32>
    %610 = arith.truncf %609 : vector<8x32xf32> to vector<8x32xbf16>
    %cst_225 = arith.constant dense<0.000000e+00> : vector<8x32xf32>
    %611 = tpu.matmul %610, %522, %cst_225 {dimension_numbers = #tpu.dot_dimension_numbers<[1], [0], [0], [1], [0, 0, 1, 1], [], []>} : vector<8x32xbf16>, vector<32x32xbf16>, vector<8x32xf32> -> vector<8x32xf32>
    %612 = vector.broadcast %524 : vector<1x32xf32> to vector<8x32xf32>
    %613 = arith.addf %611, %612 : vector<8x32xf32>
    %614 = arith.addf %474, %613 : vector<8x32xf32>
    %c1_226 = arith.constant 1 : index
    %c0_227 = arith.constant 0 : index
    %c0_228 = arith.constant 0 : index
    %615 = vector.load %arg19[%c1_226, %c0_227, %c0_228] : memref<2x1x32xf32, #tpu.memory_space<vmem>>, vector<1x1x32xf32>
    %616 = vector.shape_cast %615 : vector<1x1x32xf32> to vector<1x32xf32>
    %c1_229 = arith.constant 1 : index
    %c0_230 = arith.constant 0 : index
    %c0_231 = arith.constant 0 : index
    %617 = vector.load %arg20[%c1_229, %c0_230, %c0_231] : memref<2x1x32xf32, #tpu.memory_space<vmem>>, vector<1x1x32xf32>
    %618 = vector.shape_cast %617 : vector<1x1x32xf32> to vector<1x32xf32>
    %cst_232 = arith.constant dense<0.000000e+00> : vector<8xf32>
    %619 = vector.multi_reduction <add>, %614, %cst_232 [1] : vector<8x32xf32> to vector<8xf32>
    %620 = vector.shape_cast %619 : vector<8xf32> to vector<8x1xf32>
    %cst_233 = arith.constant 3.200000e+01 : f32
    %621 = vector.broadcast %cst_233 : f32 to vector<8x1xf32>
    %622 = arith.divf %620, %621 : vector<8x1xf32>
    %623 = vector.broadcast %622 : vector<8x1xf32> to vector<8x32xf32>
    %624 = arith.subf %614, %623 : vector<8x32xf32>
    %625 = arith.mulf %624, %624 : vector<8x32xf32>
    %cst_234 = arith.constant dense<0.000000e+00> : vector<8xf32>
    %626 = vector.multi_reduction <add>, %625, %cst_234 [1] : vector<8x32xf32> to vector<8xf32>
    %627 = vector.shape_cast %626 : vector<8xf32> to vector<8x1xf32>
    %cst_235 = arith.constant 3.100000e+01 : f32
    %628 = vector.broadcast %cst_235 : f32 to vector<8x1xf32>
    %629 = arith.divf %627, %628 : vector<8x1xf32>
    %630 = math.sqrt %629 : vector<8x1xf32>
    %631 = vector.broadcast %622 : vector<8x1xf32> to vector<8x32xf32>
    %632 = arith.subf %614, %631 : vector<8x32xf32>
    %633 = vector.broadcast %616 : vector<1x32xf32> to vector<8x32xf32>
    %634 = arith.mulf %633, %632 : vector<8x32xf32>
    %cst_236 = arith.constant 9.99999997E-7 : f32
    %635 = vector.broadcast %cst_236 : f32 to vector<8x1xf32>
    %636 = arith.addf %630, %635 : vector<8x1xf32>
    %637 = vector.broadcast %636 : vector<8x1xf32> to vector<8x32xf32>
    %638 = arith.divf %634, %637 : vector<8x32xf32>
    %639 = vector.broadcast %618 : vector<1x32xf32> to vector<8x32xf32>
    %640 = arith.addf %638, %639 : vector<8x32xf32>
    %641 = arith.truncf %640 : vector<8x32xf32> to vector<8x32xbf16>
    %c1_237 = arith.constant 1 : index
    %c0_238 = arith.constant 0 : index
    %c0_239 = arith.constant 0 : index
    %642 = vector.load %arg21[%c1_237, %c0_238, %c0_239] : memref<2x32x64xbf16, #tpu.memory_space<vmem>>, vector<1x32x64xbf16>
    %643 = vector.shape_cast %642 : vector<1x32x64xbf16> to vector<32x64xbf16>
    %cst_240 = arith.constant dense<0.000000e+00> : vector<8x64xf32>
    %644 = tpu.matmul %641, %643, %cst_240 {dimension_numbers = #tpu.dot_dimension_numbers<[1], [0], [0], [1], [0, 0, 1, 1], [], []>} : vector<8x32xbf16>, vector<32x64xbf16>, vector<8x64xf32> -> vector<8x64xf32>
    %c1_241 = arith.constant 1 : index
    %c0_242 = arith.constant 0 : index
    %c0_243 = arith.constant 0 : index
    %645 = vector.load %arg22[%c1_241, %c0_242, %c0_243] : memref<2x1x64xf32, #tpu.memory_space<vmem>>, vector<1x1x64xf32>
    %646 = vector.shape_cast %645 : vector<1x1x64xf32> to vector<1x64xf32>
    %647 = vector.broadcast %646 : vector<1x64xf32> to vector<8x64xf32>
    %648 = arith.addf %644, %647 : vector<8x64xf32>
    %cst_244 = arith.constant 0.000000e+00 : f32
    %649 = vector.broadcast %cst_244 : f32 to vector<8x64xf32>
    %650 = arith.maximumf %648, %649 : vector<8x64xf32>
    %651 = arith.truncf %650 : vector<8x64xf32> to vector<8x64xbf16>
    %c1_245 = arith.constant 1 : index
    %c0_246 = arith.constant 0 : index
    %c0_247 = arith.constant 0 : index
    %652 = vector.load %arg23[%c1_245, %c0_246, %c0_247] : memref<2x64x32xbf16, #tpu.memory_space<vmem>>, vector<1x64x32xbf16>
    %653 = vector.shape_cast %652 : vector<1x64x32xbf16> to vector<64x32xbf16>
    %cst_248 = arith.constant dense<0.000000e+00> : vector<8x32xf32>
    %654 = tpu.matmul %651, %653, %cst_248 {dimension_numbers = #tpu.dot_dimension_numbers<[1], [0], [0], [1], [0, 0, 1, 1], [], []>} : vector<8x64xbf16>, vector<64x32xbf16>, vector<8x32xf32> -> vector<8x32xf32>
    %655 = arith.addf %614, %654 : vector<8x32xf32>
    %c1_249 = arith.constant 1 : index
    %c0_250 = arith.constant 0 : index
    %c0_251 = arith.constant 0 : index
    %656 = vector.load %arg24[%c1_249, %c0_250, %c0_251] : memref<2x1x32xf32, #tpu.memory_space<vmem>>, vector<1x1x32xf32>
    %657 = vector.shape_cast %656 : vector<1x1x32xf32> to vector<1x32xf32>
    %658 = vector.broadcast %657 : vector<1x32xf32> to vector<8x32xf32>
    %659 = arith.addf %655, %658 : vector<8x32xf32>
    %cst_252 = arith.constant dense<0.000000e+00> : vector<8xf32>
    %660 = vector.multi_reduction <add>, %659, %cst_252 [1] : vector<8x32xf32> to vector<8xf32>
    %661 = vector.shape_cast %660 : vector<8xf32> to vector<8x1xf32>
    %cst_253 = arith.constant 3.200000e+01 : f32
    %662 = vector.broadcast %cst_253 : f32 to vector<8x1xf32>
    %663 = arith.divf %661, %662 : vector<8x1xf32>
    %664 = vector.broadcast %663 : vector<8x1xf32> to vector<8x32xf32>
    %665 = arith.subf %659, %664 : vector<8x32xf32>
    %666 = arith.mulf %665, %665 : vector<8x32xf32>
    %cst_254 = arith.constant dense<0.000000e+00> : vector<8xf32>
    %667 = vector.multi_reduction <add>, %666, %cst_254 [1] : vector<8x32xf32> to vector<8xf32>
    %668 = vector.shape_cast %667 : vector<8xf32> to vector<8x1xf32>
    %cst_255 = arith.constant 3.100000e+01 : f32
    %669 = vector.broadcast %cst_255 : f32 to vector<8x1xf32>
    %670 = arith.divf %668, %669 : vector<8x1xf32>
    %671 = math.sqrt %670 : vector<8x1xf32>
    %672 = vector.broadcast %663 : vector<8x1xf32> to vector<8x32xf32>
    %673 = arith.subf %659, %672 : vector<8x32xf32>
    %674 = vector.broadcast %8 : vector<1x32xf32> to vector<8x32xf32>
    %675 = arith.mulf %674, %673 : vector<8x32xf32>
    %cst_256 = arith.constant 9.99999997E-7 : f32
    %676 = vector.broadcast %cst_256 : f32 to vector<8x1xf32>
    %677 = arith.addf %671, %676 : vector<8x1xf32>
    %678 = vector.broadcast %677 : vector<8x1xf32> to vector<8x32xf32>
    %679 = arith.divf %675, %678 : vector<8x32xf32>
    %680 = vector.broadcast %9 : vector<1x32xf32> to vector<8x32xf32>
    %681 = arith.addf %679, %680 : vector<8x32xf32>
    %c0_257 = arith.constant 0 : index
    %c0_258 = arith.constant 0 : index
    %c0_259 = arith.constant 0 : index
    %682 = vector.load %arg27[%c0_257, %c0_258, %c0_259] : memref<1x8x32xf32, #tpu.memory_space<vmem>>, vector<1x8x32xf32>
    %683 = vector.shape_cast %682 : vector<1x8x32xf32> to vector<8x32xf32>
    %684 = vector.shape_cast %681 : vector<8x32xf32> to vector<1x8x32xf32>
    tpu.vector_store %arg27[%c0_257, %c0_258, %c0_259], %684 {strides = array<i32>} : memref<1x8x32xf32, #tpu.memory_space<vmem>>, vector<1x8x32xf32>,
    return
  }
  func.func @transform_0(%arg0: i32) -> (i32, i32, i32) {
    %c0_i32 = arith.constant 0 : i32
    %c0_i32_0 = arith.constant 0 : i32
    %c0_i32_1 = arith.constant 0 : i32
    return %arg0, %c0_i32, %c0_i32_0 : i32, i32, i32
  }
  func.func @transform_1(%arg0: i32) -> (i32, i32, i32) {
    %c0_i32 = arith.constant 0 : i32
    %c0_i32_0 = arith.constant 0 : i32
    %c0_i32_1 = arith.constant 0 : i32
    return %arg0, %c0_i32, %c0_i32_0 : i32, i32, i32
  }
  func.func @transform_2(%arg0: i32) -> (i32, i32, i32) {
    %c0_i32 = arith.constant 0 : i32
    %c0_i32_0 = arith.constant 0 : i32
    %c0_i32_1 = arith.constant 0 : i32
    %c0_i32_2 = arith.constant 0 : i32
    return %c0_i32, %c0_i32_0, %c0_i32_1 : i32, i32, i32
  }
  func.func @transform_3(%arg0: i32) -> (i32, i32, i32) {
    %c0_i32 = arith.constant 0 : i32
    %c0_i32_0 = arith.constant 0 : i32
    %c0_i32_1 = arith.constant 0 : i32
    return %arg0, %c0_i32, %c0_i32_0 : i32, i32, i32
  }
  func.func @transform_4(%arg0: i32) -> (i32, i32, i32) {
    %c0_i32 = arith.constant 0 : i32
    %c0_i32_0 = arith.constant 0 : i32
    %c0_i32_1 = arith.constant 0 : i32
    %c0_i32_2 = arith.constant 0 : i32
    return %c0_i32, %c0_i32_0, %c0_i32_1 : i32, i32, i32
  }
  func.func @transform_5(%arg0: i32) -> (i32, i32, i32) {
    %c0_i32 = arith.constant 0 : i32
    %c0_i32_0 = arith.constant 0 : i32
    %c0_i32_1 = arith.constant 0 : i32
    %c0_i32_2 = arith.constant 0 : i32
    return %c0_i32, %c0_i32_0, %c0_i32_1 : i32, i32, i32
  }
  func.func @transform_6(%arg0: i32) -> (i32, i32, i32) {
    %c0_i32 = arith.constant 0 : i32
    %c0_i32_0 = arith.constant 0 : i32
    %c0_i32_1 = arith.constant 0 : i32
    %c0_i32_2 = arith.constant 0 : i32
    return %c0_i32, %c0_i32_0, %c0_i32_1 : i32, i32, i32
  }
  func.func @transform_7(%arg0: i32) -> (i32, i32, i32) {
    %c0_i32 = arith.constant 0 : i32
    %c0_i32_0 = arith.constant 0 : i32
    %c0_i32_1 = arith.constant 0 : i32
    %c0_i32_2 = arith.constant 0 : i32
    return %c0_i32, %c0_i32_0, %c0_i32_1 : i32, i32, i32
  }
  func.func @transform_8(%arg0: i32) -> (i32, i32, i32) {
    %c0_i32 = arith.constant 0 : i32
    %c0_i32_0 = arith.constant 0 : i32
    %c0_i32_1 = arith.constant 0 : i32
    %c0_i32_2 = arith.constant 0 : i32
    return %c0_i32, %c0_i32_0, %c0_i32_1 : i32, i32, i32
  }
  func.func @transform_9(%arg0: i32) -> (i32, i32, i32) {
    %c0_i32 = arith.constant 0 : i32
    %c0_i32_0 = arith.constant 0 : i32
    %c0_i32_1 = arith.constant 0 : i32
    %c0_i32_2 = arith.constant 0 : i32
    return %c0_i32, %c0_i32_0, %c0_i32_1 : i32, i32, i32
  }
  func.func @transform_10(%arg0: i32) -> (i32, i32, i32) {
    %c0_i32 = arith.constant 0 : i32
    %c0_i32_0 = arith.constant 0 : i32
    %c0_i32_1 = arith.constant 0 : i32
    %c0_i32_2 = arith.constant 0 : i32
    return %c0_i32, %c0_i32_0, %c0_i32_1 : i32, i32, i32
  }
  func.func @transform_11(%arg0: i32) -> (i32, i32, i32) {
    %c0_i32 = arith.constant 0 : i32
    %c0_i32_0 = arith.constant 0 : i32
    %c0_i32_1 = arith.constant 0 : i32
    %c0_i32_2 = arith.constant 0 : i32
    return %c0_i32, %c0_i32_0, %c0_i32_1 : i32, i32, i32
  }
  func.func @transform_12(%arg0: i32) -> (i32, i32, i32) {
    %c0_i32 = arith.constant 0 : i32
    %c0_i32_0 = arith.constant 0 : i32
    %c0_i32_1 = arith.constant 0 : i32
    %c0_i32_2 = arith.constant 0 : i32
    return %c0_i32, %c0_i32_0, %c0_i32_1 : i32, i32, i32
  }
  func.func @transform_13(%arg0: i32) -> (i32, i32, i32) {
    %c0_i32 = arith.constant 0 : i32
    %c0_i32_0 = arith.constant 0 : i32
    %c0_i32_1 = arith.constant 0 : i32
    %c0_i32_2 = arith.constant 0 : i32
    return %c0_i32, %c0_i32_0, %c0_i32_1 : i32, i32, i32
  }
  func.func @transform_14(%arg0: i32) -> (i32, i32, i32) {
    %c0_i32 = arith.constant 0 : i32
    %c0_i32_0 = arith.constant 0 : i32
    %c0_i32_1 = arith.constant 0 : i32
    %c0_i32_2 = arith.constant 0 : i32
    return %c0_i32, %c0_i32_0, %c0_i32_1 : i32, i32, i32
  }
  func.func @transform_15(%arg0: i32) -> (i32, i32, i32) {
    %c0_i32 = arith.constant 0 : i32
    %c0_i32_0 = arith.constant 0 : i32
    %c0_i32_1 = arith.constant 0 : i32
    %c0_i32_2 = arith.constant 0 : i32
    return %c0_i32, %c0_i32_0, %c0_i32_1 : i32, i32, i32
  }
  func.func @transform_16(%arg0: i32) -> (i32, i32, i32) {
    %c0_i32 = arith.constant 0 : i32
    %c0_i32_0 = arith.constant 0 : i32
    %c0_i32_1 = arith.constant 0 : i32
    %c0_i32_2 = arith.constant 0 : i32
    return %c0_i32, %c0_i32_0, %c0_i32_1 : i32, i32, i32
  }
  func.func @transform_17(%arg0: i32) -> (i32, i32, i32) {
    %c0_i32 = arith.constant 0 : i32
    %c0_i32_0 = arith.constant 0 : i32
    %c0_i32_1 = arith.constant 0 : i32
    %c0_i32_2 = arith.constant 0 : i32
    return %c0_i32, %c0_i32_0, %c0_i32_1 : i32, i32, i32
  }
  func.func @transform_18(%arg0: i32) -> (i32, i32, i32) {
    %c0_i32 = arith.constant 0 : i32
    %c0_i32_0 = arith.constant 0 : i32
    %c0_i32_1 = arith.constant 0 : i32
    %c0_i32_2 = arith.constant 0 : i32
    return %c0_i32, %c0_i32_0, %c0_i32_1 : i32, i32, i32
  }
  func.func @transform_19(%arg0: i32) -> (i32, i32, i32) {
    %c0_i32 = arith.constant 0 : i32
    %c0_i32_0 = arith.constant 0 : i32
    %c0_i32_1 = arith.constant 0 : i32
    %c0_i32_2 = arith.constant 0 : i32
    return %c0_i32, %c0_i32_0, %c0_i32_1 : i32, i32, i32
  }
  func.func @transform_20(%arg0: i32) -> (i32, i32, i32) {
    %c0_i32 = arith.constant 0 : i32
    %c0_i32_0 = arith.constant 0 : i32
    %c0_i32_1 = arith.constant 0 : i32
    %c0_i32_2 = arith.constant 0 : i32
    return %c0_i32, %c0_i32_0, %c0_i32_1 : i32, i32, i32
  }
  func.func @transform_21(%arg0: i32) -> (i32, i32, i32) {
    %c0_i32 = arith.constant 0 : i32
    %c0_i32_0 = arith.constant 0 : i32
    %c0_i32_1 = arith.constant 0 : i32
    %c0_i32_2 = arith.constant 0 : i32
    return %c0_i32, %c0_i32_0, %c0_i32_1 : i32, i32, i32
  }
  func.func @transform_22(%arg0: i32) -> (i32, i32, i32) {
    %c0_i32 = arith.constant 0 : i32
    %c0_i32_0 = arith.constant 0 : i32
    %c0_i32_1 = arith.constant 0 : i32
    %c0_i32_2 = arith.constant 0 : i32
    return %c0_i32, %c0_i32_0, %c0_i32_1 : i32, i32, i32
  }
  func.func @transform_23(%arg0: i32) -> (i32, i32, i32) {
    %c0_i32 = arith.constant 0 : i32
    %c0_i32_0 = arith.constant 0 : i32
    %c0_i32_1 = arith.constant 0 : i32
    %c0_i32_2 = arith.constant 0 : i32
    return %c0_i32, %c0_i32_0, %c0_i32_1 : i32, i32, i32
  }
  func.func @transform_24(%arg0: i32) -> (i32, i32) {
    %c0_i32 = arith.constant 0 : i32
    %c0_i32_0 = arith.constant 0 : i32
    %c0_i32_1 = arith.constant 0 : i32
    return %c0_i32, %c0_i32_0 : i32, i32
  }
  func.func @transform_25(%arg0: i32) -> (i32, i32) {
    %c0_i32 = arith.constant 0 : i32
    %c0_i32_0 = arith.constant 0 : i32
    %c0_i32_1 = arith.constant 0 : i32
    return %c0_i32, %c0_i32_0 : i32, i32
  }
  func.func @transform_26(%arg0: i32) -> (i32, i32, i32) {
    %c0_i32 = arith.constant 0 : i32
    %c0_i32_0 = arith.constant 0 : i32
    %c0_i32_1 = arith.constant 0 : i32
    return %arg0, %c0_i32, %c0_i32_0 : i32, i32, i32
  }
}

</mosaic_0001>

<bundles_post_ra>
// kernel: decoder_forward.1
= control target key start
LH: loop header
LB: loop body
LE: loop exit
PB: predicated region body
PF: predicated region fallthrough
CT: control target
= control target key end

     0   :  { %s7123_s0 = inlined_call_operand.vmem [shape: f32[2,8,32], index: 0, kind: input, shape index: {}]   ;;  %s7124_s1 = inlined_call_operand.hbm [shape: f32[2,8,32], index: 1, kind: input, shape index: {}]   ;;  %s7125_s2 = inlined_call_operand.vmem [shape: f32[1,8,8], index: 2, kind: input, shape index: {}]   ;;  %s7126_s3 = inlined_call_operand.vmem [shape: f32[2,1,8], index: 3, kind: input, shape index: {}]   ;;  %s7127_s4 = inlined_call_operand.hbm [shape: f32[2,1,32], index: 4, kind: input, shape index: {}]   ;;  %s7128_s5 = inlined_call_operand.hbm [shape: f32[2,1,32], index: 5, kind: input, shape index: {}]   ;;  %s7129_s6 = inlined_call_operand.vmem [shape: bf16[2,32,96], index: 6, kind: input, shape index: {}]   ;;  %s7130_s7 = inlined_call_operand.hbm [shape: f32[2,1,96], index: 7, kind: input, shape index: {}]   ;;  %s7131_s8 = inlined_call_operand.vmem [shape: bf16[2,32,32], index: 8, kind: input, shape index: {}]   ;;  %s7132_s9 = inlined_call_operand.hbm [shape: f32[2,1,32], index: 9, kind: input, shape index: {}]   ;;  %s7133_s10 = inlined_call_operand.hbm [shape: f32[2,1,32], index: 10, kind: input, shape index: {}]   ;;  %s7134_s11 = inlined_call_operand.hbm [shape: f32[2,1,32], index: 11, kind: input, shape index: {}]   ;;  %s7135_s12 = inlined_call_operand.vmem [shape: bf16[2,32,32], index: 12, kind: input, shape index: {}]   ;;  %s7136_s13 = inlined_call_operand.hbm [shape: f32[2,1,32], index: 13, kind: input, shape index: {}]   ;;  %s7137_s14 = inlined_call_operand.hbm [shape: bf16[2,32,64], index: 14, kind: input, shape index: {}]   ;;  %s7138_s15 = inlined_call_operand.hbm [shape: f32[2,1,64], index: 15, kind: input, shape index: {}]   ;;  %s7139_s16 = inlined_call_operand.hbm [shape: bf16[2,32,32], index: 16, kind: input, shape index: {}]   ;;  %s7140_s17 = inlined_call_operand.hbm [shape: f32[2,1,32], index: 17, kind: input, shape index: {}]   ;;  %s7141_s18 = inlined_call_operand.hbm [shape: f32[2,1,32], index: 18, kind: input, shape index: {}]   ;;  %s7142_s19 = inlined_call_operand.hbm [shape: f32[2,1,32], index: 19, kind: input, shape index: {}]   ;;  %s7143_s20 = inlined_call_operand.hbm [shape: bf16[2,32,64], index: 20, kind: input, shape index: {}]   ;;  %s7144_s21 = inlined_call_operand.hbm [shape: f32[2,1,64], index: 21, kind: input, shape index: {}]   ;;  %s7145_s22 = inlined_call_operand.vmem [shape: bf16[2,64,32], index: 22, kind: input, shape index: {}]   ;;  %s7146_s23 = inlined_call_operand.hbm [shape: f32[2,1,32], index: 23, kind: input, shape index: {}]   ;;  %s7147_s24 = inlined_call_operand.hbm [shape: f32[1,32], index: 24, kind: input, shape index: {}]   ;;  %s7148_s25 = inlined_call_operand.hbm [shape: f32[1,32], index: 25, kind: input, shape index: {}]   ;;  %s7149_s26 = inlined_call_operand.hbm [shape: f32[2,8,32], index: 26, kind: output, shape index: {}]  }
   0x1   :  { %7192 = sst [smem:[#allocation45_spill]] %s7123_s0 }
   0x2   :  { %7193 = sst [smem:[#allocation46_spill]] %s7124_s1 }
   0x3   :  { %7194 = sst [smem:[#allocation47_spill]] %s7125_s2 }
   0x4   :  { %7195 = sst [smem:[#allocation48_spill]] %s7126_s3 }
   0x5   :  { %7196 = sst [smem:[#allocation49_spill]] %s7127_s4 }
   0x6   :  { %7197 = sst [smem:[#allocation50_spill]] %s7128_s5 }
   0x7   :  { %7198 = sst [smem:[#allocation51_spill]] %s7129_s6 }
   0x8   :  { %7199 = sst [smem:[#allocation52_spill]] %s7130_s7 }
   0x9   :  { %7200 = sst [smem:[#allocation53_spill]] %s7131_s8 }
   0xa   :  { %7201 = sst [smem:[#allocation54_spill]] %s7132_s9 }
   0xb   :  { %7202 = sst [smem:[#allocation55_spill]] %s7133_s10 }
   0xc   :  { %7203 = sst [smem:[#allocation56_spill]] %s7134_s11 }
   0xd   :  { %7204 = sst [smem:[#allocation57_spill]] %s7135_s12 }
   0xe   :  { %7205 = sst [smem:[#allocation58_spill]] %s7136_s13 }
   0xf   :  { %7206 = sst [smem:[#allocation59_spill]] %s7137_s14 }
  0x10   :  { %7207 = sst [smem:[#allocation60_spill]] %s7138_s15 }
  0x11   :  { %7208 = sst [smem:[#allocation61_spill]] %s7139_s16 }
  0x12   :  { %7209 = sst [smem:[#allocation62_spill]] %s7140_s17 }
  0x13   :  { %7210 = sst [smem:[#allocation63_spill]] %s7141_s18 }
  0x14   :  { %7211 = sst [smem:[#allocation64_spill]] %s7142_s19 }
  0x15   :  { %7212 = sst [smem:[#allocation65_spill]] %s7143_s20 }
  0x16   :  { %7213 = sst [smem:[#allocation66_spill]] %s7144_s21 }
  0x17   :  { %7214 = sst [smem:[#allocation67_spill]] %s7145_s22 }
  0x18   :  { %7215 = sst [smem:[#allocation68_spill]] %s7146_s23 }
  0x19   :  { %7216 = sst [smem:[#allocation69_spill]] %s7149_s26 }
  0x1a   :  { %31 = vsyncpa [#allocation3], 0 }
  0x1b   :  { %33 = vsyncpa [#allocation3 + $0x1], 0 }
  0x1c   :  { %34 = vsyncpa [#allocation6], 0 }
  0x1d   :  { %35 = vsyncpa [#allocation9], 0 }
  0x1e   :  { %36 = vsyncpa [#allocation12], 0 }
  0x1f   :  { %37 = vsyncpa [#allocation15], 0 }
  0x20   :  { %38 = vsyncpa [#allocation18], 0 }
  0x21   :  { %39 = vsyncpa [#allocation21], 0 }
  0x22   :  { %40 = vsyncpa [#allocation24], 0 }
  0x23   :  { %41 = vsyncpa [#allocation27], 0 }
  0x24   :  { %42 = vsyncpa [#allocation30], 0 }
  0x25   :  { %43 = vsyncpa [#allocation4], 0 }
  0x26   :  { %45 = vsyncpa [#allocation4 + $0x1], 0  ;;  %s6239_s27 = smov 0   ;;  %s6241_s3 = smov 0  }
  0x27   :  { %s6243_s7 = smov 0   ;;  %s6245_s28 = smov 0  }
  0x28 LB: > { %s6064_s8 = smov [#allocation5]   ;;  %s6260_s29 = sadd.s32 4294967295, %s6062_s28   ;;  %s6062_s28 = sphi %s6245_s28, %s7295_s28   ;;  %s6058_s7 = sphi %s6243_s7, %s7294_s7   ;;  %s6054_s3 = sphi %s6241_s3, %s7293_s3   ;;  %s6050_s27 = sphi %s6239_s27, %s7292_s27  }
  0x29   : > { %s658_s4 = sshll.u32 %s6064_s8, 4  ;;  %p4490_p0 = scmp.ge.s32.totalorder %s6062_s28, 1  ;;  %s659_s4 = int_to_ptr.vmem [resolvable:$true] %s658_s4 }
  0x2a   : > { %p7161_p1 = scmp.eq.s32.totalorder %s6260_s29, 0  ;;  %p643_p2 = scmp.lt.s32.totalorder %s6062_s28, 3 }
  0x2b   : > { %s6065_s9 = smov [#allocation8]   ;;  %s6066_s5 = smov [#allocation11]  }
  0x2c   : > { %p6265_p3 = pnand %p4490_p0, %p643_p2  ;;  %s687_s30 = sshll.u32 %s6065_s9, 4  ;;  %s6278_s30 = int_to_ptr.vmem [resolvable:$true] %s687_s30 }
  0x2d   : > { %s716_s10 = sshll.u32 %s6066_s5, 4  ;;  %s5477_s1 = scalar_lea.vmem %s659_s4, 32  ;;  %s6280_s10 = int_to_ptr.vmem [resolvable:$true] %s716_s10 }
  0x2e   : > { %s7217_s0 = scalar_select %p6265_p3, 1, 0 }
  0x2f   : > { %p5163_p5 = pneg %p6265_p3  ;;  %p5478_p8 = scmp.ne.s32.totalorder %s659_s4, %s5477_s1 }
  0x30   : > { %7218 = sst [smem:[#allocation44_spill]] %s7217_s0  ;;  %p5485_p11 = scmp.lt.s32.totalorder %s659_s4, %s659_s4 }
  0x31   : > { %p6274_p6 = pnand %p5163_p5, %p7161_p1  ;;  %p5486_p12 = scmp.lt.s32.totalorder %s5477_s1, %s5477_s1 }
  0x33   : > { %p6284_p7 = pneg %p6274_p6  ;;  %p5487_p13 = por %p5486_p12, %p5485_p11 }
  0x35   : > { %p5480_p9 = pnand %p5478_p8, %p6284_p7 }
  0x37   : > { %p5481_p10 = pneg %p5480_p9 }
  0x39   : > { %p5488_p0 = pnand %p5487_p13, %p5481_p10 }
  0x3b   : > { %5491 = shalt.err (!%p5488_p0)
}
  0x3c   : > { %s7158_s8 = smov 16   ;;  %s6068_s9 = smov 1  }
  0x3d   : > { %s7221_s22 = sld [smem:[#allocation49_spill]]  ;;  %s5503_s12 = scalar_lea.vmem %s6278_s30, 32 }
  0x3e   : > { %p5504_p2 = scmp.ne.s32.totalorder %s6278_s30, %s5503_s12  ;;  %p5511_p9 = scmp.lt.s32.totalorder %s6278_s30, %s6278_s30 }
  0x3f   : > { %p5512_p10 = scmp.lt.s32.totalorder %s5503_s12, %s5503_s12 }
  0x40   : > { %p5506_p5 = pnand %p5504_p2, %p6284_p7 }
  0x41   : > { %p5513_p11 = por %p5512_p10, %p5511_p9 }
  0x42   : > { %p5507_p8 = pneg %p5506_p5 }
  0x43   : > { %5166 = dma.hbm_to_vmem [thread:$0]  (!%p6274_p6), %s7221_s22, 32, %s659_s4, [#allocation6], %s7158_s8, %s7158_s8, %s6068_s9  }
  0x44   : > { %p5514_p12 = pnand %p5513_p11, %p5507_p8 }
  0x46   : > { %5517 = shalt.err (!%p5514_p12)
}
  0x47   : > { %s7222_s22 = sld [smem:[#allocation52_spill]]  ;;  %s5529_s4 = scalar_lea.vmem %s6280_s10, 32 }
  0x48   : > { %p5530_p13 = scmp.ne.s32.totalorder %s6280_s10, %s5529_s4  ;;  %p5537_p5 = scmp.lt.s32.totalorder %s6280_s10, %s6280_s10 }
  0x49   : > { %p5538_p8 = scmp.lt.s32.totalorder %s5529_s4, %s5529_s4 }
  0x4a   : > { %p5532_p0 = pnand %p5530_p13, %p6284_p7 }
  0x4b   : > { %p5539_p9 = por %p5538_p8, %p5537_p5 }
  0x4c   : > { %p5533_p2 = pneg %p5532_p0 }
  0x4d   : > { %5172 = dma.hbm_to_vmem [thread:$0]  (!%p6274_p6), %s7222_s22, 32, %s6278_s30, [#allocation9], %s7158_s8, %s7158_s8, %s6068_s9  }
  0x4e   : > { %p5540_p10 = pnand %p5539_p9, %p5533_p2 }
  0x50   : > { %5543 = shalt.err (!%p5540_p10)
}
  0x51   : > { %s7223_s30 = sld [smem:[#allocation55_spill]]  ;;  %s6069_s1 = smov [#allocation14]  }
  0x52   : > { %s745_s26 = sshll.u32 %s6069_s1, 4  ;;  %s6070_s22 = smov [#allocation17]   ;;  %s746_s26 = int_to_ptr.vmem [resolvable:$true] %s745_s26 }
  0x53   : > { %s771_s0 = sshll.u32 %s6070_s22, 4  ;;  %s5555_s4 = scalar_lea.vmem %s746_s26, 32  ;;  %s772_s0 = int_to_ptr.vmem [resolvable:$true] %s771_s0 }
  0x54   : > { %p5556_p11 = scmp.ne.s32.totalorder %s746_s26, %s5555_s4  ;;  %p5563_p0 = scmp.lt.s32.totalorder %s746_s26, %s746_s26 }
  0x55   : > { %p5564_p2 = scmp.lt.s32.totalorder %s5555_s4, %s5555_s4 }
  0x56   : > { %p5558_p12 = pnand %p5556_p11, %p6284_p7 }
  0x57   : > { %5178 = dma.hbm_to_vmem [thread:$0]  (!%p6274_p6), %s7223_s30, 32, %s6280_s10, [#allocation12], %s7158_s8, %s7158_s8, %s6068_s9  }
  0x58   : > { %p5559_p13 = pneg %p5558_p12  ;;  %p5565_p5 = por %p5564_p2, %p5563_p0 }
  0x5a   : > { %p5566_p8 = pnand %p5565_p5, %p5559_p13 }
  0x5c   : > { %5569 = shalt.err (!%p5566_p8)
}
  0x5d   : > { %s7224_s13 = sld [smem:[#allocation58_spill]]  ;;  %s5581_s5 = scalar_lea.vmem %s772_s0, 32 }
  0x5e   : > { %p5582_p9 = scmp.ne.s32.totalorder %s772_s0, %s5581_s5  ;;  %p5589_p12 = scmp.lt.s32.totalorder %s772_s0, %s772_s0 }
  0x5f   : > { %p5590_p0 = scmp.lt.s32.totalorder %s5581_s5, %s5581_s5 }
  0x60   : > { %p5584_p10 = pnand %p5582_p9, %p6284_p7 }
  0x61   : > { %p5591_p13 = por %p5590_p0, %p5589_p12 }
  0x62   : > { %p5585_p11 = pneg %p5584_p10 }
  0x63   : > { %5184 = dma.hbm_to_vmem [thread:$0]  (!%p6274_p6), %s7224_s13, 32, %s746_s26, [#allocation15], %s7158_s8, %s7158_s8, %s6068_s9  }
  0x64   : > { %p5592_p2 = pnand %p5591_p13, %p5585_p11 }
  0x66   : > { %5595 = shalt.err (!%p5592_p2)
}
  0x67   : > { %s7225_s15 = sld [smem:[#allocation60_spill]]  ;;  %s6071_s26 = smov [#allocation20]  }
  0x68   : > { %s797_s22 = sshll.u32 %s6071_s26, 4  ;;  %s6072_s4 = smov [#allocation23]   ;;  %s798_s22 = int_to_ptr.vmem [resolvable:$true] %s797_s22 }
  0x69   : > { %s823_s10 = sshll.u32 %s6072_s4, 4  ;;  %s5607_s12 = scalar_lea.vmem %s798_s22, 32  ;;  %s824_s10 = int_to_ptr.vmem [resolvable:$true] %s823_s10 }
  0x6a   : > { %p5608_p5 = scmp.ne.s32.totalorder %s798_s22, %s5607_s12  ;;  %p5615_p10 = scmp.lt.s32.totalorder %s798_s22, %s798_s22 }
  0x6b   : > { %p5616_p11 = scmp.lt.s32.totalorder %s5607_s12, %s5607_s12 }
  0x6c   : > { %p5610_p8 = pnand %p5608_p5, %p6284_p7 }
  0x6d   : > { %5190 = dma.hbm_to_vmem [thread:$0]  (!%p6274_p6), %s7225_s15, 32, %s772_s0, [#allocation18], %s7158_s8, %s7158_s8, %s6068_s9  }
  0x6e   : > { %p5611_p9 = pneg %p5610_p8  ;;  %p5617_p12 = por %p5616_p11, %p5615_p10 }
  0x70   : > { %p5618_p0 = pnand %p5617_p12, %p5611_p9 }
  0x72   : > { %5621 = shalt.err (!%p5618_p0)
}
  0x73   : > { %s7226_s17 = sld [smem:[#allocation62_spill]]  ;;  %s5633_s30 = scalar_lea.vmem %s824_s10, 32 }
  0x74   : > { %p5634_p13 = scmp.ne.s32.totalorder %s824_s10, %s5633_s30  ;;  %p5641_p8 = scmp.lt.s32.totalorder %s824_s10, %s824_s10 }
  0x75   : > { %p5642_p10 = scmp.lt.s32.totalorder %s5633_s30, %s5633_s30 }
  0x76   : > { %p5636_p2 = pnand %p5634_p13, %p6284_p7 }
  0x77   : > { %p5643_p9 = por %p5642_p10, %p5641_p8 }
  0x78   : > { %p5637_p5 = pneg %p5636_p2 }
  0x79   : > { %5196 = dma.hbm_to_vmem [thread:$0]  (!%p6274_p6), %s7226_s17, 32, %s798_s22, [#allocation21], %s7158_s8, %s7158_s8, %s6068_s9  }
  0x7a   : > { %p5644_p11 = pnand %p5643_p9, %p5637_p5 }
  0x7c   : > { %5647 = shalt.err (!%p5644_p11)
}
  0x7d   : > { %s7227_s19 = sld [smem:[#allocation64_spill]]  ;;  %s6073_s22 = smov [#allocation26]  }
  0x7e   : > { %s849_s4 = sshll.u32 %s6073_s22, 4  ;;  %s6074_s12 = smov [#allocation29]   ;;  %s850_s4 = int_to_ptr.vmem [resolvable:$true] %s849_s4 }
  0x7f   : > { %s879_s0 = sshll.u32 %s6074_s12, 4  ;;  %s5659_s5 = scalar_lea.vmem %s850_s4, 32  ;;  %s880_s0 = int_to_ptr.vmem [resolvable:$true] %s879_s0 }
  0x80   : > { %p5660_p12 = scmp.ne.s32.totalorder %s850_s4, %s5659_s5  ;;  %p5667_p2 = scmp.lt.s32.totalorder %s850_s4, %s850_s4 }
  0x81   : > { %p5668_p5 = scmp.lt.s32.totalorder %s5659_s5, %s5659_s5 }
  0x82   : > { %p5662_p0 = pnand %p5660_p12, %p6284_p7 }
  0x83   : > { %5202 = dma.hbm_to_vmem [thread:$0]  (!%p6274_p6), %s7227_s19, 32, %s824_s10, [#allocation24], %s7158_s8, %s7158_s8, %s6068_s9  }
  0x84   : > { %p5663_p13 = pneg %p5662_p0  ;;  %p5669_p8 = por %p5668_p5, %p5667_p2 }
  0x86   : > { %p5670_p10 = pnand %p5669_p8, %p5663_p13 }
  0x88   : > { %5673 = shalt.err (!%p5670_p10)
}
  0x89   : > { %s7228_s21 = sld [smem:[#allocation66_spill]]  ;;  %s5685_s1 = scalar_lea.vmem %s880_s0, 16 }
  0x8a   : > { %p5686_p9 = scmp.ne.s32.totalorder %s880_s0, %s5685_s1  ;;  %s5692_s26 = scalar_lea.vmem %s880_s0, 32 }
  0x8b   : > { %p5693_p0 = scmp.lt.s32.totalorder %s880_s0, %s880_s0  ;;  %p5694_p13 = scmp.lt.s32.totalorder %s5692_s26, %s5685_s1 }
  0x8c   : > { %p5688_p11 = pnand %p5686_p9, %p6284_p7 }
  0x8d   : > { %p5695_p2 = por %p5694_p13, %p5693_p0 }
  0x8e   : > { %p5689_p12 = pneg %p5688_p11 }
  0x8f   : > { %5208 = dma.hbm_to_vmem [thread:$0]  (!%p6274_p6), %s7228_s21, 32, %s850_s4, [#allocation27], %s7158_s8, %s7158_s8, %s6068_s9  }
  0x90   : > { %p5696_p5 = pnand %p5695_p2, %p5689_p12 }
  0x92   : > { %5699 = shalt.err (!%p5696_p5)
}
  0x93   : > { %5214 = dma.hbm_to_vmem [thread:$0]  (!%p6274_p6), %s7147_s24, 16, %s880_s0, [#allocation30]  }
  0x94   : > { %s6075_s4 = smov [#allocation7]   ;;  %s6076_s10 = smov [#allocation10]  }
  0x95   : > { %s671_s5 = sshll.u32 %s6075_s4, 4  ;;  %s703_s30 = sshll.u32 %s6076_s10, 4  ;;  %s672_s5 = int_to_ptr.vmem [resolvable:$true] %s671_s5  ;;  %s704_s30 = int_to_ptr.vmem [resolvable:$true] %s703_s30 }
  0x96   : > { %s5711_s8 = scalar_lea.vmem %s672_s5, 32  ;;  %p5719_p11 = scmp.lt.s32.totalorder %s672_s5, %s672_s5 }
  0x97   : > { %p5712_p8 = scmp.ne.s32.totalorder %s672_s5, %s5711_s8  ;;  %p5720_p12 = scmp.lt.s32.totalorder %s5711_s8, %s5711_s8 }
  0x99   : > { %p5714_p10 = pnand %p5712_p8, %p6284_p7  ;;  %p5721_p0 = por %p5720_p12, %p5719_p11 }
  0x9b   : > { %p5715_p9 = pneg %p5714_p10 }
  0x9d   : > { %p5722_p13 = pnand %p5721_p0, %p5715_p9 }
  0x9f   : > { %5725 = shalt.err (!%p5722_p13)
}
  0xa0   : > { %s7229_s1 = smov 16   ;;  %s7230_s22 = sld [smem:[#allocation50_spill]] }
  0xa1   : > { %s5737_s12 = scalar_lea.vmem %s704_s30, 32  ;;  %p5745_p10 = scmp.lt.s32.totalorder %s704_s30, %s704_s30 }
  0xa2   : > { %p5738_p2 = scmp.ne.s32.totalorder %s704_s30, %s5737_s12  ;;  %p5746_p11 = scmp.lt.s32.totalorder %s5737_s12, %s5737_s12 }
  0xa4   : > { %p5740_p5 = pnand %p5738_p2, %p6284_p7  ;;  %p5747_p9 = por %p5746_p11, %p5745_p10 }
  0xa6   : > { %5169 = dma.hbm_to_vmem [thread:$0]  (!%p6274_p6), %s7230_s22, 32, %s672_s5, [#allocation6], %s7229_s1, %s7229_s1, %s6068_s9  }
  0xa7   : > { %p5741_p8 = pneg %p5740_p5 }
  0xa9   : > { %p5748_p12 = pnand %p5747_p9, %p5741_p8 }
  0xab   : > { %5751 = shalt.err (!%p5748_p12)
}
  0xac   : > { %s7231_s10 = sld [smem:[#allocation54_spill]]  ;;  %s6077_s5 = smov [#allocation13]  }
  0xad   : > { %s729_s0 = sshll.u32 %s6077_s5, 4  ;;  %s6078_s26 = smov [#allocation16]   ;;  %s730_s0 = int_to_ptr.vmem [resolvable:$true] %s729_s0 }
  0xae   : > { %s758_s22 = sshll.u32 %s6078_s26, 4  ;;  %s5763_s13 = scalar_lea.vmem %s730_s0, 32  ;;  %s759_s22 = int_to_ptr.vmem [resolvable:$true] %s758_s22 }
  0xaf   : > { %p5764_p0 = scmp.ne.s32.totalorder %s730_s0, %s5763_s13  ;;  %p5771_p5 = scmp.lt.s32.totalorder %s730_s0, %s730_s0 }
  0xb0   : > { %p5772_p8 = scmp.lt.s32.totalorder %s5763_s13, %s5763_s13 }
  0xb1   : > { %p5766_p13 = pnand %p5764_p0, %p6284_p7 }
  0xb2   : > { %5175 = dma.hbm_to_vmem [thread:$0]  (!%p6274_p6), %s7231_s10, 32, %s704_s30, [#allocation9], %s7229_s1, %s7229_s1, %s6068_s9  }
  0xb3   : > { %p5767_p2 = pneg %p5766_p13  ;;  %p5773_p10 = por %p5772_p8, %p5771_p5 }
  0xb5   : > { %p5774_p11 = pnand %p5773_p10, %p5767_p2 }
  0xb7   : > { %5777 = shalt.err (!%p5774_p11)
}
  0xb8   : > { %s7232_s11 = sld [smem:[#allocation56_spill]]  ;;  %s5789_s8 = scalar_lea.vmem %s759_s22, 512 }
  0xb9   : > { %p5790_p9 = scmp.ne.s32.totalorder %s759_s22, %s5789_s8  ;;  %p5797_p13 = scmp.lt.s32.totalorder %s759_s22, %s759_s22 }
  0xba   : > { %p5798_p5 = scmp.lt.s32.totalorder %s5789_s8, %s5789_s8 }
  0xbb   : > { %p5792_p12 = pnand %p5790_p9, %p6284_p7 }
  0xbc   : > { %p5799_p2 = por %p5798_p5, %p5797_p13 }
  0xbd   : > { %p5793_p0 = pneg %p5792_p12 }
  0xbe   : > { %5181 = dma.hbm_to_vmem [thread:$0]  (!%p6274_p6), %s7232_s11, 32, %s730_s0, [#allocation12], %s7229_s1, %s7229_s1, %s6068_s9  }
  0xbf   : > { %p5800_p8 = pnand %p5799_p2, %p5793_p0 }
  0xc1   : > { %5803 = shalt.err (!%p5800_p8)
}
  0xc2   : > { %s7160_s13 = smov 64   ;;  %s6080_s4 = smov 4  }
  0xc3   : > { %s7233_s14 = sld [smem:[#allocation59_spill]]  ;;  %s6081_s0 = smov [#allocation19]  }
  0xc4   : > { %s784_s26 = sshll.u32 %s6081_s0, 4  ;;  %s6082_s30 = smov [#allocation22]   ;;  %s785_s26 = int_to_ptr.vmem [resolvable:$true] %s784_s26 }
  0xc5   : > { %s810_s12 = sshll.u32 %s6082_s30, 4  ;;  %s5815_s8 = scalar_lea.vmem %s785_s26, 512  ;;  %s811_s12 = int_to_ptr.vmem [resolvable:$true] %s810_s12 }
  0xc6   : > { %p5816_p10 = scmp.ne.s32.totalorder %s785_s26, %s5815_s8  ;;  %p5823_p12 = scmp.lt.s32.totalorder %s785_s26, %s785_s26 }
  0xc7   : > { %p5824_p0 = scmp.lt.s32.totalorder %s5815_s8, %s5815_s8 }
  0xc8   : > { %p5818_p11 = pnand %p5816_p10, %p6284_p7 }
  0xc9   : > { %5187 = dma.hbm_to_vmem [thread:$0]  (!%p6274_p6), %s7233_s14, 512, %s759_s22, [#allocation15], %s7160_s13, %s7160_s13, %s6080_s4  }
  0xca   : > { %p5819_p9 = pneg %p5818_p11  ;;  %p5825_p13 = por %p5824_p0, %p5823_p12 }
  0xcc   : > { %p5826_p5 = pnand %p5825_p13, %p5819_p9 }
  0xce   : > { %5829 = shalt.err (!%p5826_p5)
}
  0xcf   : > { %s7234_s16 = sld [smem:[#allocation61_spill]]  ;;  %s5841_s5 = scalar_lea.vmem %s811_s12, 32 }
  0xd0   : > { %p5842_p2 = scmp.ne.s32.totalorder %s811_s12, %s5841_s5  ;;  %p5849_p11 = scmp.lt.s32.totalorder %s811_s12, %s811_s12 }
  0xd1   : > { %p5850_p12 = scmp.lt.s32.totalorder %s5841_s5, %s5841_s5 }
  0xd2   : > { %p5844_p8 = pnand %p5842_p2, %p6284_p7 }
  0xd3   : > { %p5851_p9 = por %p5850_p12, %p5849_p11 }
  0xd4   : > { %p5845_p10 = pneg %p5844_p8 }
  0xd5   : > { %5193 = dma.hbm_to_vmem [thread:$0]  (!%p6274_p6), %s7234_s16, 512, %s785_s26, [#allocation18], %s7160_s13, %s7160_s13, %s6080_s4  }
  0xd6   : > { %p5852_p0 = pnand %p5851_p9, %p5845_p10 }
  0xd8   : > { %5855 = shalt.err (!%p5852_p0)
}
  0xd9   : > { %s7235_s18 = sld [smem:[#allocation63_spill]]  ;;  %s6083_s26 = smov [#allocation25]  }
  0xda   : > { %s836_s8 = sshll.u32 %s6083_s26, 4  ;;  %s6084_s22 = smov [#allocation28]   ;;  %s837_s8 = int_to_ptr.vmem [resolvable:$true] %s836_s8 }
  0xdb   : > { %s865_s10 = sshll.u32 %s6084_s22, 4  ;;  %s5867_s13 = scalar_lea.vmem %s837_s8, 512  ;;  %s866_s10 = int_to_ptr.vmem [resolvable:$true] %s865_s10 }
  0xdc   : > { %p5868_p13 = scmp.ne.s32.totalorder %s837_s8, %s5867_s13  ;;  %p5875_p8 = scmp.lt.s32.totalorder %s837_s8, %s837_s8 }
  0xdd   : > { %p5876_p10 = scmp.lt.s32.totalorder %s5867_s13, %s5867_s13 }
  0xde   : > { %p5870_p5 = pnand %p5868_p13, %p6284_p7 }
  0xdf   : > { %5199 = dma.hbm_to_vmem [thread:$0]  (!%p6274_p6), %s7235_s18, 32, %s811_s12, [#allocation21], %s7229_s1, %s7229_s1, %s6068_s9  }
  0xe0   : > { %p5871_p2 = pneg %p5870_p5  ;;  %p5877_p11 = por %p5876_p10, %p5875_p8 }
  0xe2   : > { %p5878_p12 = pnand %p5877_p11, %p5871_p2 }
  0xe4   : > { %5881 = shalt.err (!%p5878_p12)
}
  0xe5   : > { %s7236_s5 = smov 64   ;;  %s7237_s20 = sld [smem:[#allocation65_spill]] }
  0xe6   : > { %s5893_s30 = scalar_lea.vmem %s866_s10, 32  ;;  %p5901_p5 = scmp.lt.s32.totalorder %s866_s10, %s866_s10 }
  0xe7   : > { %p5894_p9 = scmp.ne.s32.totalorder %s866_s10, %s5893_s30  ;;  %p5902_p8 = scmp.lt.s32.totalorder %s5893_s30, %s5893_s30 }
  0xe9   : > { %p5896_p0 = pnand %p5894_p9, %p6284_p7  ;;  %p5903_p2 = por %p5902_p8, %p5901_p5 }
  0xeb   : > { %5205 = dma.hbm_to_vmem [thread:$0]  (!%p6274_p6), %s7237_s20, 512, %s837_s8, [#allocation24], %s7236_s5, %s7236_s5, %s6080_s4  }
  0xec   : > { %p5897_p13 = pneg %p5896_p0 }
  0xee   : > { %p5904_p10 = pnand %p5903_p2, %p5897_p13 }
  0xf0   : > { %5907 = shalt.err (!%p5904_p10)
}
  0xf1   : > { %s7238_s23 = sld [smem:[#allocation68_spill]]  ;;  %s6085_s4 = smov [#allocation31]  }
  0xf2   : > { %s890_s8 = sshll.u32 %s6085_s4, 4  ;;  %s891_s8 = int_to_ptr.vmem [resolvable:$true] %s890_s8 }
  0xf3   : > { %s5919_s22 = scalar_lea.vmem %s891_s8, 16  ;;  %s5926_s5 = scalar_lea.vmem %s891_s8, 32 }
  0xf4   : > { %p5920_p11 = scmp.ne.s32.totalorder %s891_s8, %s5919_s22  ;;  %p5927_p0 = scmp.lt.s32.totalorder %s891_s8, %s891_s8 }
  0xf5   : > { %p5928_p13 = scmp.lt.s32.totalorder %s5926_s5, %s5919_s22 }
  0xf6   : > { %p5922_p12 = pnand %p5920_p11, %p6284_p7 }
  0xf7   : > { %5211 = dma.hbm_to_vmem [thread:$0]  (!%p6274_p6), %s7238_s23, 32, %s866_s10, [#allocation27], %s7229_s1, %s7229_s1, %s6068_s9  }
  0xf8   : > { %p5923_p9 = pneg %p5922_p12  ;;  %p5929_p5 = por %p5928_p13, %p5927_p0 }
  0xfa   : > { %p5930_p8 = pnand %p5929_p5, %p5923_p9 }
  0xfc   : > { %5933 = shalt.err (!%p5930_p8)
}
  0xfd   : > { %5217 = dma.hbm_to_vmem [thread:$0]  (!%p6274_p6), %s7148_s25, 16, %s891_s8, [#allocation30]  }
  0xfe   : > { %s4489_s6 = sadd.s32 4294967294, %s6062_s28   ;;  %s6474_s2 = sadd.s32 1, %s6062_s28  }
  0xff   : > { %s81_s9 = ssub.s32 %s6062_s28, %s6474_s2  ;;  %s84_s1 = sadd.s32 1, %s6058_s7 }
 0x100   : > { %p82_p7 = scmp.eq.s32.totalorder %s81_s9, 0  ;;  %p91_p2 = scmp.ne.s32.totalorder %s6058_s7, %s6054_s3 }
 0x101   : > { %p92_p10 = scmp.eq.s32.totalorder %s6062_s28, 0  ;;  %p97_p11 = scmp.ne.s32.totalorder %s6054_s3, %s6050_s27 }
 0x102   : > { %s6485_s10 = scalar_select %p82_p7, %s6058_s7, %s84_s1  }
 0x103   : > { %p6487_p12 = por %p92_p10, %p91_p2  ;;  %p6493_p6 = por %p7161_p1, %p97_p11 }
 0x104   : > { %p630_p9 = scmp.eq.s32.totalorder %s6260_s29, 1  ;;  %p636_p0 = scmp.eq.s32.totalorder %s4489_s6, 1 }
 0x105   : > { %s7240_s13 = scalar_select %p6493_p6, 1, 0 }
 0x106   : > { %p5244_p13 = scmp.lt.s32.totalorder %s6062_s28, 2  ;;  %s908_s26 = sand.u32 1, %s6058_s7  }
 0x107   : > { %p6500_p5 = por %p630_p9, %p91_p2  ;;  %p6504_p8 = por %p636_p0, %p97_p11 }
 0x108   : > { %s4510_s22 = sshll.u32 %s908_s26, 3  ;;  %s4511_s5 = sshll.u32 %s6062_s28, 7 }
 0x109   : > { %s7241_s4 = scalar_select %p6500_p5, 1, 0 }
 0x10a   : > { %s7242_s8 = scalar_select %p6504_p8, 1, 0 }
 0x10b   : > { %s7243_s9 = sld [smem:[#allocation46_spill]]  ;;  %s912_s6 = scalar_lea.vmem [#allocation2], %s4510_s22 }
 0x10c   : > { %s919_s11 = sshll.u32 %s912_s6, 4  ;;  %p6516_p7 = pnand %p5244_p13, %p6487_p12  ;;  %s920_s11 = int_to_ptr.vmem [resolvable:$true] %s919_s11 }
 0x10d   : > { %s909_s15 = scalar_lea.sflag [#allocation3], %s908_s26 }
 0x10e   : > { %p5936_p10 = pneg %p6516_p7 }
 0x111   : > { %s6512_s1 = scalar_lea.hbm %s7243_s9, %s4511_s5  ;;  %s5939_s0 = scalar_lea.hbm %s7243_s9, 256 }
 0x112   : > { %s5934_s16 = scalar_lea.hbm %s6512_s1, 128  ;;  %p5940_p0 = scmp.lt.s32.totalorder %s6512_s1, %s7243_s9 }
 0x113   : > { %p5935_p2 = scmp.ne.s32.totalorder %s6512_s1, %s5934_s16  ;;  %p5941_p12 = scmp.lt.s32.totalorder %s5939_s0, %s5934_s16 }
 0x115   : > { %p5937_p11 = pnand %p5936_p10, %p5935_p2  ;;  %p5942_p13 = por %p5941_p12, %p5940_p0 }
 0x117   : > { %p5938_p9 = pneg %p5937_p11 }
 0x119   : > { %p5943_p4 = pnand %p5942_p13, %p5938_p9 }
 0x11b   : > { %5946 = shalt.err (!%p5943_p4)
}
 0x11c   : > { %s5947_s30 = scalar_lea.vmem %s920_s11, 128  ;;  %s6086_s26 = smov [#allocation2]  }
 0x11d   : > { %p5948_p1 = scmp.ne.s32.totalorder %s920_s11, %s5947_s30  ;;  %s5952_s17 = sshll.u32 %s6086_s26, 4  ;;  %s5953_s17 = int_to_ptr.vmem [resolvable:$false] %s5952_s17 }
 0x11e   : > { %s5954_s18 = scalar_lea.vmem %s5953_s17, 256  ;;  %p5955_p2 = scmp.lt.s32.totalorder %s920_s11, %s5953_s17 }
 0x11f   : > { %p5950_p8 = pnand %p5948_p1, %p5936_p10  ;;  %p5956_p11 = scmp.lt.s32.totalorder %s5954_s18, %s5947_s30 }
 0x121   : > { %p5951_p5 = pneg %p5950_p8  ;;  %p5957_p6 = por %p5956_p11, %p5955_p2 }
 0x123   : > { %p5958_p3 = pnand %p5957_p6, %p5951_p5 }
 0x125   : > { %5961 = shalt.err (!%p5958_p3)
}
 0x126   : > { %5221 = dma.hbm_to_vmem [thread:$0]  (!%p6516_p7), %s6512_s1, 128, %s920_s11, %s909_s15  }
 0x127   : > { %s7245_s16 = sld [smem:[#allocation44_spill]] }
 0x12d   : > { %p7246_p9 = scmp.ne.s32.totalorder %s7245_s16, 0 }
 0x12e   : > { %s6537_s5 = sand.u32 (!%p7246_p9), 1, %s6054_s3   ;;  %p7247_p1 = scmp.ne.s32.totalorder (!%p7246_p9), %s7240_s13, 0 }
 0x12f   : > { %934 = sbr.rel (%p7246_p9) target bundleno = 9287 (0x2447), region = 124  ;;  %s7165_s12 = sshll.u32 (!%p7246_p9), %s6537_s5, 3 }
 0x130   : > { %s937_s17 = scalar_lea.sflag (!%p7246_p9), [#allocation3], %s6537_s5  ;;  %s6543_s18 = scalar_lea.vmem (!%p7246_p9), [#allocation2], %s7165_s12 }
 0x134   : > { %6005 = dma.done.wait (%p7247_p1), %s937_s17, 128  }
 0x135   : > { %6007 = vsyncadd (%p7247_p1), %s937_s17, 4294967168  ;;  %p7248_p3 = scmp.eq.s32.totalorder %s6260_s29, 0 }
 0x137   : > { %6009 = dma.done.wait (%p7248_p3), [#allocation6], 64   ;;  %p7249_p4 = pmov %p7248_p3 }
 0x138   : > { %p7250_p6 = pmov %p7248_p3 }
 0x139   : > { %6011 = vsyncadd (%p7249_p4), [#allocation6], 4294967232 }
 0x13a   : > { %6013 = dma.done.wait (%p7250_p6), [#allocation9], 64   ;;  %p7251_p5 = pmov %p7248_p3 }
 0x13b   : > { %p7252_p8 = pmov %p7248_p3 }
 0x13c   : > { %6015 = vsyncadd (%p7251_p5), [#allocation9], 4294967232 }
 0x13d   : > { %6017 = dma.done.wait (%p7252_p8), [#allocation12], 64   ;;  %p7253_p7 = pmov %p7248_p3 }
 0x13e   : > { %p7254_p10 = pmov %p7248_p3 }
 0x13f   : > { %6019 = vsyncadd (%p7253_p7), [#allocation12], 4294967232 }
 0x140   : > { %6021 = dma.done.wait (%p7254_p10), [#allocation15], 544   ;;  %p7255_p0 = pmov %p7248_p3 }
 0x142   : > { %6023 = vsyncadd (%p7255_p0), [#allocation15], 4294966752  ;;  %p7256_p12 = pmov %p7255_p0 }
 0x143   : > { %p7257_p13 = pmov %p7255_p0 }
 0x144   : > { %6025 = dma.done.wait (%p7256_p12), [#allocation18], 544  }
 0x145   : > { %6027 = vsyncadd (%p7257_p13), [#allocation18], 4294966752  ;;  %p7258_p2 = pmov %p7255_p0 }
 0x146   : > { %p7259_p11 = pmov %p7255_p0 }
 0x147   : > { %6029 = dma.done.wait (%p7258_p2), [#allocation21], 64  }
 0x148   : > { %6031 = vsyncadd (%p7259_p11), [#allocation21], 4294967232  ;;  %p7260_p9 = pmov %p7255_p0 }
 0x149   : > { %p7261_p1 = pmov %p7255_p0 }
 0x14a   : > { %6033 = dma.done.wait (%p7260_p9), [#allocation24], 544  }
 0x14b   : > { %6035 = vsyncadd (%p7261_p1), [#allocation24], 4294966752  ;;  %p7262_p3 = pmov %p7255_p0 }
 0x14c   : > { %p7263_p4 = pmov %p7255_p0 }
 0x14d   : > { %6037 = dma.done.wait (%p7262_p3), [#allocation27], 64  }
 0x14e   : > { %6039 = vsyncadd (%p7263_p4), [#allocation27], 4294967232  ;;  %p7264_p6 = pmov %p7255_p0 }
 0x14f   : > { %p7265_p5 = pmov %p7255_p0 }
 0x150   : > { %6041 = dma.done.wait (%p7264_p6), [#allocation30], 32  }
 0x151   : > { %6043 = vsyncadd (%p7265_p5), [#allocation30], 4294967264  ;;  %p1088_p8 = scmp.lt.s32.totalorder %s6260_s29, 1  ;;  %s7266_s1 = sld [smem:[#allocation45_spill]]  ;;  %vm1104_vm0 = vcmask 261120   ;;  %v6087_v8 = vmov 0.0  }
 0x152   : > { %s7267_s30 = sld [smem:[#allocation51_spill]]  ;;  %4775 = vmatprep.subr.bf16.mxu1 %v6087_v8  ;;  %vm6088_vm1 = vmmov 0   ;;  %4789 = vmatprep.subr.bf16.mxu0 %v6087_v8  ;;  %v4534_v18 = vld [vmem:[#allocation5] ss:$0 sm:$0xff]  ;;  %v4535_v21 = vld [vmem:[#allocation7] ss:$0 sm:$0xff] }
 0x153   : > { %s6587_s11 = scalar_select %p1088_p8, %s6260_s29, 1  ;;  %4779 = vmatprep.mubr.msk.bf16.mxu1 %vm6088_vm1, %v6087_v8  ;;  %4791 = vmatprep.mubr.msk.bf16.mxu0 %vm6088_vm1, %v6087_v8  ;;  %v4536_v25 = vld [vmem:[#allocation8] ss:$0 sm:$0xff]  ;;  %vm1219_vm4 = vcmask 64512   ;;  %vm1283_vm5 = vcmask 1043456   ;;  %vm1671_vm6 = vcmask 130048  }
 0x154   : > { %s7174_s17 = smov 96   ;;  %s7176_s15 = smov 88   ;;  %vm1673_vm7 = vcmask 195584   ;;  %vm2575_vm12 = vcmask 523264  }
 0x155   : > { %s4533_s14 = sshll.u32 %s6587_s11, 3  ;;  %s7170_s13 = smov 80  }
 0x156   : > { %s7182_s22 = smov 104   ;;  %s7268_s16 = sld [smem:[#allocation47_spill]] }
 0x157   : > { %s1091_s0 = scalar_lea.vmem %s7266_s1, %s4533_s14  ;;  %s7186_s14 = smov 120  }
 0x158   : > { %v6593_v0 = vld [vmem:[%s1091_s0] sm:$0xff]  ;;  %v5334_v7 = vld [vmem:[%s7267_s30 + $0x8] sm:$0xff]   ;;  %s7188_s1 = smov 112   ;;  %s7172_s0 = smov 72  }
 0x159   : > { %v1105_v1 = vsel %vm1104_vm0, %v6593_v0, 0.0  ;;  %4776 = vmatpush3.bf16.msra.mxu1 %v5334_v7  ;;  %v5335_v9 = vld [vmem:[%s7267_s30] sm:$0xff]   ;;  %s7166_s6 = smov 64   ;;  %s7169_s26 = smov 56  }
 0x15a   : > { %1106 = vadd.xlane.f32.xlu0 %v1105_v1  ;;  %4777 = vmatprep.subr.bf16.mxu1 %v6087_v8  ;;  %s7167_s12 = smov 48   ;;  %s7279_s19 = smov 112  }
 0x15b   : > { %s7280_s9 = smov 120   ;;  %s7282_s20 = smov 56  }
 0x15c   : > { %v1098_v45 = vld [vmem:[%s7268_s16] sm:$0xff]  ;;  %s7285_s21 = smov 48   ;;  %p7289_p10 = scmp.ne.s32.totalorder %s7241_s4, 0 }
 0x15d   : > { %4778 = vmatpush3.bf16.msra.mxu1 %v5335_v9 }
 0x15e   : > { %4783 = vmatprep.subr.bf16.mxu1 %v6087_v8 }
 0x1e3   : > { %v1107_v2 = vpop.xlane.xlu0 %1106 }
 0x1e4   : > { %v1109_v3 = vmul.f32 0.03125, %v1107_v2 }
 0x1e6   : > { %v1110_v4 = vsub.f32 %v6593_v0, %v1109_v3 }
 0x1e8   : > { %v1111_v5 = vmul.f32 %v1110_v4, %v1110_v4  ;;  %v1130_v19 = vmul.f32 %v4534_v18, %v1110_v4 }
 0x1ea   : > { %v1112_v6 = vsel %vm1104_vm0, %v1111_v5, 0.0 }
 0x1eb   : > { %1113 = vadd.xlane.f32.xlu0 %v1112_v6 }
 0x274   : > { %v1114_v10 = vpop.xlane.xlu0 %1113 }
 0x275   : > { %v1116_v11 = vmul.f32 0.032258064, %v1114_v10 }
 0x277   : > { %5366 = vrsqrt.f32 %v1116_v11  ;;  %vm1119_vm2 = vcmp.eq.f32.partialorder %v1116_v11, inf  ;;  %v1122_v14 = vand.u32 2147483648, %v1116_v11  ;;  %vm1121_vm3 = vcmp.eq.f32.partialorder %v1116_v11, 0.0 }
 0x284   : > { %v5367_v12 = vpop.eup %5366 }
 0x285   : > { %v1118_v13 = vmul.f32 %v5367_v12, %v1116_v11 }
 0x287   : > { %v1120_v15 = vsel %vm1119_vm2, %v1116_v11, %v1118_v13 }
 0x288   : > { %v1123_v16 = vsel %vm1121_vm3, %v1122_v14, %v1120_v15 }
 0x289   : > { %v1131_v17 = vadd.f32 1e-06, %v1123_v16 }
 0x28b   : > { %5368 = vrcp.f32 %v1131_v17 }
 0x298   : > { %v5369_v20 = vpop.eup %5368 }
 0x299   : > { %v1133_v22 = vmul.f32 %v5369_v20, %v1130_v19 }
 0x29b   : > { %v1140_v23 = vadd.f32 %v4535_v21, %v1133_v22 }
 0x29d   : > { %v1141_v24 = vpack.c.bf16 %v1140_v23, %v1140_v23 }
 0x29f   : > { %4780 = vmatmul.mubr.msk.bf16.vlgmr.msra.gmra.mxu1 %vm1104_vm0, %v1141_v24 }
 0x2a0   : > { %4785 = vmatprep.mubr.msk.bf16.mxu1 %vm6088_vm1, %v6087_v8 }
 0x35f   : > { %v1202_v26 = vpop.f32.mrf.mxu1 }
 0x360   : > { %v1203_v27 = vadd.f32 %v4536_v25, %v1202_v26 }
 0x361   : > { %v4781_v28 = vpop.f32.mrf.mxu1 }
 0x362   : > { %v1208_v29 = vmul.f32 0.35355338, %v1203_v27  ;;  %v6616_v30 = vpack.c.bf16 %v1203_v27, %v1203_v27 }
 0x363   : > { %v1205_v31 = vpop.f32.mrf.mxu1 }
 0x364   : > { %v1214_v32 = vpack.c.bf16 %v1208_v29, %v1208_v29  ;;  %1217 = vrot.lane.b32.xlu1 %v6616_v30, %s7174_s17 }
 0x365   : > { %v4782_v33 = vpop.f32.mrf.mxu1 }
 0x366   : > { %1328 = vrot.lane.b32.xlu0 %v1214_v32, %s7186_s14 }
 0x368   : > { %1330 = vrot.lane.b32.xlu1 %v6616_v30, %s7176_s15  ;;  %s7180_s15 = smov 16  }
 0x36c   : > { %1440 = vrot.lane.b32.xlu1 %v6616_v30, %s7170_s13  ;;  %s7269_s13 = sld [smem:[#allocation53_spill]] }
 0x370   : > { %1438 = vrot.lane.b32.xlu1 %v1214_v32, %s7188_s1 }
 0x374   : > { %1550 = vrot.lane.b32.xlu1 %v6616_v30, %s7172_s0  ;;  %s7273_s0 = smov 96  }
 0x378   : > { %1548 = vrot.lane.b32.xlu1 %v1214_v32, %s7182_s22 }
 0x3d6   : > { %v1218_v34 = vpop.permute.xlu1 %1217 }
 0x3d7   : > { %v1224_v35 = vsel %vm1219_vm4, %v1218_v34, 0 }
 0x3d8   : > { %4784 = vmatpush3.bf16.xpose.msra.mxu1 %v1224_v35  ;;  %v1329_v39 = vpop.permute.xlu0 %1328 }
 0x3d9   : > { %4795 = vmatprep.subr.bf16.mxu1 %v6087_v8 }
 0x3da   : > { %v1331_v36 = vpop.permute.xlu1 %1330 }
 0x3db   : > { %v1336_v37 = vsel %vm1219_vm4, %v1331_v36, 0 }
 0x3de   : > { %v1441_v38 = vpop.permute.xlu1 %1440 }
 0x3df   : > { %4786 = vmatmul.mubr.msk.bf16.vlgmr.msra.gmra.mxu1 %vm1219_vm4, %v1214_v32  ;;  %v1446_v41 = vsel %vm1219_vm4, %v1441_v38, 0 }
 0x3e0   : > { %4796 = vmatpush3.bf16.xpose.msra.mxu1 %v1336_v37  ;;  %4797 = vmatprep.mubr.msk.bf16.mxu1 %vm6088_vm1, %v6087_v8 }
 0x3e1   : > { %4807 = vmatprep.subr.bf16.mxu1 %v6087_v8 }
 0x3e2   : > { %v1439_v40 = vpop.permute.xlu1 %1438 }
 0x3e6   : > { %v1551_v42 = vpop.permute.xlu1 %1550 }
 0x3e7   : > { %4798 = vmatmul.mubr.msk.bf16.vlgmr.msra.gmra.mxu1 %vm1219_vm4, %v1329_v39  ;;  %v1556_v43 = vsel %vm1219_vm4, %v1551_v42, 0 }
 0x3e8   : > { %4808 = vmatpush3.bf16.xpose.msra.mxu1 %v1446_v41  ;;  %4809 = vmatprep.mubr.msk.bf16.mxu1 %vm6088_vm1, %v6087_v8 }
 0x3e9   : > { %4819 = vmatprep.subr.bf16.mxu1 %v6087_v8 }
 0x3ea   : > { %v1549_v44 = vpop.permute.xlu1 %1548 }
 0x3ef   : > { %4810 = vmatmul.mubr.msk.bf16.vlgmr.msra.gmra.mxu1 %vm1219_vm4, %v1439_v40 }
 0x3f0   : > { %4820 = vmatpush3.bf16.xpose.msra.mxu1 %v1556_v43  ;;  %4821 = vmatprep.mubr.msk.bf16.mxu1 %vm6088_vm1, %v6087_v8 }
 0x3f1   : > { %4831 = vmatprep.subr.bf16.mxu1 %v6087_v8 }
 0x3f7   : > { %4822 = vmatmul.mubr.msk.bf16.vlgmr.msra.gmra.mxu1 %vm1219_vm4, %v1549_v44 }
 0x3f8   : > { %4835 = vmatprep.mubr.msk.bf16.mxu1 %vm6088_vm1, %v6087_v8 }
 0x49f   : > { %v1260_v46 = vpop.f32.mrf.mxu1 }
 0x4a0   : > { %v1261_v47 = vadd.f32 %v1260_v46, %v1098_v45 }
 0x4a1   : > { %v4787_v48 = vpop.f32.mrf.mxu1 }
 0x4a2   : > { %v1266_v49 = vsel %vm1219_vm4, %v1261_v47, -inf }
 0x4a3   : > { %1267 = vmax.xlane.f32.xlu1 %v1266_v49  ;;  %v1263_v50 = vpop.f32.mrf.mxu1 }
 0x4a5   : > { %v4788_v51 = vpop.f32.mrf.mxu1 }
 0x4a7   : > { %v1372_v52 = vpop.f32.mrf.mxu1 }
 0x4a8   : > { %v1373_v53 = vadd.f32 %v1372_v52, %v1098_v45 }
 0x4a9   : > { %v4799_v54 = vpop.f32.mrf.mxu1 }
 0x4aa   : > { %v1378_v55 = vsel %vm1219_vm4, %v1373_v53, -inf }
 0x4ab   : > { %1379 = vmax.xlane.f32.xlu0 %v1378_v55  ;;  %v1375_v56 = vpop.f32.mrf.mxu1 }
 0x4ad   : > { %v4800_v57 = vpop.f32.mrf.mxu1 }
 0x4af   : > { %v1482_v58 = vpop.f32.mrf.mxu1 }
 0x4b0   : > { %v1483_v59 = vadd.f32 %v1482_v58, %v1098_v45 }
 0x4b1   : > { %v4811_v60 = vpop.f32.mrf.mxu1 }
 0x4b2   : > { %v1488_v61 = vsel %vm1219_vm4, %v1483_v59, -inf  ;;  %v5336_v60 = vld [vmem:[%s7269_s13 + $0x8] sm:$0xff]  }
 0x4b3   : > { %1489 = vmax.xlane.f32.xlu1 %v1488_v61  ;;  %v1485_v62 = vpop.f32.mrf.mxu1  ;;  %4832 = vmatpush3.bf16.msra.mxu1 %v5336_v60  ;;  %v5337_v61 = vld [vmem:[%s7269_s13] sm:$0xff]  }
 0x4b4   : > { %4833 = vmatprep.subr.bf16.mxu1 %v6087_v8 }
 0x4b5   : > { %v4812_v63 = vpop.f32.mrf.mxu1 }
 0x4b7   : > { %v1592_v1 = vpop.f32.mrf.mxu1  ;;  %4834 = vmatpush3.bf16.msra.mxu1 %v5337_v61 }
 0x4b8   : > { %v1593_v2 = vadd.f32 %v1592_v1, %v1098_v45  ;;  %4847 = vmatprep.subr.bf16.mxu1 %v6087_v8 }
 0x4b9   : > { %v4823_v3 = vpop.f32.mrf.mxu1 }
 0x4ba   : > { %v1598_v4 = vsel %vm1219_vm4, %v1593_v2, -inf }
 0x4bb   : > { %1599 = vmax.xlane.f32.xlu0 %v1598_v4  ;;  %v1595_v5 = vpop.f32.mrf.mxu1 }
 0x4bd   : > { %v4824_v6 = vpop.f32.mrf.mxu1 }
 0x52c   : > { %v1268_v7 = vpop.xlane.xlu1 %1267 }
 0x52d   : > { %v1269_v9 = vsub.f32 %v1261_v47, %v1268_v7 }
 0x52f   : > { %v1270_v10 = vmul.f32 1.442695, %v1269_v9 }
 0x531   : > { %5370 = vpow2.f32 %v1270_v10 }
 0x534   : > { %v1380_v11 = vpop.xlane.xlu0 %1379 }
 0x535   : > { %v1381_v12 = vsub.f32 %v1373_v53, %v1380_v11 }
 0x537   : > { %v1382_v13 = vmul.f32 1.442695, %v1381_v12 }
 0x539   : > { %5372 = vpow2.f32 %v1382_v13 }
 0x53c   : > { %v1490_v23 = vpop.xlane.xlu1 %1489 }
 0x53d   : > { %v1491_v24 = vsub.f32 %v1483_v59, %v1490_v23 }
 0x53e   : > { %v5371_v14 = vpop.eup %5370 }
 0x53f   : > { %v1272_v15 = vsel %vm1219_vm4, %v5371_v14, 0.0  ;;  %v1492_v25 = vmul.f32 1.442695, %v1491_v24 }
 0x540   : > { %1273 = vadd.xlane.f32.xlu1 %v1272_v15  ;;  %v4548_v15 = vld [vmem:[#allocation10] ss:$0 sm:$0xff] }
 0x544   : > { %v1600_v16 = vpop.xlane.xlu0 %1599 }
 0x545   : > { %v1601_v17 = vsub.f32 %v1593_v2, %v1600_v16 }
 0x546   : > { %v5373_v18 = vpop.eup %5372 }
 0x547   : > { %v1602_v19 = vmul.f32 1.442695, %v1601_v17  ;;  %v1384_v20 = vsel %vm1219_vm4, %v5373_v18, 0.0 }
 0x548   : > { %1385 = vadd.xlane.f32.xlu0 %v1384_v20 }
 0x549   : > { %5374 = vpow2.f32 %v1602_v19 }
 0x54a   : > { %5376 = vpow2.f32 %v1492_v25 }
 0x551   : > { %1278 = vrot.lane.b32.xlu1 %v6616_v30, %s7166_s6  ;;  %s7168_s6 = smov 40  }
 0x556   : > { %v5375_v21 = vpop.eup %5374 }
 0x557   : > { %v1604_v22 = vsel %vm1219_vm4, %v5375_v21, 0.0  ;;  %v5377_v26 = vpop.eup %5376 }
 0x558   : > { %1605 = vadd.xlane.f32.xlu0 %v1604_v22  ;;  %v1494_v27 = vsel %vm1219_vm4, %v5377_v26, 0.0 }
 0x56e   : > { %1390 = vrot.lane.b32.xlu0 %v6616_v30, %s7169_s26  ;;  %s7270_s26 = sld [smem:[#allocation57_spill]] }
 0x575   : > { %1495 = vadd.xlane.f32.xlu1 %v1494_v27 }
 0x586   : > { %1500 = vrot.lane.b32.xlu1 %v6616_v30, %s7167_s12  ;;  %s7184_s12 = smov 8  }
 0x58a   : > { %1610 = vrot.lane.b32.xlu1 %v6616_v30, %s7168_s6  ;;  %s7178_s6 = smov 24  }
 0x5c9   : > { %v1274_v28 = vpop.xlane.xlu1 %1273 }
 0x5ca   : > { %5378 = vrcp.f32 %v1274_v28  ;;  %v5338_v28 = vld [vmem:[#allocation16 + $0x8] sm:$0xff]  }
 0x5cd   : > { %v1279_v29 = vpop.permute.xlu1 %1278 }
 0x5ce   : > { %v1285_v31 = vsel %vm1283_vm5, %v1279_v29, 0  ;;  %v5339_v29 = vld [vmem:[#allocation16] sm:$0xff]  }
 0x5cf   : > { %4790 = vmatpush3.bf16.msra.mxu0 %v1285_v31  ;;  %v1097_v31 = vld [vmem:[%s6543_s18] sm:$0xff]  ;;  %s7274_s18 = smov 72  }
 0x5d0   : > { %4801 = vmatprep.subr.bf16.mxu0 %v6087_v8 }
 0x5d1   : > { %v1386_v32 = vpop.xlane.xlu0 %1385 }
 0x5d2   : > { %5380 = vrcp.f32 %v1386_v32  ;;  %v5341_v32 = vld [vmem:[%s7270_s26] sm:$0xff]  }
 0x5d7   : > { %v5379_v33 = vpop.eup %5378 }
 0x5d8   : > { %v1276_v34 = vmul.f32 %v5379_v33, %v5371_v14  ;;  %v6721_v33 = vpack.c.bf16 %v1097_v31, %v1097_v31 }
 0x5da   : > { %v1277_v35 = vpack.c.bf16 %v1276_v34, %v1276_v34 }
 0x5dc   : > { %4792 = vmatmul.mubr.msk.bf16.vlgmr.msra.gmra.mxu0 %vm1219_vm4, %v1277_v35 }
 0x5dd   : > { %4803 = vmatprep.mubr.msk.bf16.mxu0 %vm6088_vm1, %v6087_v8 }
 0x5df   : > { %v5381_v30 = vpop.eup %5380 }
 0x5e0   : > { %v1388_v37 = vmul.f32 %v5381_v30, %v5373_v18 }
 0x5e1   : > { %v1606_v36 = vpop.xlane.xlu0 %1605 }
 0x5e2   : > { %v1389_v40 = vpack.c.bf16 %v1388_v37, %v1388_v37 }
 0x5e5   : > { %v1391_v38 = vpop.permute.xlu0 %1390 }
 0x5e6   : > { %v1396_v39 = vsel %vm1283_vm5, %v1391_v38, 0 }
 0x5e7   : > { %4802 = vmatpush3.bf16.msra.mxu0 %v1396_v39 }
 0x5e8   : > { %4813 = vmatprep.subr.bf16.mxu0 %v6087_v8 }
 0x5ea   : > { %4804 = vmatmul.mubr.msk.bf16.vlgmr.msra.gmra.mxu0 %vm1219_vm4, %v1389_v40 }
 0x5eb   : > { %4815 = vmatprep.mubr.msk.bf16.mxu0 %vm6088_vm1, %v6087_v8 }
 0x5fe   : > { %v1496_v41 = vpop.xlane.xlu1 %1495 }
 0x5ff   : > { %5382 = vrcp.f32 %v1496_v41  ;;  %v4552_v41 = vld [vmem:[#allocation11] ss:$0 sm:$0xff] }
 0x600   : > { %5384 = vrcp.f32 %v1606_v36 }
 0x602   : > { %v1501_v42 = vpop.permute.xlu1 %1500 }
 0x603   : > { %v1506_v43 = vsel %vm1283_vm5, %v1501_v42, 0 }
 0x604   : > { %4814 = vmatpush3.bf16.msra.mxu0 %v1506_v43 }
 0x605   : > { %4825 = vmatprep.subr.bf16.mxu0 %v6087_v8 }
 0x606   : > { %v1611_v46 = vpop.permute.xlu1 %1610 }
 0x607   : > { %v1616_v49 = vsel %vm1283_vm5, %v1611_v46, 0 }
 0x60c   : > { %v5383_v44 = vpop.eup %5382 }
 0x60d   : > { %v1498_v45 = vmul.f32 %v5383_v44, %v5377_v26  ;;  %v5385_v48 = vpop.eup %5384  ;;  %v4553_v44 = vld [vmem:[#allocation13] ss:$0 sm:$0xff] }
 0x60e   : > { %v1608_v50 = vmul.f32 %v5385_v48, %v5375_v21  ;;  %v4558_v48 = vld [vmem:[#allocation17] ss:$0 sm:$0xff] }
 0x60f   : > { %v1499_v47 = vpack.c.bf16 %v1498_v45, %v1498_v45 }
 0x610   : > { %v1609_v51 = vpack.c.bf16 %v1608_v50, %v1608_v50 }
 0x611   : > { %4816 = vmatmul.mubr.msk.bf16.vlgmr.msra.gmra.mxu0 %vm1219_vm4, %v1499_v47 }
 0x612   : > { %4826 = vmatpush3.bf16.msra.mxu0 %v1616_v49  ;;  %4827 = vmatprep.mubr.msk.bf16.mxu0 %vm6088_vm1, %v6087_v8 }
 0x613   : > { %4839 = vmatprep.subr.bf16.mxu0 %v6087_v8 }
 0x619   : > { %4828 = vmatmul.mubr.msk.bf16.vlgmr.msra.gmra.mxu0 %vm1219_vm4, %v1609_v51 }
 0x61a   : > { %4843 = vmatprep.mubr.msk.bf16.mxu0 %vm6088_vm1, %v6087_v8 }
 0x69c   : > { %v1321_v52 = vpop.f32.mrf.mxu0 }
 0x69e   : > { %v4793_v53 = vpop.f32.mrf.mxu0 }
 0x6a0   : > { %v1324_v54 = vpop.f32.mrf.mxu0 }
 0x6a2   : > { %v4794_v55 = vpop.f32.mrf.mxu0 }
 0x6aa   : > { %v1432_v56 = vpop.f32.mrf.mxu0 }
 0x6ab   : > { %1659 = vrot.lane.b32.xlu0 %v1432_v56, %s7184_s12  ;;  %v4554_v56 = vld [vmem:[#allocation14] ss:$0 sm:$0xff] }
 0x6ac   : > { %v4805_v57 = vpop.f32.mrf.mxu0 }
 0x6ae   : > { %v1435_v58 = vpop.f32.mrf.mxu0 }
 0x6b0   : > { %v4806_v59 = vpop.f32.mrf.mxu0 }
 0x6d1   : > { %v1542_v62 = vpop.f32.mrf.mxu0 }
 0x6d2   : > { %1663 = vrot.lane.b32.xlu1 %v1542_v62, %s7180_s15  ;;  %s7275_s15 = smov 80  }
 0x6d3   : > { %v4817_v63 = vpop.f32.mrf.mxu0 }
 0x6d5   : > { %v1545_v1 = vpop.f32.mrf.mxu0 }
 0x6d7   : > { %v4818_v2 = vpop.f32.mrf.mxu0 }
 0x6d9   : > { %v1652_v3 = vpop.f32.mrf.mxu0 }
 0x6da   : > { %1667 = vrot.lane.b32.xlu0 %v1652_v3, %s7178_s6  ;;  %s7271_s6 = sld [smem:[#allocation48_spill]] }
 0x6db   : > { %v4829_v4 = vpop.f32.mrf.mxu0 }
 0x6dd   : > { %v1655_v5 = vpop.f32.mrf.mxu0 }
 0x6df   : > { %v4830_v6 = vpop.f32.mrf.mxu0 }
 0x6e0   : > { %s6768_s17 = scalar_lea.vmem %s7271_s6, %s6587_s11  ;;  %s7272_s11 = smov 88  }
 0x6e1   : > { %s7276_s6 = smov 16  }
 0x71d   : > { %v1660_v7 = vpop.permute.xlu0 %1659 }
 0x71e   : > { %v1670_v10 = vsel %vm1219_vm4, %v1321_v52, %v1660_v7 }
 0x744   : > { %v1664_v9 = vpop.permute.xlu1 %1663 }
 0x745   : > { %v1672_v11 = vsel %vm1671_vm6, %v1670_v10, %v1664_v9 }
 0x74c   : > { %v1668_v12 = vpop.permute.xlu0 %1667 }
 0x74d   : > { %v1674_v13 = vsel %vm1673_vm7, %v1672_v11, %v1668_v12  ;;  %v4562_v11 = vld [vmem:[%s6768_s17] ss:$0 sm:$0xff] }
 0x74e   : > { %v1675_v14 = vpack.c.bf16 %v1674_v13, %v1674_v13 }
 0x750   : > { %4836 = vmatmul.mubr.msk.bf16.vlgmr.msra.gmra.mxu1 %vm1104_vm0, %v1675_v14 }
 0x751   : > { %4851 = vmatprep.mubr.msk.bf16.mxu1 %vm6088_vm1, %v6087_v8  ;;  %4848 = vmatpush3.bf16.msra.mxu1 %v5338_v28 }
 0x752   : > { %4849 = vmatprep.subr.bf16.mxu1 %v6087_v8 }
 0x755   : > { %4850 = vmatpush3.bf16.msra.mxu1 %v5339_v29 }
 0x756   : > { %4861 = vmatprep.subr.bf16.mxu1 %v6087_v8 }
 0x758   : > { %4852 = vmatmul.mubr.msk.bf16.vlgmr.msra.gmra.mxu1 %vm1104_vm0, %v6721_v33 }
 0x759   : > { %4863 = vmatprep.mubr.msk.bf16.mxu1 %vm6088_vm1, %v6087_v8 }
 0x810   : > { %v1731_v16 = vpop.f32.mrf.mxu1 }
 0x811   : > { %v1732_v17 = vadd.f32 %v4548_v15, %v1731_v16 }
 0x812   : > { %v4837_v18 = vpop.f32.mrf.mxu1 }
 0x813   : > { %v6706_v19 = vadd.f32 %v1732_v17, %v6593_v0  ;;  %v5340_v0 = vld [vmem:[%s7270_s26 + $0x8] sm:$0xff]  }
 0x814   : > { %v1734_v20 = vpop.f32.mrf.mxu1  ;;  %4840 = vmatpush3.bf16.msra.mxu0 %v5340_v0 }
 0x815   : > { %v1740_v21 = vsel %vm1104_vm0, %v6706_v19, 0.0  ;;  %4841 = vmatprep.subr.bf16.mxu0 %v6087_v8 }
 0x816   : > { %1741 = vadd.xlane.f32.xlu1 %v1740_v21  ;;  %v4838_v22 = vpop.f32.mrf.mxu1 }
 0x818   : > { %4842 = vmatpush3.bf16.msra.mxu0 %v5341_v32  ;;  %v1903_v49 = vpop.f32.mrf.mxu1 }
 0x819   : > { %4855 = vmatprep.subr.bf16.mxu0 %v6087_v8  ;;  %v1904_v50 = vadd.f32 %v4558_v48, %v1903_v49 }
 0x81a   : > { %v4853_v51 = vpop.f32.mrf.mxu1 }
 0x81b   : > { %v6732_v52 = vpack.c.bf16 %v1904_v50, %v1904_v50 }
 0x81c   : > { %v1906_v53 = vpop.f32.mrf.mxu1 }
 0x81d   : > { %v1926_v55 = vsel %vm1219_vm4, %v6732_v52, 0 }
 0x81e   : > { %v4854_v54 = vpop.f32.mrf.mxu1 }
 0x89f   : > { %v1742_v23 = vpop.xlane.xlu1 %1741 }
 0x8a0   : > { %v1743_v24 = vmul.f32 0.03125, %v1742_v23 }
 0x8a2   : > { %v1744_v25 = vsub.f32 %v6706_v19, %v1743_v24 }
 0x8a4   : > { %v1745_v26 = vmul.f32 %v1744_v25, %v1744_v25  ;;  %v1763_v42 = vmul.f32 %v4552_v41, %v1744_v25 }
 0x8a6   : > { %v1746_v27 = vsel %vm1104_vm0, %v1745_v26, 0.0 }
 0x8a7   : > { %1747 = vadd.xlane.f32.xlu0 %v1746_v27 }
 0x8bd   : > { %2032 = vrot.lane.b32.xlu0 %v6732_v52, %s7186_s14 }
 0x930   : > { %v1748_v34 = vpop.xlane.xlu0 %1747 }
 0x931   : > { %v1749_v35 = vmul.f32 0.032258064, %v1748_v34 }
 0x933   : > { %5386 = vrsqrt.f32 %v1749_v35  ;;  %vm1752_vm8 = vcmp.eq.f32.partialorder %v1749_v35, inf  ;;  %v1755_v37 = vand.u32 2147483648, %v1749_v35  ;;  %vm1754_vm9 = vcmp.eq.f32.partialorder %v1749_v35, 0.0 }
 0x934   : > { %v2033_v61 = vpop.permute.xlu0 %2032 }
 0x935   : > { %v2038_v2 = vsel %vm1219_vm4, %v2033_v61, 0 }
 0x940   : > { %v5387_v30 = vpop.eup %5386 }
 0x941   : > { %v1751_v36 = vmul.f32 %v5387_v30, %v1749_v35 }
 0x943   : > { %v1753_v38 = vsel %vm1752_vm8, %v1749_v35, %v1751_v36 }
 0x944   : > { %v1756_v39 = vsel %vm1754_vm9, %v1755_v37, %v1753_v38 }
 0x945   : > { %v1764_v40 = vadd.f32 1e-06, %v1756_v39 }
 0x947   : > { %5388 = vrcp.f32 %v1764_v40 }
 0x954   : > { %v5389_v43 = vpop.eup %5388 }
 0x955   : > { %v1766_v45 = vmul.f32 %v5389_v43, %v1763_v42 }
 0x957   : > { %v1773_v46 = vadd.f32 %v4553_v44, %v1766_v45 }
 0x959   : > { %v1774_v47 = vpack.c.bf16 %v1773_v46, %v1773_v46 }
 0x95b   : > { %4844 = vmatmul.mubr.msk.bf16.vlgmr.msra.gmra.mxu0 %vm1104_vm0, %v1774_v47 }
 0x95c   : > { %4857 = vmatprep.mubr.msk.bf16.mxu0 %vm6088_vm1, %v6087_v8  ;;  %4856 = vmatpush3.bf16.xpose.msra.mxu0 %v1926_v55 }
 0x95d   : > { %4867 = vmatprep.subr.bf16.mxu0 %v6087_v8 }
 0xa1b   : > { %v1835_v57 = vpop.f32.mrf.mxu0 }
 0xa1c   : > { %v1836_v58 = vadd.f32 %v4554_v56, %v1835_v57 }
 0xa1d   : > { %v4845_v59 = vpop.f32.mrf.mxu0 }
 0xa1e   : > { %v1841_v60 = vmul.f32 0.35355338, %v1836_v58 }
 0xa1f   : > { %v1838_v62 = vpop.f32.mrf.mxu0 }
 0xa20   : > { %v1914_v63 = vpack.c.bf16 %v1841_v60, %v1841_v60 }
 0xa21   : > { %v4846_v1 = vpop.f32.mrf.mxu0 }
 0xa22   : > { %2030 = vrot.lane.b32.xlu1 %v1914_v63, %s7186_s14  ;;  %2140 = vrot.lane.b32.xlu0 %v1914_v63, %s7188_s1  ;;  %s7283_s14 = smov 64  }
 0xa23   : > { %4858 = vmatmul.mubr.msk.bf16.vlgmr.msra.gmra.mxu0 %vm1219_vm4, %v1914_v63 }
 0xa24   : > { %4868 = vmatpush3.bf16.xpose.msra.mxu0 %v2038_v2  ;;  %4869 = vmatprep.mubr.msk.bf16.mxu0 %vm6088_vm1, %v6087_v8 }
 0xa25   : > { %4879 = vmatprep.subr.bf16.mxu0 %v6087_v8 }
 0xa26   : > { %2142 = vrot.lane.b32.xlu1 %v6732_v52, %s7188_s1  ;;  %2250 = vrot.lane.b32.xlu0 %v1914_v63, %s7182_s22  ;;  %s7278_s1 = sld [smem:[#allocation67_spill]] }
 0xa2a   : > { %2252 = vrot.lane.b32.xlu1 %v6732_v52, %s7182_s22  ;;  %s7277_s22 = smov 24  }
 0xa94   : > { %v2031_v3 = vpop.permute.xlu1 %2030  ;;  %v2141_v7 = vpop.permute.xlu0 %2140 }
 0xa95   : > { %4870 = vmatmul.mubr.msk.bf16.vlgmr.msra.gmra.mxu0 %vm1219_vm4, %v2031_v3 }
 0xa96   : > { %4881 = vmatprep.mubr.msk.bf16.mxu0 %vm6088_vm1, %v6087_v8 }
 0xa98   : > { %v2143_v4 = vpop.permute.xlu1 %2142  ;;  %v2251_v10 = vpop.permute.xlu0 %2250 }
 0xa99   : > { %v2148_v5 = vsel %vm1219_vm4, %v2143_v4, 0 }
 0xa9a   : > { %4880 = vmatpush3.bf16.xpose.msra.mxu0 %v2148_v5 }
 0xa9b   : > { %4891 = vmatprep.subr.bf16.mxu0 %v6087_v8 }
 0xa9c   : > { %v2253_v6 = vpop.permute.xlu1 %2252 }
 0xa9d   : > { %v2258_v9 = vsel %vm1219_vm4, %v2253_v6, 0 }
 0xaa1   : > { %4882 = vmatmul.mubr.msk.bf16.vlgmr.msra.gmra.mxu0 %vm1219_vm4, %v2141_v7 }
 0xaa2   : > { %4892 = vmatpush3.bf16.xpose.msra.mxu0 %v2258_v9  ;;  %4893 = vmatprep.mubr.msk.bf16.mxu0 %vm6088_vm1, %v6087_v8 }
 0xaa3   : > { %4903 = vmatprep.subr.bf16.mxu0 %v6087_v8 }
 0xaa9   : > { %4894 = vmatmul.mubr.msk.bf16.vlgmr.msra.gmra.mxu0 %vm1219_vm4, %v2251_v10 }
 0xaaa   : > { %4907 = vmatprep.mubr.msk.bf16.mxu0 %vm6088_vm1, %v6087_v8 }
 0xae3   : > { %v1962_v12 = vpop.f32.mrf.mxu0 }
 0xae4   : > { %v1963_v13 = vadd.f32 %v4562_v11, %v1962_v12 }
 0xae5   : > { %v4859_v14 = vpop.f32.mrf.mxu0 }
 0xae6   : > { %v1968_v15 = vsel %vm1219_vm4, %v1963_v13, -inf }
 0xae7   : > { %1969 = vmax.xlane.f32.xlu1 %v1968_v15  ;;  %v1965_v16 = vpop.f32.mrf.mxu0 }
 0xae9   : > { %v4860_v17 = vpop.f32.mrf.mxu0 }
 0xb55   : > { %v2074_v18 = vpop.f32.mrf.mxu0 }
 0xb56   : > { %v2075_v20 = vadd.f32 %v4562_v11, %v2074_v18 }
 0xb57   : > { %v4871_v21 = vpop.f32.mrf.mxu0 }
 0xb58   : > { %v2080_v22 = vsel %vm1219_vm4, %v2075_v20, -inf }
 0xb59   : > { %2081 = vmax.xlane.f32.xlu0 %v2080_v22  ;;  %v2077_v23 = vpop.f32.mrf.mxu0 }
 0xb5b   : > { %v4872_v24 = vpop.f32.mrf.mxu0 }
 0xb61   : > { %v2184_v25 = vpop.f32.mrf.mxu0 }
 0xb62   : > { %v2185_v26 = vadd.f32 %v4562_v11, %v2184_v25 }
 0xb63   : > { %v4883_v27 = vpop.f32.mrf.mxu0 }
 0xb64   : > { %v2190_v28 = vsel %vm1219_vm4, %v2185_v26, -inf }
 0xb65   : > { %2191 = vmax.xlane.f32.xlu0 %v2190_v28  ;;  %v2187_v0 = vpop.f32.mrf.mxu0  ;;  %v5342_v28 = vld [vmem:[#allocation19 + $0x8] sm:$0xff]  }
 0xb66   : > { %4904 = vmatpush3.bf16.msra.mxu0 %v5342_v28  ;;  %v5343_v0 = vld [vmem:[#allocation19] sm:$0xff]  }
 0xb67   : > { %v4884_v29 = vpop.f32.mrf.mxu0  ;;  %4905 = vmatprep.subr.bf16.mxu0 %v6087_v8 }
 0xb69   : > { %v2294_v31 = vpop.f32.mrf.mxu0 }
 0xb6a   : > { %v2295_v32 = vadd.f32 %v4562_v11, %v2294_v31  ;;  %4906 = vmatpush3.bf16.msra.mxu0 %v5343_v0 }
 0xb6b   : > { %v4895_v34 = vpop.f32.mrf.mxu0  ;;  %4919 = vmatprep.subr.bf16.mxu0 %v6087_v8 }
 0xb6c   : > { %v2300_v35 = vsel %vm1219_vm4, %v2295_v32, -inf }
 0xb6d   : > { %2301 = vmax.xlane.f32.xlu1 %v2300_v35  ;;  %v2297_v30 = vpop.f32.mrf.mxu0 }
 0xb6f   : > { %v4896_v36 = vpop.f32.mrf.mxu0 }
 0xb70   : > { %v1970_v37 = vpop.xlane.xlu1 %1969 }
 0xb71   : > { %v1971_v38 = vsub.f32 %v1963_v13, %v1970_v37 }
 0xb73   : > { %v1972_v39 = vmul.f32 1.442695, %v1971_v38 }
 0xb75   : > { %5390 = vpow2.f32 %v1972_v39 }
 0xb82   : > { %v5391_v40 = vpop.eup %5390 }
 0xb83   : > { %v1974_v41 = vsel %vm1219_vm4, %v5391_v40, 0.0 }
 0xb84   : > { %1975 = vadd.xlane.f32.xlu0 %v1974_v41 }
 0xbe2   : > { %v2082_v42 = vpop.xlane.xlu0 %2081 }
 0xbe3   : > { %v2083_v43 = vsub.f32 %v2075_v20, %v2082_v42 }
 0xbe5   : > { %v2084_v44 = vmul.f32 1.442695, %v2083_v43 }
 0xbe7   : > { %5392 = vpow2.f32 %v2084_v44 }
 0xbee   : > { %v2192_v45 = vpop.xlane.xlu0 %2191 }
 0xbef   : > { %v2193_v46 = vsub.f32 %v2185_v26, %v2192_v45  ;;  %v4571_v45 = vld [vmem:[#allocation20] ss:$0 sm:$0xff] }
 0xbf1   : > { %v2194_v47 = vmul.f32 1.442695, %v2193_v46 }
 0xbf3   : > { %5394 = vpow2.f32 %v2194_v47 }
 0xbf4   : > { %v5393_v48 = vpop.eup %5392 }
 0xbf5   : > { %v2086_v49 = vsel %vm1219_vm4, %v5393_v48, 0.0 }
 0xbf6   : > { %2087 = vadd.xlane.f32.xlu1 %v2086_v49  ;;  %v2302_v53 = vpop.xlane.xlu1 %2301 }
 0xbf7   : > { %v2303_v54 = vsub.f32 %v2295_v32, %v2302_v53 }
 0xbf9   : > { %v2304_v55 = vmul.f32 1.442695, %v2303_v54 }
 0xbfb   : > { %5396 = vpow2.f32 %v2304_v55 }
 0xc00   : > { %v5395_v50 = vpop.eup %5394 }
 0xc01   : > { %v2196_v51 = vsel %vm1219_vm4, %v5395_v50, 0.0 }
 0xc02   : > { %2197 = vadd.xlane.f32.xlu0 %v2196_v51 }
 0xc07   : > { %2092 = vrot.lane.b32.xlu1 %v6732_v52, %s7272_s11 }
 0xc08   : > { %v5397_v56 = vpop.eup %5396 }
 0xc09   : > { %v2306_v57 = vsel %vm1219_vm4, %v5397_v56, 0.0 }
 0xc0d   : > { %v1976_v58 = vpop.xlane.xlu0 %1975 }
 0xc0e   : > { %5398 = vrcp.f32 %v1976_v58 }
 0xc18   : > { %1981 = vrot.lane.b32.xlu0 %v6732_v52, %s7273_s0 }
 0xc1b   : > { %v5399_v60 = vpop.eup %5398 }
 0xc1c   : > { %2312 = vrot.lane.b32.xlu0 %v6732_v52, %s7274_s18  ;;  %v1978_v62 = vmul.f32 %v5399_v60, %v5391_v40  ;;  %v5345_v60 = vld [vmem:[#allocation25] sm:$0xff]  }
 0xc1e   : > { %v1979_v3 = vpack.c.bf16 %v1978_v62, %v1978_v62 }
 0xc2b   : > { %2307 = vadd.xlane.f32.xlu1 %v2306_v57 }
 0xc3c   : > { %2202 = vrot.lane.b32.xlu1 %v6732_v52, %s7275_s15 }
 0xc7f   : > { %v2088_v59 = vpop.xlane.xlu1 %2087 }
 0xc80   : > { %5400 = vrcp.f32 %v2088_v59  ;;  %v5344_v59 = vld [vmem:[#allocation25 + $0x8] sm:$0xff]  }
 0xc83   : > { %v2093_v2 = vpop.permute.xlu1 %2092 }
 0xc84   : > { %v2098_v5 = vsel %vm1283_vm5, %v2093_v2, 0 }
 0xc8b   : > { %v2198_v61 = vpop.xlane.xlu0 %2197 }
 0xc8c   : > { %5402 = vrcp.f32 %v2198_v61  ;;  %v5347_v61 = vld [vmem:[%s7278_s1 + $0x10] sm:$0xff]  }
 0xc8d   : > { %v5401_v4 = vpop.eup %5400 }
 0xc8e   : > { %v2090_v52 = vmul.f32 %v5401_v4, %v5393_v48 }
 0xc8f   : > { %v1982_v63 = vpop.permute.xlu0 %1981 }
 0xc90   : > { %v1987_v1 = vsel %vm1283_vm5, %v1982_v63, 0  ;;  %v2091_v6 = vpack.c.bf16 %v2090_v52, %v2090_v52 }
 0xc91   : > { %4862 = vmatpush3.bf16.msra.mxu1 %v1987_v1 }
 0xc92   : > { %4873 = vmatprep.subr.bf16.mxu1 %v6087_v8 }
 0xc93   : > { %v2313_v13 = vpop.permute.xlu0 %2312 }
 0xc94   : > { %4864 = vmatmul.mubr.msk.bf16.vlgmr.msra.gmra.mxu1 %vm1219_vm4, %v1979_v3  ;;  %v2318_v15 = vsel %vm1283_vm5, %v2313_v13, 0 }
 0xc95   : > { %4874 = vmatpush3.bf16.msra.mxu1 %v2098_v5  ;;  %4875 = vmatprep.mubr.msk.bf16.mxu1 %vm6088_vm1, %v6087_v8 }
 0xc96   : > { %4885 = vmatprep.subr.bf16.mxu1 %v6087_v8 }
 0xc99   : > { %v5403_v7 = vpop.eup %5402 }
 0xc9a   : > { %v2200_v10 = vmul.f32 %v5403_v7, %v5395_v50 }
 0xc9c   : > { %4876 = vmatmul.mubr.msk.bf16.vlgmr.msra.gmra.mxu1 %vm1219_vm4, %v2091_v6  ;;  %v2201_v14 = vpack.c.bf16 %v2200_v10, %v2200_v10  ;;  %v4575_v6 = vld [vmem:[#allocation22] ss:$0 sm:$0xff]  ;;  %v4576_v10 = vld [vmem:[#allocation23] ss:$0 sm:$0xff] }
 0xc9d   : > { %4887 = vmatprep.mubr.msk.bf16.mxu1 %vm6088_vm1, %v6087_v8 }
 0xcb4   : > { %v2308_v9 = vpop.xlane.xlu1 %2307 }
 0xcb5   : > { %5404 = vrcp.f32 %v2308_v9 }
 0xcb8   : > { %v2203_v11 = vpop.permute.xlu1 %2202 }
 0xcb9   : > { %v2208_v12 = vsel %vm1283_vm5, %v2203_v11, 0 }
 0xcba   : > { %4886 = vmatpush3.bf16.msra.mxu1 %v2208_v12 }
 0xcbb   : > { %4897 = vmatprep.subr.bf16.mxu1 %v6087_v8 }
 0xcbd   : > { %4888 = vmatmul.mubr.msk.bf16.vlgmr.msra.gmra.mxu1 %vm1219_vm4, %v2201_v14  ;;  %v5348_v14 = vld [vmem:[%s7278_s1 + $0x8] sm:$0xff]  }
 0xcbe   : > { %4898 = vmatpush3.bf16.msra.mxu1 %v2318_v15  ;;  %4899 = vmatprep.mubr.msk.bf16.mxu1 %vm6088_vm1, %v6087_v8  ;;  %v5349_v15 = vld [vmem:[%s7278_s1] sm:$0xff]  }
 0xcbf   : > { %4911 = vmatprep.subr.bf16.mxu1 %v6087_v8 }
 0xcc2   : > { %v5405_v16 = vpop.eup %5404 }
 0xcc3   : > { %v2310_v17 = vmul.f32 %v5405_v16, %v5397_v56  ;;  %v4577_v16 = vld [vmem:[#allocation26] ss:$0 sm:$0xff] }
 0xcc5   : > { %v2311_v18 = vpack.c.bf16 %v2310_v17, %v2310_v17 }
 0xcc7   : > { %4900 = vmatmul.mubr.msk.bf16.vlgmr.msra.gmra.mxu1 %vm1219_vm4, %v2311_v18 }
 0xcc8   : > { %4915 = vmatprep.mubr.msk.bf16.mxu1 %vm6088_vm1, %v6087_v8  ;;  %4912 = vmatpush3.bf16.msra.mxu1 %v5344_v59  ;;  %v5350_v59 = vld [vmem:[%s7267_s30 + $0x18] sm:$0xff]  }
 0xcc9   : > { %4913 = vmatprep.subr.bf16.mxu1 %v6087_v8 }
 0xccc   : > { %4914 = vmatpush3.bf16.msra.mxu1 %v5345_v60  ;;  %v5351_v60 = vld [vmem:[%s7267_s30 + $0x10] sm:$0xff]  }
 0xccd   : > { %4931 = vmatprep.subr.bf16.mxu1 %v6087_v8 }
 0xd54   : > { %v2023_v20 = vpop.f32.mrf.mxu1 }
 0xd56   : > { %v4865_v21 = vpop.f32.mrf.mxu1 }
 0xd58   : > { %v2026_v22 = vpop.f32.mrf.mxu1 }
 0xd5a   : > { %v4866_v23 = vpop.f32.mrf.mxu1 }
 0xd5c   : > { %v2134_v24 = vpop.f32.mrf.mxu1 }
 0xd5d   : > { %2361 = vrot.lane.b32.xlu1 %v2134_v24, %s7184_s12  ;;  %s7281_s12 = smov 104  }
 0xd5e   : > { %v4877_v25 = vpop.f32.mrf.mxu1 }
 0xd60   : > { %v2137_v26 = vpop.f32.mrf.mxu1 }
 0xd61   : > { %v4586_v26 = vld [vmem:[#allocation28] ss:$0 sm:$0xff] }
 0xd62   : > { %v4878_v27 = vpop.f32.mrf.mxu1 }
 0xd7d   : > { %v2244_v29 = vpop.f32.mrf.mxu1 }
 0xd7e   : > { %2365 = vrot.lane.b32.xlu0 %v2244_v29, %s7276_s6 }
 0xd7f   : > { %v4889_v31 = vpop.f32.mrf.mxu1 }
 0xd81   : > { %v2247_v32 = vpop.f32.mrf.mxu1 }
 0xd83   : > { %v4890_v34 = vpop.f32.mrf.mxu1 }
 0xd87   : > { %v2354_v35 = vpop.f32.mrf.mxu1 }
 0xd88   : > { %2369 = vrot.lane.b32.xlu1 %v2354_v35, %s7277_s22 }
 0xd89   : > { %v4901_v30 = vpop.f32.mrf.mxu1 }
 0xd8b   : > { %v2357_v36 = vpop.f32.mrf.mxu1 }
 0xd8d   : > { %v4902_v37 = vpop.f32.mrf.mxu1 }
 0xdcf   : > { %v2362_v38 = vpop.permute.xlu1 %2361 }
 0xdd0   : > { %v2372_v40 = vsel %vm1219_vm4, %v2023_v20, %v2362_v38 }
 0xdf0   : > { %v2366_v39 = vpop.permute.xlu0 %2365 }
 0xdf1   : > { %v2373_v41 = vsel %vm1671_vm6, %v2372_v40, %v2366_v39 }
 0xdfa   : > { %v2370_v42 = vpop.permute.xlu1 %2369 }
 0xdfb   : > { %v2374_v43 = vsel %vm1673_vm7, %v2373_v41, %v2370_v42 }
 0xdfc   : > { %v2375_v44 = vpack.c.bf16 %v2374_v43, %v2374_v43 }
 0xdfe   : > { %4908 = vmatmul.mubr.msk.bf16.vlgmr.msra.gmra.mxu0 %vm1104_vm0, %v2375_v44 }
 0xdff   : > { %4927 = vmatprep.mubr.msk.bf16.mxu0 %vm6088_vm1, %v6087_v8 }
 0xebe   : > { %v2431_v46 = vpop.f32.mrf.mxu0 }
 0xebf   : > { %v2432_v47 = vadd.f32 %v4571_v45, %v2431_v46  ;;  %v4587_v46 = vld [vmem:[#allocation29] ss:$0 sm:$0xff] }
 0xec0   : > { %v4909_v48 = vpop.f32.mrf.mxu0 }
 0xec1   : > { %v6819_v49 = vadd.f32 %v2432_v47, %v6706_v19  ;;  %v5346_v19 = vld [vmem:[%s7278_s1 + $0x18] sm:$0xff]  }
 0xec2   : > { %v2434_v50 = vpop.f32.mrf.mxu0  ;;  %4920 = vmatpush3.bf16.msra.mxu0 %v5346_v19 }
 0xec3   : > { %v2440_v51 = vsel %vm1104_vm0, %v6819_v49, 0.0  ;;  %4921 = vmatprep.subr.bf16.mxu0 %v6087_v8 }
 0xec4   : > { %2441 = vadd.xlane.f32.xlu0 %v2440_v51  ;;  %v4910_v53 = vpop.f32.mrf.mxu0 }
 0xec6   : > { %4922 = vmatpush3.bf16.msra.mxu0 %v5347_v61 }
 0xec7   : > { %4923 = vmatprep.subr.bf16.mxu0 %v6087_v8 }
 0xeca   : > { %4924 = vmatpush3.bf16.msra.mxu0 %v5348_v14 }
 0xecb   : > { %4925 = vmatprep.subr.bf16.mxu0 %v6087_v8 }
 0xece   : > { %4926 = vmatpush3.bf16.msra.mxu0 %v5349_v15 }
 0xecf   : > { %4945 = vmatprep.subr.bf16.mxu0 %v6087_v8 }
 0xf4d   : > { %v2442_v54 = vpop.xlane.xlu0 %2441 }
 0xf4e   : > { %v2443_v55 = vmul.f32 0.03125, %v2442_v54 }
 0xf50   : > { %v2444_v56 = vsub.f32 %v6819_v49, %v2443_v55 }
 0xf52   : > { %v2445_v57 = vmul.f32 %v2444_v56, %v2444_v56  ;;  %v2463_v7 = vmul.f32 %v4575_v6, %v2444_v56 }
 0xf54   : > { %v2446_v58 = vsel %vm1104_vm0, %v2445_v57, 0.0 }
 0xf55   : > { %2447 = vadd.xlane.f32.xlu1 %v2446_v58 }
 0xfde   : > { %v2448_v62 = vpop.xlane.xlu1 %2447 }
 0xfdf   : > { %v2449_v63 = vmul.f32 0.032258064, %v2448_v62 }
 0xfe1   : > { %5406 = vrsqrt.f32 %v2449_v63  ;;  %vm2452_vm10 = vcmp.eq.f32.partialorder %v2449_v63, inf  ;;  %v2455_v3 = vand.u32 2147483648, %v2449_v63  ;;  %vm2454_vm11 = vcmp.eq.f32.partialorder %v2449_v63, 0.0 }
 0xfee   : > { %v5407_v1 = vpop.eup %5406 }
 0xfef   : > { %v2451_v2 = vmul.f32 %v5407_v1, %v2449_v63 }
 0xff1   : > { %v2453_v4 = vsel %vm2452_vm10, %v2449_v63, %v2451_v2 }
 0xff2   : > { %v2456_v5 = vsel %vm2454_vm11, %v2455_v3, %v2453_v4 }
 0xff3   : > { %v2464_v52 = vadd.f32 1e-06, %v2456_v5  ;;  %v4589_v5 = vld [vmem:[#allocation5 + $0x1] ss:$0 sm:$0xff] }
 0xff5   : > { %5408 = vrcp.f32 %v2464_v52 }
0x1002   : > { %v5409_v9 = vpop.eup %5408 }
0x1003   : > { %v2466_v11 = vmul.f32 %v5409_v9, %v2463_v7  ;;  %v4590_v7 = vld [vmem:[#allocation7 + $0x1] ss:$0 sm:$0xff] }
0x1005   : > { %v2473_v12 = vadd.f32 %v4576_v10, %v2466_v11 }
0x1007   : > { %v2474_v13 = vpack.c.bf16 %v2473_v12, %v2473_v12  ;;  %v4595_v12 = vld [vmem:[#allocation8 + $0x1] ss:$0 sm:$0xff] }
0x1009   : > { %4916 = vmatmul.mubr.msk.bf16.vlgmr.msra.gmra.mxu1 %vm1104_vm0, %v2474_v13 }
0x100a   : > { %4935 = vmatprep.mubr.msk.bf16.mxu1 %vm6088_vm1, %v6087_v8  ;;  %4932 = vmatpush3.bf16.msra.mxu1 %v5350_v59 }
0x100b   : > { %4933 = vmatprep.subr.bf16.mxu1 %v6087_v8 }
0x100e   : > { %4934 = vmatpush3.bf16.msra.mxu1 %v5351_v60 }
0x100f   : > { %4939 = vmatprep.subr.bf16.mxu1 %v6087_v8 }
0x10c9   : > { %v2535_v17 = vpop.f32.mrf.mxu1 }
0x10ca   : > { %v2536_v18 = vadd.f32 %v4577_v16, %v2535_v17 }
0x10cb   : > { %v4917_v20 = vpop.f32.mrf.mxu1 }
0x10cc   : > { %v2541_v21 = vmax.f32 %v2536_v18, 0.0 }
0x10cd   : > { %v2538_v22 = vpop.f32.mrf.mxu1 }
0x10ce   : > { %v2542_v23 = vpack.c.bf16 %v2541_v21, %v2541_v21 }
0x10cf   : > { %v4918_v24 = vpop.f32.mrf.mxu1 }
0x10d0   : > { %4928 = vmatmul.mubr.msk.bf16.vlgmr.msra.gmra.mxu0 %vm2575_vm12, %v2542_v23 }
0x10d1   : > { %4947 = vmatprep.mubr.msk.bf16.mxu0 %vm6088_vm1, %v6087_v8 }
0x1190   : > { %v2613_v25 = vpop.f32.mrf.mxu0 }
0x1191   : > { %v2619_v27 = vadd.f32 %v2613_v25, %v6819_v49  ;;  %v4588_v49 = vld [vmem:[#allocation31] ss:$0 sm:$0xff] }
0x1192   : > { %v4929_v28 = vpop.f32.mrf.mxu0 }
0x1193   : > { %v2627_v0 = vadd.f32 %v4586_v26, %v2619_v27 }
0x1194   : > { %v2616_v29 = vpop.f32.mrf.mxu0 }
0x1195   : > { %v2628_v31 = vsel %vm1104_vm0, %v2627_v0, 0.0 }
0x1196   : > { %2629 = vadd.xlane.f32.xlu0 %v2628_v31  ;;  %v4930_v32 = vpop.f32.mrf.mxu0 }
0x121f   : > { %v2630_v34 = vpop.xlane.xlu0 %2629 }
0x1220   : > { %v2631_v35 = vmul.f32 0.03125, %v2630_v34 }
0x1222   : > { %v2632_v30 = vsub.f32 %v2627_v0, %v2631_v35  ;;  %v5462_v35 = vld [vmem:[%s7268_s16] sm:$0xff]  ;;  %s7284_s16 = smov 40  }
0x1224   : > { %v2633_v36 = vmul.f32 %v2632_v30, %v2632_v30  ;;  %v2651_v47 = vmul.f32 %v4587_v46, %v2632_v30 }
0x1226   : > { %v2634_v37 = vsel %vm1104_vm0, %v2633_v36, 0.0 }
0x1227   : > { %2635 = vadd.xlane.f32.xlu0 %v2634_v37 }
0x12b0   : > { %v2636_v38 = vpop.xlane.xlu0 %2635 }
0x12b1   : > { %v2637_v39 = vmul.f32 0.032258064, %v2636_v38 }
0x12b3   : > { %5410 = vrsqrt.f32 %v2637_v39  ;;  %vm2640_vm13 = vcmp.eq.f32.partialorder %v2637_v39, inf  ;;  %v2643_v42 = vand.u32 2147483648, %v2637_v39  ;;  %vm2642_vm14 = vcmp.eq.f32.partialorder %v2637_v39, 0.0 }
0x12c0   : > { %v5411_v40 = vpop.eup %5410 }
0x12c1   : > { %v2639_v41 = vmul.f32 %v5411_v40, %v2637_v39 }
0x12c3   : > { %v2641_v43 = vsel %vm2640_vm13, %v2637_v39, %v2639_v41 }
0x12c4   : > { %v2644_v44 = vsel %vm2642_vm14, %v2643_v42, %v2641_v43 }
0x12c5   : > { %v2652_v45 = vadd.f32 1e-06, %v2644_v44 }
0x12c7   : > { %5412 = vrcp.f32 %v2652_v45 }
0x12d4   : > { %v5413_v48 = vpop.eup %5412 }
0x12d5   : > { %v2654_v50 = vmul.f32 %v5413_v48, %v2651_v47 }
0x12d7   : > { %v6852_v51 = vadd.f32 %v4588_v49, %v2654_v50 }
0x12d9   : > { %v2666_v53 = vsel %vm1104_vm0, %v6852_v51, 0.0 }
0x12da   : > { %2667 = vadd.xlane.f32.xlu1 %v2666_v53 }
0x1363   : > { %v2668_v54 = vpop.xlane.xlu1 %2667 }
0x1364   : > { %v2669_v55 = vmul.f32 0.03125, %v2668_v54 }
0x1366   : > { %v2670_v56 = vsub.f32 %v6852_v51, %v2669_v55 }
0x1368   : > { %v2671_v57 = vmul.f32 %v2670_v56, %v2670_v56  ;;  %v2689_v52 = vmul.f32 %v4589_v5, %v2670_v56 }
0x136a   : > { %v2672_v58 = vsel %vm1104_vm0, %v2671_v57, 0.0 }
0x136b   : > { %2673 = vadd.xlane.f32.xlu0 %v2672_v58 }
0x13f4   : > { %v2674_v19 = vpop.xlane.xlu0 %2673 }
0x13f5   : > { %v2675_v61 = vmul.f32 0.032258064, %v2674_v19 }
0x13f7   : > { %5414 = vrsqrt.f32 %v2675_v61  ;;  %vm2678_vm15 = vcmp.eq.f32.partialorder %v2675_v61, inf  ;;  %v2681_v1 = vand.u32 2147483648, %v2675_v61  ;;  %vm2680_vm2 = vcmp.eq.f32.partialorder %v2675_v61, 0.0 }
0x1404   : > { %v5415_v62 = vpop.eup %5414 }
0x1405   : > { %v2677_v63 = vmul.f32 %v5415_v62, %v2675_v61 }
0x1407   : > { %v2679_v2 = vsel %vm2678_vm15, %v2675_v61, %v2677_v63 }
0x1408   : > { %v2682_v3 = vsel %vm2680_vm2, %v2681_v1, %v2679_v2 }
0x1409   : > { %v2690_v4 = vadd.f32 1e-06, %v2682_v3 }
0x140b   : > { %5416 = vrcp.f32 %v2690_v4 }
0x1418   : > { %v5417_v6 = vpop.eup %5416 }
0x1419   : > { %v2692_v9 = vmul.f32 %v5417_v6, %v2689_v52 }
0x141b   : > { %v2699_v10 = vadd.f32 %v4590_v7, %v2692_v9 }
0x141d   : > { %v2700_v11 = vpack.c.bf16 %v2699_v10, %v2699_v10 }
0x141f   : > { %4936 = vmatmul.mubr.msk.bf16.vlgmr.msra.gmra.mxu1 %vm1104_vm0, %v2700_v11 }
0x1420   : > { %4941 = vmatprep.mubr.msk.bf16.mxu1 %vm6088_vm1, %v6087_v8 }
0x14df   : > { %v2763_v13 = vpop.f32.mrf.mxu1 }
0x14e0   : > { %v2764_v14 = vadd.f32 %v4595_v12, %v2763_v13 }
0x14e1   : > { %v4937_v15 = vpop.f32.mrf.mxu1 }
0x14e2   : > { %v2769_v16 = vmul.f32 0.35355338, %v2764_v14  ;;  %v6869_v17 = vpack.c.bf16 %v2764_v14, %v2764_v14 }
0x14e3   : > { %v2766_v18 = vpop.f32.mrf.mxu1 }
0x14e4   : > { %2891 = vrot.lane.b32.xlu0 %v6869_v17, %s7272_s11  ;;  %2780 = vrot.lane.b32.xlu1 %v6869_v17, %s7273_s0  ;;  %v2777_v21 = vpack.c.bf16 %v2769_v16, %v2769_v16 }
0x14e5   : > { %v4938_v20 = vpop.f32.mrf.mxu1 }
0x14e8   : > { %2999 = vrot.lane.b32.xlu0 %v2777_v21, %s7279_s19  ;;  %2889 = vrot.lane.b32.xlu1 %v2777_v21, %s7280_s9 }
0x14ec   : > { %3109 = vrot.lane.b32.xlu0 %v2777_v21, %s7281_s12  ;;  %3001 = vrot.lane.b32.xlu1 %v6869_v17, %s7275_s15 }
0x14f0   : > { %3111 = vrot.lane.b32.xlu1 %v6869_v17, %s7274_s18 }
0x1556   : > { %v2781_v22 = vpop.permute.xlu1 %2780  ;;  %v2892_v24 = vpop.permute.xlu0 %2891 }
0x1557   : > { %v2786_v23 = vsel %vm1219_vm4, %v2781_v22, 0  ;;  %v2897_v26 = vsel %vm1219_vm4, %v2892_v24, 0 }
0x1558   : > { %4940 = vmatpush3.bf16.xpose.msra.mxu1 %v2786_v23 }
0x1559   : > { %4951 = vmatprep.subr.bf16.mxu1 %v6087_v8 }
0x155a   : > { %v2890_v25 = vpop.permute.xlu1 %2889  ;;  %v3000_v29 = vpop.permute.xlu0 %2999 }
0x155e   : > { %v3002_v27 = vpop.permute.xlu1 %3001  ;;  %v3110_v32 = vpop.permute.xlu0 %3109 }
0x155f   : > { %4942 = vmatmul.mubr.msk.bf16.vlgmr.msra.gmra.mxu1 %vm1219_vm4, %v2777_v21  ;;  %v3007_v28 = vsel %vm1219_vm4, %v3002_v27, 0 }
0x1560   : > { %4952 = vmatpush3.bf16.xpose.msra.mxu1 %v2897_v26  ;;  %4953 = vmatprep.mubr.msk.bf16.mxu1 %vm6088_vm1, %v6087_v8 }
0x1561   : > { %4963 = vmatprep.subr.bf16.mxu1 %v6087_v8 }
0x1562   : > { %v3112_v0 = vpop.permute.xlu1 %3111 }
0x1563   : > { %v3117_v31 = vsel %vm1219_vm4, %v3112_v0, 0 }
0x1567   : > { %4954 = vmatmul.mubr.msk.bf16.vlgmr.msra.gmra.mxu1 %vm1219_vm4, %v2890_v25 }
0x1568   : > { %4964 = vmatpush3.bf16.xpose.msra.mxu1 %v3007_v28  ;;  %4965 = vmatprep.mubr.msk.bf16.mxu1 %vm6088_vm1, %v6087_v8 }
0x1569   : > { %4975 = vmatprep.subr.bf16.mxu1 %v6087_v8 }
0x156f   : > { %4966 = vmatmul.mubr.msk.bf16.vlgmr.msra.gmra.mxu1 %vm1219_vm4, %v3000_v29 }
0x1570   : > { %4976 = vmatpush3.bf16.xpose.msra.mxu1 %v3117_v31  ;;  %4977 = vmatprep.mubr.msk.bf16.mxu1 %vm6088_vm1, %v6087_v8 }
0x1571   : > { %4987 = vmatprep.subr.bf16.mxu1 %v6087_v8 }
0x1577   : > { %4978 = vmatmul.mubr.msk.bf16.vlgmr.msra.gmra.mxu1 %vm1219_vm4, %v3110_v32 }
0x1578   : > { %4991 = vmatprep.mubr.msk.bf16.mxu1 %vm6088_vm1, %v6087_v8 }
0x161f   : > { %v2822_v34 = vpop.f32.mrf.mxu1 }
0x1620   : > { %v2823_v30 = vadd.f32 %v5462_v35, %v2822_v34 }
0x1621   : > { %v4943_v36 = vpop.f32.mrf.mxu1 }
0x1622   : > { %v2828_v37 = vsel %vm1219_vm4, %v2823_v30, -inf }
0x1623   : > { %2829 = vmax.xlane.f32.xlu1 %v2828_v37  ;;  %v2825_v38 = vpop.f32.mrf.mxu1 }
0x1625   : > { %v4944_v39 = vpop.f32.mrf.mxu1 }
0x1627   : > { %v2933_v40 = vpop.f32.mrf.mxu1 }
0x1628   : > { %v2934_v41 = vadd.f32 %v5462_v35, %v2933_v40 }
0x1629   : > { %v4955_v42 = vpop.f32.mrf.mxu1 }
0x162a   : > { %v2939_v43 = vsel %vm1219_vm4, %v2934_v41, -inf }
0x162b   : > { %2940 = vmax.xlane.f32.xlu0 %v2939_v43  ;;  %v2936_v44 = vpop.f32.mrf.mxu1 }
0x162d   : > { %v4956_v45 = vpop.f32.mrf.mxu1 }
0x162f   : > { %v3043_v46 = vpop.f32.mrf.mxu1 }
0x1630   : > { %v3044_v47 = vadd.f32 %v5462_v35, %v3043_v46 }
0x1631   : > { %v4967_v48 = vpop.f32.mrf.mxu1 }
0x1632   : > { %v3049_v49 = vsel %vm1219_vm4, %v3044_v47, -inf }
0x1633   : > { %3050 = vmax.xlane.f32.xlu0 %v3049_v49  ;;  %v3046_v50 = vpop.f32.mrf.mxu1  ;;  %v5352_v49 = vld [vmem:[%s7269_s13 + $0x18] sm:$0xff]  }
0x1634   : > { %4988 = vmatpush3.bf16.msra.mxu1 %v5352_v49  ;;  %v5353_v50 = vld [vmem:[%s7269_s13 + $0x10] sm:$0xff]  }
0x1635   : > { %v4968_v53 = vpop.f32.mrf.mxu1  ;;  %4989 = vmatprep.subr.bf16.mxu1 %v6087_v8 }
0x1637   : > { %v3153_v54 = vpop.f32.mrf.mxu1 }
0x1638   : > { %v3154_v55 = vadd.f32 %v5462_v35, %v3153_v54  ;;  %4990 = vmatpush3.bf16.msra.mxu1 %v5353_v50 }
0x1639   : > { %v4979_v56 = vpop.f32.mrf.mxu1  ;;  %5003 = vmatprep.subr.bf16.mxu1 %v6087_v8 }
0x163a   : > { %v3159_v57 = vsel %vm1219_vm4, %v3154_v55, -inf }
0x163b   : > { %3160 = vmax.xlane.f32.xlu1 %v3159_v57  ;;  %v3156_v58 = vpop.f32.mrf.mxu1 }
0x163d   : > { %v4980_v59 = vpop.f32.mrf.mxu1 }
0x16ac   : > { %v2830_v60 = vpop.xlane.xlu1 %2829 }
0x16ad   : > { %v2831_v19 = vsub.f32 %v2823_v30, %v2830_v60 }
0x16af   : > { %v2832_v61 = vmul.f32 1.442695, %v2831_v19 }
0x16b1   : > { %5418 = vpow2.f32 %v2832_v61 }
0x16b4   : > { %v2941_v62 = vpop.xlane.xlu0 %2940 }
0x16b5   : > { %v2942_v63 = vsub.f32 %v2934_v41, %v2941_v62 }
0x16b7   : > { %v2943_v1 = vmul.f32 1.442695, %v2942_v63 }
0x16b9   : > { %5420 = vpow2.f32 %v2943_v1 }
0x16bc   : > { %v3051_v2 = vpop.xlane.xlu0 %3050 }
0x16bd   : > { %v3052_v3 = vsub.f32 %v3044_v47, %v3051_v2 }
0x16be   : > { %v5419_v4 = vpop.eup %5418 }
0x16bf   : > { %v3053_v5 = vmul.f32 1.442695, %v3052_v3  ;;  %v2834_v52 = vsel %vm1219_vm4, %v5419_v4, 0.0 }
0x16c0   : > { %2835 = vadd.xlane.f32.xlu0 %v2834_v52 }
0x16c1   : > { %5422 = vpow2.f32 %v3053_v5 }
0x16c4   : > { %v3161_v11 = vpop.xlane.xlu1 %3160 }
0x16c5   : > { %v3162_v12 = vsub.f32 %v3154_v55, %v3161_v11 }
0x16c6   : > { %v5421_v6 = vpop.eup %5420 }
0x16c7   : > { %v2945_v7 = vsel %vm1219_vm4, %v5421_v6, 0.0  ;;  %v3163_v13 = vmul.f32 1.442695, %v3162_v12 }
0x16c8   : > { %2946 = vadd.xlane.f32.xlu1 %v2945_v7 }
0x16c9   : > { %5424 = vpow2.f32 %v3163_v13 }
0x16ce   : > { %v5423_v9 = vpop.eup %5422 }
0x16cf   : > { %v3055_v10 = vsel %vm1219_vm4, %v5423_v9, 0.0 }
0x16d0   : > { %3056 = vadd.xlane.f32.xlu0 %v3055_v10 }
0x16d6   : > { %v5425_v14 = vpop.eup %5424 }
0x16d7   : > { %v3165_v15 = vsel %vm1219_vm4, %v5425_v14, 0.0 }
0x16d9   : > { %2951 = vrot.lane.b32.xlu1 %v6869_v17, %s7282_s20 }
0x16e6   : > { %2840 = vrot.lane.b32.xlu0 %v6869_v17, %s7283_s14  ;;  %s7288_s14 = sld [smem:[#allocation69_spill]] }
0x16ea   : > { %3171 = vrot.lane.b32.xlu0 %v6869_v17, %s7284_s16 }
0x16fd   : > { %3166 = vadd.xlane.f32.xlu1 %v3165_v15 }
0x170e   : > { %3061 = vrot.lane.b32.xlu1 %v6869_v17, %s7285_s21  ;;  %s7286_s21 = smov 8  }
0x1749   : > { %v2836_v16 = vpop.xlane.xlu0 %2835 }
0x174a   : > { %5426 = vrcp.f32 %v2836_v16 }
0x1751   : > { %v2947_v18 = vpop.xlane.xlu1 %2946 }
0x1752   : > { %5428 = vrcp.f32 %v2947_v18  ;;  %v5354_v18 = vld [vmem:[#allocation16 + $0x18] sm:$0xff]  }
0x1755   : > { %v2952_v25 = vpop.permute.xlu1 %2951 }
0x1756   : > { %v2957_v28 = vsel %vm1283_vm5, %v2952_v25, 0 }
0x1757   : > { %v5427_v20 = vpop.eup %5426 }
0x1758   : > { %v2838_v22 = vmul.f32 %v5427_v20, %v5419_v4  ;;  %v4611_v4 = vld [vmem:[#allocation10 + $0x1] ss:$0 sm:$0xff]  ;;  %v5355_v20 = vld [vmem:[#allocation16 + $0x10] sm:$0xff]  }
0x1759   : > { %v3057_v21 = vpop.xlane.xlu0 %3056 }
0x175a   : > { %v2839_v26 = vpack.c.bf16 %v2838_v22, %v2838_v22  ;;  %5430 = vrcp.f32 %v3057_v21  ;;  %v5357_v21 = vld [vmem:[%s7270_s26 + $0x10] sm:$0xff]  }
0x175d   : > { %v2841_v23 = vpop.permute.xlu0 %2840 }
0x175e   : > { %v2846_v24 = vsel %vm1283_vm5, %v2841_v23, 0 }
0x175f   : > { %4946 = vmatpush3.bf16.msra.mxu0 %v2846_v24  ;;  %v5429_v27 = vpop.eup %5428 }
0x1760   : > { %4957 = vmatprep.subr.bf16.mxu0 %v6087_v8  ;;  %v2949_v17 = vmul.f32 %v5429_v27, %v5421_v6 }
0x1761   : > { %v3172_v30 = vpop.permute.xlu0 %3171 }
0x1762   : > { %4948 = vmatmul.mubr.msk.bf16.vlgmr.msra.gmra.mxu0 %vm1219_vm4, %v2839_v26  ;;  %v2950_v0 = vpack.c.bf16 %v2949_v17, %v2949_v17  ;;  %v3177_v37 = vsel %vm1283_vm5, %v3172_v30, 0  ;;  %v4625_v30 = vld [vmem:[#allocation17 + $0x1] ss:$0 sm:$0xff] }
0x1763   : > { %4958 = vmatpush3.bf16.msra.mxu0 %v2957_v28  ;;  %4959 = vmatprep.mubr.msk.bf16.mxu0 %vm6088_vm1, %v6087_v8 }
0x1764   : > { %4969 = vmatprep.subr.bf16.mxu0 %v6087_v8 }
0x1767   : > { %v5431_v29 = vpop.eup %5430 }
0x1768   : > { %v3059_v32 = vmul.f32 %v5431_v29, %v5423_v9 }
0x176a   : > { %4960 = vmatmul.mubr.msk.bf16.vlgmr.msra.gmra.mxu0 %vm1219_vm4, %v2950_v0  ;;  %v3060_v36 = vpack.c.bf16 %v3059_v32, %v3059_v32  ;;  %v4615_v0 = vld [vmem:[#allocation11 + $0x1] ss:$0 sm:$0xff] }
0x176b   : > { %4971 = vmatprep.mubr.msk.bf16.mxu0 %vm6088_vm1, %v6087_v8 }
0x1786   : > { %v3167_v31 = vpop.xlane.xlu1 %3166 }
0x1787   : > { %5432 = vrcp.f32 %v3167_v31  ;;  %v4616_v31 = vld [vmem:[#allocation13 + $0x1] ss:$0 sm:$0xff] }
0x178a   : > { %v3062_v34 = vpop.permute.xlu1 %3061 }
0x178b   : > { %v3067_v35 = vsel %vm1283_vm5, %v3062_v34, 0 }
0x178c   : > { %4970 = vmatpush3.bf16.msra.mxu0 %v3067_v35 }
0x178d   : > { %4981 = vmatprep.subr.bf16.mxu0 %v6087_v8 }
0x178f   : > { %4972 = vmatmul.mubr.msk.bf16.vlgmr.msra.gmra.mxu0 %vm1219_vm4, %v3060_v36 }
0x1790   : > { %4982 = vmatpush3.bf16.msra.mxu0 %v3177_v37  ;;  %4983 = vmatprep.mubr.msk.bf16.mxu0 %vm6088_vm1, %v6087_v8 }
0x1791   : > { %4995 = vmatprep.subr.bf16.mxu0 %v6087_v8 }
0x1794   : > { %v5433_v38 = vpop.eup %5432 }
0x1795   : > { %v3169_v39 = vmul.f32 %v5433_v38, %v5425_v14 }
0x1797   : > { %v3170_v40 = vpack.c.bf16 %v3169_v39, %v3169_v39 }
0x1799   : > { %4984 = vmatmul.mubr.msk.bf16.vlgmr.msra.gmra.mxu0 %vm1219_vm4, %v3170_v40 }
0x179a   : > { %4999 = vmatprep.mubr.msk.bf16.mxu0 %vm6088_vm1, %v6087_v8 }
0x1822   : > { %v2882_v41 = vpop.f32.mrf.mxu0 }
0x1824   : > { %v4949_v42 = vpop.f32.mrf.mxu0 }
0x1826   : > { %v2885_v43 = vpop.f32.mrf.mxu0 }
0x1827   : > { %v4621_v43 = vld [vmem:[#allocation14 + $0x1] ss:$0 sm:$0xff] }
0x1828   : > { %v4950_v44 = vpop.f32.mrf.mxu0 }
0x182a   : > { %v2993_v45 = vpop.f32.mrf.mxu0 }
0x182b   : > { %3220 = vrot.lane.b32.xlu1 %v2993_v45, %s7286_s21 }
0x182c   : > { %v4961_v46 = vpop.f32.mrf.mxu0 }
0x182e   : > { %v2996_v47 = vpop.f32.mrf.mxu0 }
0x1830   : > { %v4962_v48 = vpop.f32.mrf.mxu0 }
0x184f   : > { %v3103_v53 = vpop.f32.mrf.mxu0 }
0x1850   : > { %3224 = vrot.lane.b32.xlu0 %v3103_v53, %s7276_s6 }
0x1851   : > { %v4973_v54 = vpop.f32.mrf.mxu0 }
0x1853   : > { %v3106_v55 = vpop.f32.mrf.mxu0 }
0x1855   : > { %v4974_v56 = vpop.f32.mrf.mxu0 }
0x1859   : > { %v3213_v57 = vpop.f32.mrf.mxu0 }
0x185a   : > { %3228 = vrot.lane.b32.xlu1 %v3213_v57, %s7277_s22 }
0x185b   : > { %v4985_v58 = vpop.f32.mrf.mxu0 }
0x185d   : > { %v3216_v59 = vpop.f32.mrf.mxu0 }
0x185f   : > { %v4986_v60 = vpop.f32.mrf.mxu0 }
0x189d   : > { %v3221_v19 = vpop.permute.xlu1 %3220 }
0x189e   : > { %v3231_v62 = vsel %vm1219_vm4, %v2882_v41, %v3221_v19 }
0x18c2   : > { %v3225_v61 = vpop.permute.xlu0 %3224 }
0x18c3   : > { %v3232_v63 = vsel %vm1671_vm6, %v3231_v62, %v3225_v61  ;;  %v5463_v62 = vld [vmem:[%s6768_s17] ss:$0 sm:$0xff]  ;;  %s4214_s17 = scalar_lea.sflag [#allocation4], %s6537_s5 }
0x18cc   : > { %v3229_v1 = vpop.permute.xlu1 %3228 }
0x18cd   : > { %v3233_v2 = vsel %vm1673_vm7, %v3232_v63, %v3229_v1 }
0x18ce   : > { %v3234_v3 = vpack.c.bf16 %v3233_v2, %v3233_v2 }
0x18d0   : > { %4992 = vmatmul.mubr.msk.bf16.vlgmr.msra.gmra.mxu1 %vm1104_vm0, %v3234_v3 }
0x18d1   : > { %5007 = vmatprep.mubr.msk.bf16.mxu1 %vm6088_vm1, %v6087_v8  ;;  %5004 = vmatpush3.bf16.msra.mxu1 %v5354_v18 }
0x18d2   : > { %5005 = vmatprep.subr.bf16.mxu1 %v6087_v8 }
0x18d5   : > { %5006 = vmatpush3.bf16.msra.mxu1 %v5355_v20 }
0x18d6   : > { %5017 = vmatprep.subr.bf16.mxu1 %v6087_v8 }
0x18d8   : > { %5008 = vmatmul.mubr.msk.bf16.vlgmr.msra.gmra.mxu1 %vm1104_vm0, %v6721_v33 }
0x18d9   : > { %5019 = vmatprep.mubr.msk.bf16.mxu1 %vm6088_vm1, %v6087_v8 }
0x1990   : > { %v3290_v5 = vpop.f32.mrf.mxu1 }
0x1991   : > { %v3291_v52 = vadd.f32 %v4611_v4, %v3290_v5 }
0x1992   : > { %v4993_v6 = vpop.f32.mrf.mxu1 }
0x1993   : > { %v6959_v7 = vadd.f32 %v3291_v52, %v6852_v51  ;;  %v5356_v51 = vld [vmem:[%s7270_s26 + $0x18] sm:$0xff]  }
0x1994   : > { %v3293_v9 = vpop.f32.mrf.mxu1  ;;  %4996 = vmatpush3.bf16.msra.mxu0 %v5356_v51 }
0x1995   : > { %v3301_v10 = vsel %vm1104_vm0, %v6959_v7, 0.0  ;;  %4997 = vmatprep.subr.bf16.mxu0 %v6087_v8 }
0x1996   : > { %3302 = vadd.xlane.f32.xlu0 %v3301_v10  ;;  %v4994_v11 = vpop.f32.mrf.mxu1 }
0x1998   : > { %4998 = vmatpush3.bf16.msra.mxu0 %v5357_v21  ;;  %v3464_v36 = vpop.f32.mrf.mxu1 }
0x1999   : > { %5011 = vmatprep.subr.bf16.mxu0 %v6087_v8  ;;  %v3465_v37 = vadd.f32 %v4625_v30, %v3464_v36 }
0x199a   : > { %v5009_v38 = vpop.f32.mrf.mxu1 }
0x199b   : > { %v6982_v39 = vpack.c.bf16 %v3465_v37, %v3465_v37 }
0x199c   : > { %v3467_v40 = vpop.f32.mrf.mxu1 }
0x199d   : > { %v3483_v42 = vsel %vm1219_vm4, %v6982_v39, 0 }
0x199e   : > { %v5010_v41 = vpop.f32.mrf.mxu1 }
0x19ac   : > { %3589 = vrot.lane.b32.xlu0 %v6982_v39, %s7280_s9 }
0x19b0   : > { %3699 = vrot.lane.b32.xlu0 %v6982_v39, %s7279_s19 }
0x19b4   : > { %3809 = vrot.lane.b32.xlu0 %v6982_v39, %s7281_s12 }
0x1a1f   : > { %v3303_v12 = vpop.xlane.xlu0 %3302 }
0x1a20   : > { %v3304_v13 = vmul.f32 0.03125, %v3303_v12 }
0x1a22   : > { %v3305_v14 = vsub.f32 %v6959_v7, %v3304_v13 }
0x1a23   : > { %v3590_v49 = vpop.permute.xlu0 %3589 }
0x1a24   : > { %v3306_v15 = vmul.f32 %v3305_v14, %v3305_v14  ;;  %v3324_v29 = vmul.f32 %v4615_v0, %v3305_v14  ;;  %v3595_v53 = vsel %vm1219_vm4, %v3590_v49, 0 }
0x1a26   : > { %v3307_v16 = vsel %vm1104_vm0, %v3306_v15, 0.0 }
0x1a27   : > { %3308 = vadd.xlane.f32.xlu1 %v3307_v16  ;;  %v3700_v55 = vpop.permute.xlu0 %3699 }
0x1a28   : > { %v3705_v57 = vsel %vm1219_vm4, %v3700_v55, 0 }
0x1a2b   : > { %v3810_v58 = vpop.permute.xlu0 %3809 }
0x1a2c   : > { %v3815_v60 = vsel %vm1219_vm4, %v3810_v58, 0 }
0x1ab0   : > { %v3309_v22 = vpop.xlane.xlu1 %3308 }
0x1ab1   : > { %v3310_v23 = vmul.f32 0.032258064, %v3309_v22 }
0x1ab3   : > { %5434 = vrsqrt.f32 %v3310_v23  ;;  %vm3313_vm3 = vcmp.eq.f32.partialorder %v3310_v23, inf  ;;  %v3316_v26 = vand.u32 2147483648, %v3310_v23  ;;  %vm3315_vm8 = vcmp.eq.f32.partialorder %v3310_v23, 0.0 }
0x1ac0   : > { %v5435_v24 = vpop.eup %5434 }
0x1ac1   : > { %v3312_v25 = vmul.f32 %v5435_v24, %v3310_v23 }
0x1ac3   : > { %v3314_v27 = vsel %vm3313_vm3, %v3310_v23, %v3312_v25 }
0x1ac4   : > { %v3317_v28 = vsel %vm3315_vm8, %v3316_v26, %v3314_v27 }
0x1ac5   : > { %v3325_v17 = vadd.f32 1e-06, %v3317_v28 }
0x1ac7   : > { %5436 = vrcp.f32 %v3325_v17 }
0x1ad4   : > { %v5437_v33 = vpop.eup %5436 }
0x1ad5   : > { %v3327_v32 = vmul.f32 %v5437_v33, %v3324_v29 }
0x1ad7   : > { %v3334_v34 = vadd.f32 %v4616_v31, %v3327_v32 }
0x1ad9   : > { %v3335_v35 = vpack.c.bf16 %v3334_v34, %v3334_v34 }
0x1adb   : > { %5000 = vmatmul.mubr.msk.bf16.vlgmr.msra.gmra.mxu0 %vm1104_vm0, %v3335_v35 }
0x1adc   : > { %5013 = vmatprep.mubr.msk.bf16.mxu0 %vm6088_vm1, %v6087_v8  ;;  %5012 = vmatpush3.bf16.xpose.msra.mxu0 %v3483_v42 }
0x1add   : > { %5023 = vmatprep.subr.bf16.mxu0 %v6087_v8 }
0x1b9b   : > { %v3398_v44 = vpop.f32.mrf.mxu0 }
0x1b9c   : > { %v3399_v45 = vadd.f32 %v4621_v43, %v3398_v44 }
0x1b9d   : > { %v5001_v46 = vpop.f32.mrf.mxu0 }
0x1b9e   : > { %v3404_v47 = vmul.f32 0.35355338, %v3399_v45 }
0x1b9f   : > { %v3401_v48 = vpop.f32.mrf.mxu0 }
0x1ba0   : > { %v3477_v50 = vpack.c.bf16 %v3404_v47, %v3404_v47 }
0x1ba1   : > { %v5002_v54 = vpop.f32.mrf.mxu0 }
0x1ba2   : > { %3587 = vrot.lane.b32.xlu1 %v3477_v50, %s7280_s9  ;;  %5014 = vmatmul.mubr.msk.bf16.vlgmr.msra.gmra.mxu0 %vm1219_vm4, %v3477_v50  ;;  %s4662_s9 = sshll.u32 %s6260_s29, 7  ;;  %s6103_s29 = smov [#allocation32]  }
0x1ba3   : > { %5024 = vmatpush3.bf16.xpose.msra.mxu0 %v3595_v53  ;;  %5025 = vmatprep.mubr.msk.bf16.mxu0 %vm6088_vm1, %v6087_v8 }
0x1ba4   : > { %5035 = vmatprep.subr.bf16.mxu0 %v6087_v8 }
0x1ba6   : > { %3697 = vrot.lane.b32.xlu1 %v3477_v50, %s7279_s19 }
0x1baa   : > { %3807 = vrot.lane.b32.xlu1 %v3477_v50, %s7281_s12  ;;  %s7287_s12 = sshll.u32 %s6537_s5, 3 }
0x1c14   : > { %v3588_v56 = vpop.permute.xlu1 %3587 }
0x1c15   : > { %5026 = vmatmul.mubr.msk.bf16.vlgmr.msra.gmra.mxu0 %vm1219_vm4, %v3588_v56 }
0x1c16   : > { %5036 = vmatpush3.bf16.xpose.msra.mxu0 %v3705_v57  ;;  %5037 = vmatprep.mubr.msk.bf16.mxu0 %vm6088_vm1, %v6087_v8 }
0x1c17   : > { %5047 = vmatprep.subr.bf16.mxu0 %v6087_v8 }
0x1c18   : > { %v3698_v59 = vpop.permute.xlu1 %3697 }
0x1c1c   : > { %v3808_v19 = vpop.permute.xlu1 %3807 }
0x1c1d   : > { %5038 = vmatmul.mubr.msk.bf16.vlgmr.msra.gmra.mxu0 %vm1219_vm4, %v3698_v59 }
0x1c1e   : > { %5048 = vmatpush3.bf16.xpose.msra.mxu0 %v3815_v60  ;;  %5049 = vmatprep.mubr.msk.bf16.mxu0 %vm6088_vm1, %v6087_v8 }
0x1c1f   : > { %5059 = vmatprep.subr.bf16.mxu0 %v6087_v8 }
0x1c25   : > { %5050 = vmatmul.mubr.msk.bf16.vlgmr.msra.gmra.mxu0 %vm1219_vm4, %v3808_v19 }
0x1c26   : > { %5063 = vmatprep.mubr.msk.bf16.mxu0 %vm6088_vm1, %v6087_v8 }
0x1c62   : > { %v3519_v61 = vpop.f32.mrf.mxu0 }
0x1c63   : > { %v3520_v63 = vadd.f32 %v5463_v62, %v3519_v61 }
0x1c64   : > { %v5015_v1 = vpop.f32.mrf.mxu0 }
0x1c65   : > { %v3525_v2 = vsel %vm1219_vm4, %v3520_v63, -inf }
0x1c66   : > { %3526 = vmax.xlane.f32.xlu0 %v3525_v2  ;;  %v3522_v3 = vpop.f32.mrf.mxu0 }
0x1c68   : > { %v5016_v4 = vpop.f32.mrf.mxu0 }
0x1cd5   : > { %v3631_v5 = vpop.f32.mrf.mxu0 }
0x1cd6   : > { %v3632_v52 = vadd.f32 %v5463_v62, %v3631_v5 }
0x1cd7   : > { %v5027_v6 = vpop.f32.mrf.mxu0 }
0x1cd8   : > { %v3637_v9 = vsel %vm1219_vm4, %v3632_v52, -inf }
0x1cd9   : > { %3638 = vmax.xlane.f32.xlu1 %v3637_v9  ;;  %v3634_v10 = vpop.f32.mrf.mxu0 }
0x1cda   : > { %v5358_v10 = vld [vmem:[#allocation19 + $0x18] sm:$0xff]  }
0x1cdb   : > { %v5028_v11 = vpop.f32.mrf.mxu0  ;;  %5060 = vmatpush3.bf16.msra.mxu0 %v5358_v10 }
0x1cdc   : > { %5061 = vmatprep.subr.bf16.mxu0 %v6087_v8 }
0x1cdd   : > { %v3741_v12 = vpop.f32.mrf.mxu0 }
0x1cde   : > { %v3742_v13 = vadd.f32 %v5463_v62, %v3741_v12 }
0x1cdf   : > { %v5039_v14 = vpop.f32.mrf.mxu0 }
0x1ce0   : > { %v3747_v15 = vsel %vm1219_vm4, %v3742_v13, -inf }
0x1ce1   : > { %3748 = vmax.xlane.f32.xlu0 %v3747_v15  ;;  %v3744_v16 = vpop.f32.mrf.mxu0 }
0x1ce3   : > { %v5040_v18 = vpop.f32.mrf.mxu0 }
0x1ce5   : > { %v3851_v20 = vpop.f32.mrf.mxu0 }
0x1ce6   : > { %v3852_v51 = vadd.f32 %v5463_v62, %v3851_v20 }
0x1ce7   : > { %v5051_v21 = vpop.f32.mrf.mxu0 }
0x1ce8   : > { %v3857_v22 = vsel %vm1219_vm4, %v3852_v51, -inf }
0x1ce9   : > { %3858 = vmax.xlane.f32.xlu0 %v3857_v22  ;;  %v3854_v23 = vpop.f32.mrf.mxu0 }
0x1ceb   : > { %v5052_v24 = vpop.f32.mrf.mxu0 }
0x1cef   : > { %v3527_v25 = vpop.xlane.xlu0 %3526 }
0x1cf0   : > { %v3528_v26 = vsub.f32 %v3520_v63, %v3527_v25 }
0x1cf2   : > { %v3529_v27 = vmul.f32 1.442695, %v3528_v26 }
0x1cf4   : > { %5438 = vpow2.f32 %v3529_v27 }
0x1d01   : > { %v5439_v28 = vpop.eup %5438 }
0x1d02   : > { %v3531_v17 = vsel %vm1219_vm4, %v5439_v28, 0.0 }
0x1d03   : > { %3532 = vadd.xlane.f32.xlu1 %v3531_v17 }
0x1d14   : > { %3538 = vrot.lane.b32.xlu1 %v6982_v39, %s7273_s0  ;;  %s5966_s0 = sshll.u32 %s6103_s29, 4  ;;  %s5967_s0 = int_to_ptr.vmem [resolvable:$false] %s5966_s0 }
0x1d62   : > { %v3639_v0 = vpop.xlane.xlu1 %3638 }
0x1d63   : > { %v3640_v29 = vsub.f32 %v3632_v52, %v3639_v0 }
0x1d65   : > { %v3641_v33 = vmul.f32 1.442695, %v3640_v29 }
0x1d67   : > { %5440 = vpow2.f32 %v3641_v33  ;;  %v4637_v33 = vld [vmem:[#allocation20 + $0x1] ss:$0 sm:$0xff] }
0x1d6a   : > { %v3749_v31 = vpop.xlane.xlu0 %3748 }
0x1d6b   : > { %v3750_v32 = vsub.f32 %v3742_v13, %v3749_v31  ;;  %v5359_v13 = vld [vmem:[#allocation19 + $0x10] sm:$0xff]  }
0x1d6c   : > { %5062 = vmatpush3.bf16.msra.mxu0 %v5359_v13 }
0x1d6d   : > { %v3751_v34 = vmul.f32 1.442695, %v3750_v32  ;;  %5075 = vmatprep.subr.bf16.mxu0 %v6087_v8 }
0x1d6f   : > { %5442 = vpow2.f32 %v3751_v34 }
0x1d72   : > { %v3859_v35 = vpop.xlane.xlu0 %3858 }
0x1d73   : > { %v3860_v30 = vsub.f32 %v3852_v51, %v3859_v35 }
0x1d74   : > { %v5441_v36 = vpop.eup %5440 }
0x1d75   : > { %v3861_v37 = vmul.f32 1.442695, %v3860_v30  ;;  %v3643_v38 = vsel %vm1219_vm4, %v5441_v36, 0.0 }
0x1d76   : > { %3644 = vadd.xlane.f32.xlu0 %v3643_v38 }
0x1d77   : > { %5444 = vpow2.f32 %v3861_v37 }
0x1d7c   : > { %v5443_v40 = vpop.eup %5442 }
0x1d7d   : > { %v3753_v41 = vsel %vm1219_vm4, %v5443_v40, 0.0 }
0x1d7e   : > { %3754 = vadd.xlane.f32.xlu1 %v3753_v41 }
0x1d84   : > { %v5445_v42 = vpop.eup %5444 }
0x1d85   : > { %v3863_v43 = vsel %vm1219_vm4, %v5445_v42, 0.0 }
0x1d86   : > { %3864 = vadd.xlane.f32.xlu0 %v3863_v43 }
0x1d8c   : > { %v3533_v44 = vpop.xlane.xlu1 %3532 }
0x1d8d   : > { %5446 = vrcp.f32 %v3533_v44  ;;  %v5360_v44 = vld [vmem:[#allocation25 + $0x18] sm:$0xff]  }
0x1d8f   : > { %3759 = vrot.lane.b32.xlu1 %v6982_v39, %s7275_s15 }
0x1d90   : > { %v3539_v45 = vpop.permute.xlu1 %3538 }
0x1d91   : > { %v3544_v46 = vsel %vm1283_vm5, %v3539_v45, 0  ;;  %v5361_v45 = vld [vmem:[#allocation25 + $0x10] sm:$0xff]  }
0x1d92   : > { %5018 = vmatpush3.bf16.msra.mxu1 %v3544_v46  ;;  %v5363_v46 = vld [vmem:[%s7278_s1 + $0x30] sm:$0xff]  }
0x1d93   : > { %3869 = vrot.lane.b32.xlu1 %v6982_v39, %s7274_s18  ;;  %5029 = vmatprep.subr.bf16.mxu1 %v6087_v8  ;;  %s5968_s18 = scalar_lea.vmem %s5967_s0, 256 }
0x1d9a   : > { %v5447_v47 = vpop.eup %5446 }
0x1d9b   : > { %v3535_v48 = vmul.f32 %v5447_v47, %v5439_v28 }
0x1d9c   : > { %3649 = vrot.lane.b32.xlu0 %v6982_v39, %s7272_s11 }
0x1d9d   : > { %v3536_v49 = vpack.c.bf16 %v3535_v48, %v3535_v48 }
0x1d9f   : > { %5020 = vmatmul.mubr.msk.bf16.vlgmr.msra.gmra.mxu1 %vm1219_vm4, %v3536_v49 }
0x1da0   : > { %5031 = vmatprep.mubr.msk.bf16.mxu1 %vm6088_vm1, %v6087_v8 }
0x1dff   : > { %v3645_v50 = vpop.xlane.xlu0 %3644 }
0x1e00   : > { %5448 = vrcp.f32 %v3645_v50 }
0x1e07   : > { %v3755_v53 = vpop.xlane.xlu1 %3754 }
0x1e08   : > { %5450 = vrcp.f32 %v3755_v53 }
0x1e0b   : > { %v3760_v59 = vpop.permute.xlu1 %3759 }
0x1e0c   : > { %v3765_v19 = vsel %vm1283_vm5, %v3760_v59, 0 }
0x1e0d   : > { %v5449_v54 = vpop.eup %5448 }
0x1e0e   : > { %v3647_v56 = vmul.f32 %v5449_v54, %v5441_v36 }
0x1e0f   : > { %v3865_v55 = vpop.xlane.xlu0 %3864  ;;  %v3870_v62 = vpop.permute.xlu1 %3869 }
0x1e10   : > { %5452 = vrcp.f32 %v3865_v55  ;;  %v3648_v39 = vpack.c.bf16 %v3647_v56, %v3647_v56  ;;  %v3875_v2 = vsel %vm1283_vm5, %v3870_v62, 0  ;;  %v5364_v62 = vld [vmem:[%s7278_s1 + $0x28] sm:$0xff]  }
0x1e13   : > { %v3650_v57 = vpop.permute.xlu0 %3649 }
0x1e14   : > { %v3655_v58 = vsel %vm1283_vm5, %v3650_v57, 0  ;;  %v4641_v57 = vld [vmem:[#allocation22 + $0x1] ss:$0 sm:$0xff] }
0x1e15   : > { %5030 = vmatpush3.bf16.msra.mxu1 %v3655_v58  ;;  %v5451_v60 = vpop.eup %5450 }
0x1e16   : > { %5041 = vmatprep.subr.bf16.mxu1 %v6087_v8  ;;  %v3757_v61 = vmul.f32 %v5451_v60, %v5443_v40 }
0x1e18   : > { %5032 = vmatmul.mubr.msk.bf16.vlgmr.msra.gmra.mxu1 %vm1219_vm4, %v3648_v39  ;;  %v3758_v63 = vpack.c.bf16 %v3757_v61, %v3757_v61  ;;  %v4642_v39 = vld [vmem:[#allocation23 + $0x1] ss:$0 sm:$0xff] }
0x1e19   : > { %5042 = vmatpush3.bf16.msra.mxu1 %v3765_v19  ;;  %5043 = vmatprep.mubr.msk.bf16.mxu1 %vm6088_vm1, %v6087_v8 }
0x1e1a   : > { %5053 = vmatprep.subr.bf16.mxu1 %v6087_v8 }
0x1e1d   : > { %v5453_v1 = vpop.eup %5452 }
0x1e1e   : > { %v3867_v3 = vmul.f32 %v5453_v1, %v5445_v42  ;;  %v4643_v1 = vld [vmem:[#allocation26 + $0x1] ss:$0 sm:$0xff] }
0x1e20   : > { %5044 = vmatmul.mubr.msk.bf16.vlgmr.msra.gmra.mxu1 %vm1219_vm4, %v3758_v63  ;;  %v3868_v4 = vpack.c.bf16 %v3867_v3, %v3867_v3  ;;  %v5365_v63 = vld [vmem:[%s7278_s1 + $0x20] sm:$0xff]  }
0x1e21   : > { %5054 = vmatpush3.bf16.msra.mxu1 %v3875_v2  ;;  %5055 = vmatprep.mubr.msk.bf16.mxu1 %vm6088_vm1, %v6087_v8 }
0x1e22   : > { %5067 = vmatprep.subr.bf16.mxu1 %v6087_v8 }
0x1e28   : > { %5056 = vmatmul.mubr.msk.bf16.vlgmr.msra.gmra.mxu1 %vm1219_vm4, %v3868_v4 }
0x1e29   : > { %5071 = vmatprep.mubr.msk.bf16.mxu1 %vm6088_vm1, %v6087_v8  ;;  %5068 = vmatpush3.bf16.msra.mxu1 %v5360_v44 }
0x1e2a   : > { %5069 = vmatprep.subr.bf16.mxu1 %v6087_v8 }
0x1e2d   : > { %5070 = vmatpush3.bf16.msra.mxu1 %v5361_v45 }
0x1e5f   : > { %v3580_v5 = vpop.f32.mrf.mxu1 }
0x1e61   : > { %v5021_v52 = vpop.f32.mrf.mxu1 }
0x1e63   : > { %v3583_v6 = vpop.f32.mrf.mxu1 }
0x1e65   : > { %v5022_v9 = vpop.f32.mrf.mxu1 }
0x1ed8   : > { %v3691_v11 = vpop.f32.mrf.mxu1 }
0x1ed9   : > { %3918 = vrot.lane.b32.xlu0 %v3691_v11, %s7286_s21  ;;  %v4660_v11 = vld [vmem:[#allocation28 + $0x1] ss:$0 sm:$0xff]  ;;  %s1087_s21 = scalar_lea.vmem [#allocation32], %s7287_s12 }
0x1eda   : > { %v5033_v12 = vpop.f32.mrf.mxu1  ;;  %s4227_s23 = sshll.u32 %s1087_s21, 4  ;;  %s4228_s23 = int_to_ptr.vmem [resolvable:$true] %s4227_s23 }
0x1edb   : > { %s5962_s11 = scalar_lea.vmem %s4228_s23, 128  ;;  %p5969_p13 = scmp.lt.s32.totalorder %s4228_s23, %s5967_s0 }
0x1edc   : > { %v3694_v14 = vpop.f32.mrf.mxu1  ;;  %p5963_p7 = scmp.ne.s32.totalorder %s4228_s23, %s5962_s11  ;;  %p5970_p2 = scmp.lt.s32.totalorder %s5968_s18, %s5962_s11 }
0x1ede   : > { %v5034_v15 = vpop.f32.mrf.mxu1  ;;  %p5964_p0 = pnand %p5963_p7, %p7289_p10  ;;  %p5971_p11 = por %p5970_p2, %p5969_p13 }
0x1ee0   : > { %v3801_v16 = vpop.f32.mrf.mxu1  ;;  %p5965_p12 = pneg %p5964_p0 }
0x1ee1   : > { %3922 = vrot.lane.b32.xlu1 %v3801_v16, %s7276_s6 }
0x1ee2   : > { %v5045_v18 = vpop.f32.mrf.mxu1  ;;  %p5972_p9 = pnand %p5971_p11, %p5965_p12 }
0x1ee4   : > { %v3804_v20 = vpop.f32.mrf.mxu1 }
0x1ee6   : > { %v5046_v51 = vpop.f32.mrf.mxu1 }
0x1ee8   : > { %v3911_v21 = vpop.f32.mrf.mxu1 }
0x1ee9   : > { %3926 = vrot.lane.b32.xlu0 %v3911_v21, %s7277_s22  ;;  %s4225_s22 = scalar_lea.hbm %s7288_s14, %s4662_s9 }
0x1eea   : > { %v5057_v22 = vpop.f32.mrf.mxu1 }
0x1eec   : > { %v3914_v23 = vpop.f32.mrf.mxu1 }
0x1eee   : > { %v5058_v24 = vpop.f32.mrf.mxu1 }
0x1f4b   : > { %v3919_v25 = vpop.permute.xlu0 %3918 }
0x1f4c   : > { %v3929_v27 = vsel %vm1219_vm4, %v3580_v5, %v3919_v25 }
0x1f53   : > { %v3923_v26 = vpop.permute.xlu1 %3922 }
0x1f54   : > { %v3930_v28 = vsel %vm1671_vm6, %v3929_v27, %v3923_v26 }
0x1f5b   : > { %v3927_v17 = vpop.permute.xlu0 %3926 }
0x1f5c   : > { %v3931_v0 = vsel %vm1673_vm7, %v3930_v28, %v3927_v17 }
0x1f5d   : > { %v3932_v29 = vpack.c.bf16 %v3931_v0, %v3931_v0 }
0x1f5f   : > { %5064 = vmatmul.mubr.msk.bf16.vlgmr.msra.gmra.mxu0 %vm1104_vm0, %v3932_v29  ;;  %v5464_v29 = vld [vmem:[#allocation29] ss:$0 sm:$0xff] }
0x1f60   : > { %5083 = vmatprep.mubr.msk.bf16.mxu0 %vm6088_vm1, %v6087_v8 }
0x201f   : > { %v3988_v31 = vpop.f32.mrf.mxu0 }
0x2020   : > { %v3989_v32 = vadd.f32 %v4637_v33, %v3988_v31 }
0x2021   : > { %v5065_v34 = vpop.f32.mrf.mxu0 }
0x2022   : > { %v3994_v35 = vadd.f32 %v3989_v32, %v6959_v7  ;;  %v5362_v7 = vld [vmem:[%s7278_s1 + $0x38] sm:$0xff]   ;;  %v5465_v34 = vld [vmem:[#allocation31] ss:$0 sm:$0xff] }
0x2023   : > { %v3991_v30 = vpop.f32.mrf.mxu0  ;;  %5076 = vmatpush3.bf16.msra.mxu0 %v5362_v7 }
0x2024   : > { %v3999_v36 = vsel %vm1104_vm0, %v3994_v35, 0.0  ;;  %5077 = vmatprep.subr.bf16.mxu0 %v6087_v8 }
0x2025   : > { %4000 = vadd.xlane.f32.xlu1 %v3999_v36  ;;  %v5066_v37 = vpop.f32.mrf.mxu0 }
0x2027   : > { %5078 = vmatpush3.bf16.msra.mxu0 %v5363_v46 }
0x2028   : > { %5079 = vmatprep.subr.bf16.mxu0 %v6087_v8 }
0x202b   : > { %5080 = vmatpush3.bf16.msra.mxu0 %v5364_v62 }
0x202c   : > { %5081 = vmatprep.subr.bf16.mxu0 %v6087_v8 }
0x202f   : > { %5082 = vmatpush3.bf16.msra.mxu0 %v5365_v63 }
0x20ae   : > { %v4001_v38 = vpop.xlane.xlu1 %4000 }
0x20af   : > { %v4002_v40 = vmul.f32 0.03125, %v4001_v38 }
0x20b1   : > { %v4003_v41 = vsub.f32 %v3994_v35, %v4002_v40 }
0x20b3   : > { %v4004_v42 = vmul.f32 %v4003_v41, %v4003_v41  ;;  %v4022_v58 = vmul.f32 %v4641_v57, %v4003_v41 }
0x20b5   : > { %v4005_v43 = vsel %vm1104_vm0, %v4004_v42, 0.0 }
0x20b6   : > { %4006 = vadd.xlane.f32.xlu0 %v4005_v43 }
0x213f   : > { %v4007_v47 = vpop.xlane.xlu0 %4006 }
0x2140   : > { %v4008_v48 = vmul.f32 0.032258064, %v4007_v47 }
0x2142   : > { %5454 = vrsqrt.f32 %v4008_v48  ;;  %vm4011_vm1 = vcmp.eq.f32.partialorder %v4008_v48, inf  ;;  %v4014_v53 = vand.u32 2147483648, %v4008_v48  ;;  %vm4013_vm4 = vcmp.eq.f32.partialorder %v4008_v48, 0.0 }
0x214f   : > { %v5455_v49 = vpop.eup %5454 }
0x2150   : > { %v4010_v50 = vmul.f32 %v5455_v49, %v4008_v48 }
0x2152   : > { %v4012_v54 = vsel %vm4011_vm1, %v4008_v48, %v4010_v50 }
0x2153   : > { %v4015_v55 = vsel %vm4013_vm4, %v4014_v53, %v4012_v54 }
0x2154   : > { %v4023_v56 = vadd.f32 1e-06, %v4015_v55 }
0x2156   : > { %5456 = vrcp.f32 %v4023_v56 }
0x2163   : > { %v5457_v59 = vpop.eup %5456 }
0x2164   : > { %v4025_v60 = vmul.f32 %v5457_v59, %v4022_v58 }
0x2166   : > { %v4032_v19 = vadd.f32 %v4642_v39, %v4025_v60 }
0x2168   : > { %v4033_v61 = vpack.c.bf16 %v4032_v19, %v4032_v19 }
0x216a   : > { %5072 = vmatmul.mubr.msk.bf16.vlgmr.msra.gmra.mxu1 %vm1104_vm0, %v4033_v61 }
0x222a   : > { %v4096_v2 = vpop.f32.mrf.mxu1 }
0x222b   : > { %v4097_v3 = vadd.f32 %v4643_v1, %v4096_v2 }
0x222c   : > { %v5073_v4 = vpop.f32.mrf.mxu1 }
0x222d   : > { %v4102_v5 = vmax.f32 %v4097_v3, 0.0 }
0x222e   : > { %v4099_v52 = vpop.f32.mrf.mxu1 }
0x222f   : > { %v4103_v6 = vpack.c.bf16 %v4102_v5, %v4102_v5 }
0x2230   : > { %v5074_v9 = vpop.f32.mrf.mxu1 }
0x2231   : > { %5084 = vmatmul.mubr.msk.bf16.vlgmr.msra.gmra.mxu0 %vm2575_vm12, %v4103_v6 }
0x22f1   : > { %v4174_v10 = vpop.f32.mrf.mxu0 }
0x22f2   : > { %v4180_v12 = vadd.f32 %v4174_v10, %v3994_v35 }
0x22f3   : > { %v5085_v13 = vpop.f32.mrf.mxu0 }
0x22f4   : > { %v4189_v8 = vadd.f32 %v4660_v11, %v4180_v12 }
0x22f5   : > { %v4177_v14 = vpop.f32.mrf.mxu0 }
0x22f6   : > { %v4190_v15 = vsel %vm1104_vm0, %v4189_v8, 0.0 }
0x22f7   : > { %4191 = vadd.xlane.f32.xlu0 %v4190_v15  ;;  %v5086_v16 = vpop.f32.mrf.mxu0 }
0x2380   : > { %v4192_v18 = vpop.xlane.xlu0 %4191 }
0x2381   : > { %v4193_v20 = vmul.f32 0.03125, %v4192_v18 }
0x2383   : > { %v4194_v51 = vsub.f32 %v4189_v8, %v4193_v20 }
0x2385   : > { %v4195_v21 = vmul.f32 %v4194_v51, %v4194_v51  ;;  %v4207_v33 = vmul.f32 %v5464_v29, %v4194_v51 }
0x2387   : > { %v4196_v22 = vsel %vm1104_vm0, %v4195_v21, 0.0 }
0x2388   : > { %4197 = vadd.xlane.f32.xlu1 %v4196_v22 }
0x2411   : > { %v4198_v23 = vpop.xlane.xlu1 %4197 }
0x2412   : > { %v4199_v24 = vmul.f32 0.032258064, %v4198_v23 }
0x2414   : > { %5458 = vrsqrt.f32 %v4199_v24  ;;  %vm4202_vm5 = vcmp.eq.f32.partialorder %v4199_v24, inf  ;;  %v4205_v27 = vand.u32 2147483648, %v4199_v24  ;;  %vm4204_vm6 = vcmp.eq.f32.partialorder %v4199_v24, 0.0 }
0x2421   : > { %v5459_v25 = vpop.eup %5458 }
0x2422   : > { %v4201_v26 = vmul.f32 %v5459_v25, %v4199_v24 }
0x2424   : > { %v4203_v28 = vsel %vm4202_vm5, %v4199_v24, %v4201_v26 }
0x2425   : > { %v4206_v17 = vsel %vm4204_vm6, %v4205_v27, %v4203_v28 }
0x2426   : > { %v4208_v0 = vadd.f32 1e-06, %v4206_v17 }
0x2428   : > { %5460 = vrcp.f32 %v4208_v0 }
0x2435   : > { %v5461_v31 = vpop.eup %5460 }
0x2436   : > { %v4210_v32 = vmul.f32 %v5461_v31, %v4207_v33 }
0x2438   : > { %v4211_v35 = vadd.f32 %v5465_v34, %v4210_v32 }
0x243a   : > { %4212 = vst.msk [vmem:[%s1087_s21] sm:$0xff] %vm1104_vm0, %v4211_v35 }
0x243b   : > { %5975 = shalt.err (!%p5972_p9)
}
0x243c   : > { %s5976_s15 = scalar_lea.hbm %s4225_s22, 128  ;;  %s5980_s19 = scalar_lea.hbm %s7288_s14, 256 }
0x243d   : > { %p5977_p1 = scmp.ne.s32.totalorder %s4225_s22, %s5976_s15  ;;  %p5981_p6 = scmp.lt.s32.totalorder %s4225_s22, %s7288_s14 }
0x243e   : > { %p5982_p5 = scmp.lt.s32.totalorder %s5980_s19, %s5976_s15 }
0x243f   : > { %p5978_p3 = pnand %p5977_p1, %p7289_p10 }
0x2440   : > { %p5983_p8 = por %p5982_p5, %p5981_p6 }
0x2441   : > { %p5979_p4 = pneg %p5978_p3 }
0x2443   : > { %p5984_p7 = pnand %p5983_p8, %p5979_p4 }
0x2445   : > { %5987 = shalt.err (!%p5984_p7)
}
0x2446   : > { %5161 = dma.vmem_to_hbm [thread:$0]  (%p7289_p10), %s4228_s23, 128, %s4225_s22, %s4214_s17  }
0x2447 PF: > { %s4239_s21 = sand.u32 1, %s6050_s27   ;;  %p7290_p0 = scmp.ne.s32.totalorder %s7242_s8, 0 }
0x2448   : > { %p7291_p12 = scmp.ge.s32.totalorder %s6062_s28, 2  ;;  %s4240_s16 = scalar_lea.sflag [#allocation4], %s4239_s21 }
0x244a   : > { %p5223_p13 = pnand %p7291_p12, %p7290_p0 }
0x244c   : > { %p5224_p2 = pneg %p5223_p13 }
0x244e   : > { %6045 = dma.done.wait (%p5224_p2), %s4240_s16, 128  }
0x244f   : > { %6047 = vsyncadd (%p5224_p2), %s4240_s16, 4294967168  ;;  %p48_p11 = scmp.ge.s32.totalorder %s6474_s2, 4   ;;  %s7292_s27 = smov %s6054_s3 }
0x2450   : > { %s7293_s3 = smov %s6058_s7  ;;  %s7294_s7 = smov %s6485_s10 }
0x2451   : > { %s7295_s28 = smov %s6474_s2  ;;  %50 = sbr.rel (!%p48_p11) target bundleno = 40 (0x28), region = 267 }
0x2456   :  { %4245 = vsyncpa [#allocation3], 1 }
0x2457   :  { %4247 = vsyncpa [#allocation3 + $0x1], 1 }
0x2458   :  { %4248 = vsyncpa [#allocation6], 1 }
0x2459   :  { %4249 = vsyncpa [#allocation9], 1 }
0x245a   :  { %4250 = vsyncpa [#allocation12], 1 }
0x245b   :  { %4251 = vsyncpa [#allocation15], 1 }
0x245c   :  { %4252 = vsyncpa [#allocation18], 1 }
0x245d   :  { %4253 = vsyncpa [#allocation21], 1 }
0x245e   :  { %4254 = vsyncpa [#allocation24], 1 }
0x245f   :  { %4255 = vsyncpa [#allocation27], 1 }
0x2460   :  { %4256 = vsyncpa [#allocation30], 1 }
0x2461   :  { %4257 = vsyncpa [#allocation4], 1 }
0x2462   :  { %4259 = vsyncpa [#allocation4 + $0x1], 1 }

</bundles_post_ra>
